<compile_context>
chip_gen: v7x
topology: tpu7x:2x2x1
jax: 0.10.0
libtpu: 0.0.40
codegen_flags: <defaults>
</compile_context>

<pallas_src>
import jax
import jax.numpy as jnp
from jax.experimental import pallas as pl
from jax.experimental.pallas import tpu as pltpu

N_LAYERS = 7
BN_EPS = 1e-5


# --------------------------------------------------------------------------
# Kernel: whole-model forward for one batch tile.
# --------------------------------------------------------------------------
def dfs_kernel(x_ref, gate_ref, w1_ref, w2_ref, b1_ref, b2_ref, o_ref):
    """
    x_ref:    (TB, n_in)        input activations (batch tile)
    gate_ref: (1, n_in)         precomputed eval-mode gate  w * (w >= w_thresh)
    w1_ref:   (L, n_in, n32)    first linear (pre-transposed), BN scale folded in
    w2_ref:   (L, n32, n_in)    second linear (pre-transposed), BN scale folded in
    b1_ref:   (L, 1, n32)       folded BatchNorm1d(n32) shift
    b2_ref:   (L, 1, n_in)      folded BatchNorm1d(n_in) shift
    o_ref:    (TB, n_in)        output
    """
    h = x_ref[...].astype(jnp.float32) * gate_ref[...]       # (TB, n_in), f32
    wdt = w1_ref.dtype                                        # f32 or bf16 (glue choice)

    for l in range(N_LAYERS):
        # Linear(n_in -> n32) with BN scale folded (plain NN matmul, no transpose).
        y = jnp.dot(h.astype(wdt), w1_ref[l],
                    preferred_element_type=jnp.float32)       # (TB, n32)
        # BN shift + ReLU
        y = jnp.maximum(y + b1_ref[l], 0.0)
        # Linear(n32 -> n_in) with BN scale folded.
        z = jnp.dot(y.astype(wdt), w2_ref[l],
                    preferred_element_type=jnp.float32)       # (TB, n_in)
        # BN shift + residual add (residual stream stays f32)
        h = h + z + b2_ref[l]
        # activation_last: ReLU for all but the final residual layer
        if l < N_LAYERS - 1:
            h = jnp.maximum(h, 0.0)

    o_ref[...] = h.astype(o_ref.dtype)


# --------------------------------------------------------------------------
# Glue: fold eval-mode BatchNorm + gate into kernel-friendly parameters.
# --------------------------------------------------------------------------
def fold_params(w, w_thresh, W1, W2,
                gamma1, beta1, mean1, var1,
                gamma2, beta2, mean2, var2,
                weight_dtype=jnp.float32):
    """W1: (L, n32, n_in) PyTorch (out,in);  W2: (L, n_in, n32) PyTorch (out,in)."""
    L, n32, n_in = W1.shape

    gate = (w * (w >= jnp.asarray(w_thresh, w.dtype)).astype(w.dtype))
    gate = gate.astype(jnp.float32).reshape(1, n_in)

    s1 = gamma1 / jnp.sqrt(var1 + BN_EPS)              # (L, n32)
    b1 = beta1 - mean1 * s1                            # (L, n32)
    s2 = gamma2 / jnp.sqrt(var2 + BN_EPS)              # (L, n_in)
    b2 = beta2 - mean2 * s2                            # (L, n_in)

    # Fold BN scale over the output channel; pre-transpose so both in-kernel
    # matmuls are plain NN (contract last-of-LHS vs first-of-RHS).
    W1f = jnp.transpose(W1 * s1[:, :, None], (0, 2, 1)).astype(weight_dtype)  # (L, n_in, n32)
    W2f = jnp.transpose(W2 * s2[:, :, None], (0, 2, 1)).astype(weight_dtype)  # (L, n32, n_in)

    b1f = b1.reshape(L, 1, n32).astype(jnp.float32)
    b2f = b2.reshape(L, 1, n_in).astype(jnp.float32)
    return gate, W1f, W2f, b1f, b2f


# --------------------------------------------------------------------------
# Wrapper: batch-tiled pallas_call with VMEM-resident weights, no input pad.
# --------------------------------------------------------------------------
def dfs_forward(x, gate, W1f, W2f, b1f, b2f, *, block_b=512, min_grid=2):
    B, n_in = x.shape
    L, _, n32 = W1f.shape

    # Largest sublane-aligned batch tile that still leaves >= min_grid grid
    # steps (v7x has 2 TensorCores; "parallel" only helps with >= 2 steps, and
    # >= 2 steps keeps x/out DMA pipelined behind compute).
    tb = min(int(block_b), max(8, ((pl.cdiv(B, min_grid) + 7) // 8) * 8))
    tb = min(tb, ((B + 7) // 8) * 8)
    grid = (pl.cdiv(B, tb),)          # final block may be partial (rows independent)

    # --- VMEM budget -------------------------------------------------------
    w_item = jnp.dtype(W1f.dtype).itemsize
    io_item = jnp.dtype(x.dtype).itemsize
    resident_bytes = (W1f.size + W2f.size) * w_item \
        + (b1f.size + b2f.size + gate.size) * 4
    # Constant-index BlockSpecs are still double-buffered by default -> 2x.
    # TODO(synk): pipeline_mode=pl.Buffered(1) on the weight specs halves this.
    resident_budget = 2 * resident_bytes
    tile_io_bytes = 2 * 2 * tb * n_in * io_item          # x + out, double-buffered
    # Cap at 56 MiB: safe on v7x (64 MiB/TC) and plenty on v5e/v6e (128 MiB).
    vmem_limit = int(min(56 * 2**20,
                         max(32 * 2**20,
                             resident_budget + tile_io_bytes + 8 * 2**20)))

    cost = pl.CostEstimate(
        flops=4 * N_LAYERS * B * n_in * n32,             # 2 matmuls/layer
        transcendentals=0,
        bytes_accessed=resident_bytes + 2 * B * n_in * io_item)

    const3 = lambda b: (0, 0, 0)
    out = pl.pallas_call(
        dfs_kernel,
        out_shape=jax.ShapeDtypeStruct((B, n_in), x.dtype),
        grid=grid,
        in_specs=[
            pl.BlockSpec((tb, n_in), lambda b: (b, 0)),       # x tile (streamed)
            pl.BlockSpec((1, n_in), lambda b: (0, 0)),        # gate (resident)
            pl.BlockSpec((L, n_in, n32), const3),             # W1 (folded, resident)
            pl.BlockSpec((L, n32, n_in), const3),             # W2 (folded, resident)
            pl.BlockSpec((L, 1, n32), const3),                # b1
            pl.BlockSpec((L, 1, n_in), const3),               # b2
        ],
        out_specs=pl.BlockSpec((tb, n_in), lambda b: (b, 0)),
        compiler_params=pltpu.CompilerParams(
            dimension_semantics=("parallel",),
            vmem_limit_bytes=vmem_limit),
        cost_estimate=cost,
    )(x, gate, W1f, W2f, b1f, b2f)

    return out


# --------------------------------------------------------------------------
# Pure-JAX reference (unfolded params, same eval-mode semantics).
# --------------------------------------------------------------------------
def ref_forward(x, w, w_thresh, W1, W2,
                gamma1, beta1, mean1, var1,
                gamma2, beta2, mean2, var2):
    gate = w * (w >= w_thresh).astype(x.dtype)
    h = x * gate
    for l in range(N_LAYERS):
        y = h @ W1[l].T
        y = (y - mean1[l]) / jnp.sqrt(var1[l] + BN_EPS) * gamma1[l] + beta1[l]
        y = jnp.maximum(y, 0.0)
        z = y @ W2[l].T
        z = (z - mean2[l]) / jnp.sqrt(var2[l] + BN_EPS) * gamma2[l] + beta2[l]
        h = h + z
        if l < N_LAYERS - 1:
            h = jnp.maximum(h, 0.0)
    return h


if __name__ == "__main__":
    key = jax.random.PRNGKey(0)

    B = 200                      # deliberately not a multiple of the tile
    n_in = 128
    n32 = n_in // 32             # 4
    w_init = 1.0
    w_thresh = 0.01

    # --- deterministic parameter init (mirrors Model.__init__ / weights_init) ---
    w = jnp.full((n_in,), w_init, jnp.float32)     # nn.init.constant_(w, w_init)

    keys = jax.random.split(key, 1 + 8 * N_LAYERS)
    kx, kp = keys[0], keys[1:]

    # Linear / BatchNorm weights ~ N(0, 0.2); BN beta = 0.
    W1 = jnp.stack([0.2 * jax.random.normal(kp[8 * l + 0], (n32, n_in), jnp.float32)
                    for l in range(N_LAYERS)])                # (L, n32, n_in) (out, in)
    W2 = jnp.stack([0.2 * jax.random.normal(kp[8 * l + 1], (n_in, n32), jnp.float32)
                    for l in range(N_LAYERS)])                # (L, n_in, n32) (out, in)
    gamma1 = jnp.stack([0.2 * jax.random.normal(kp[8 * l + 2], (n32,), jnp.float32)
                        for l in range(N_LAYERS)])
    gamma2 = jnp.stack([0.2 * jax.random.normal(kp[8 * l + 3], (n_in,), jnp.float32)
                        for l in range(N_LAYERS)])
    beta1 = jnp.zeros((N_LAYERS, n32), jnp.float32)
    beta2 = jnp.zeros((N_LAYERS, n_in), jnp.float32)
    # Non-trivial running statistics to exercise the eval-mode BN fold.
    mean1 = jnp.stack([0.1 * jax.random.normal(kp[8 * l + 4], (n32,), jnp.float32)
                       for l in range(N_LAYERS)])
    var1 = jnp.stack([1.0 + 0.1 * jnp.abs(jax.random.normal(kp[8 * l + 5], (n32,), jnp.float32))
                      for l in range(N_LAYERS)])
    mean2 = jnp.stack([0.1 * jax.random.normal(kp[8 * l + 6], (n_in,), jnp.float32)
                       for l in range(N_LAYERS)])
    var2 = jnp.stack([1.0 + 0.1 * jnp.abs(jax.random.normal(kp[8 * l + 7], (n_in,), jnp.float32))
                      for l in range(N_LAYERS)])

    # --- input ---
    x = jax.random.normal(kx, (B, n_in), jnp.float32)

    # --- glue: fold BN + gate; weights stay f32 here so the self-test is tight
    #     (use weight_dtype=jnp.bfloat16 on v6e/v7x for 2x MXU rate / half VMEM,
    #      with looser ~1e-2 tolerances). ---
    gate, W1f, W2f, b1f, b2f = fold_params(
        w, w_thresh, W1, W2,
        gamma1, beta1, mean1, var1,
        gamma2, beta2, mean2, var2,
        weight_dtype=jnp.float32)

    # --- run kernel (block_b request is large; wrapper clamps to keep grid >= 2) ---
    out = dfs_forward(x, gate, W1f, W2f, b1f, b2f, block_b=512)
    out = jax.block_until_ready(out)

    # --- check against pure-JAX reference ---
    ref = ref_forward(x, w, w_thresh, W1, W2,
                      gamma1, beta1, mean1, var1,
                      gamma2, beta2, mean2, var2)
    assert out.shape == (B, n_in)
    assert jnp.allclose(out, ref, rtol=1e-4, atol=1e-4), "mismatch vs reference"

    print("KERNEL_OK")
</pallas_src>

<mosaic_0001>
module attributes {stable_mosaic.version = 11 : i64} {
  func.func @dfs_kernel(%arg0: i32, %arg1: memref<104x128xf32, #tpu.memory_space<vmem>>, %arg2: memref<1x128xf32, #tpu.memory_space<vmem>>, %arg3: memref<7x128x4xf32, #tpu.memory_space<vmem>>, %arg4: memref<7x4x128xf32, #tpu.memory_space<vmem>>, %arg5: memref<7x1x4xf32, #tpu.memory_space<vmem>>, %arg6: memref<7x1x128xf32, #tpu.memory_space<vmem>>, %arg7: memref<104x128xf32, #tpu.memory_space<vmem>>) attributes {dimension_semantics = [#tpu.dimension_semantics<parallel>], iteration_bounds = array<i64: 2>, scalar_prefetch = 0 : i64, scratch_operands = 0 : i64, tpu.core_type = #tpu.core_type<tc>, window_params = [{transform_indices = @transform_0, window_bounds = array<i64: 104, 128>}, {pipeline_mode = #tpu.pipeline_mode<synchronous>, transform_indices = @transform_1, window_bounds = array<i64: 1, 128>}, {pipeline_mode = #tpu.pipeline_mode<synchronous>, transform_indices = @transform_2, window_bounds = array<i64: 7, 128, 4>}, {pipeline_mode = #tpu.pipeline_mode<synchronous>, transform_indices = @transform_3, window_bounds = array<i64: 7, 4, 128>}, {pipeline_mode = #tpu.pipeline_mode<synchronous>, transform_indices = @transform_4, window_bounds = array<i64: 7, 1, 4>}, {pipeline_mode = #tpu.pipeline_mode<synchronous>, transform_indices = @transform_5, window_bounds = array<i64: 7, 1, 128>}, {transform_indices = @transform_6, window_bounds = array<i64: 104, 128>}]} {
    %c0 = arith.constant 0 : index
    %c0_0 = arith.constant 0 : index
    %0 = vector.load %arg1[%c0, %c0_0] : memref<104x128xf32, #tpu.memory_space<vmem>>, vector<104x128xf32>
    %c0_1 = arith.constant 0 : index
    %c0_2 = arith.constant 0 : index
    %1 = vector.load %arg2[%c0_1, %c0_2] : memref<1x128xf32, #tpu.memory_space<vmem>>, vector<1x128xf32>
    %2 = vector.broadcast %1 : vector<1x128xf32> to vector<104x128xf32>
    %3 = arith.mulf %0, %2 : vector<104x128xf32>
    %c0_3 = arith.constant 0 : index
    %c0_4 = arith.constant 0 : index
    %c0_5 = arith.constant 0 : index
    %4 = vector.load %arg3[%c0_3, %c0_4, %c0_5] : memref<7x128x4xf32, #tpu.memory_space<vmem>>, vector<1x128x4xf32>
    %5 = vector.shape_cast %4 : vector<1x128x4xf32> to vector<128x4xf32>
    %cst = arith.constant dense<0.000000e+00> : vector<104x4xf32>
    %6 = tpu.matmul %3, %5, %cst {dimension_numbers = #tpu.dot_dimension_numbers<[1], [0], [0], [1], [0, 0, 1, 1], [], []>} : vector<104x128xf32>, vector<128x4xf32>, vector<104x4xf32> -> vector<104x4xf32>
    %c0_6 = arith.constant 0 : index
    %c0_7 = arith.constant 0 : index
    %c0_8 = arith.constant 0 : index
    %7 = vector.load %arg5[%c0_6, %c0_7, %c0_8] : memref<7x1x4xf32, #tpu.memory_space<vmem>>, vector<1x1x4xf32>
    %8 = vector.shape_cast %7 : vector<1x1x4xf32> to vector<1x4xf32>
    %9 = vector.broadcast %8 : vector<1x4xf32> to vector<104x4xf32>
    %10 = arith.addf %6, %9 : vector<104x4xf32>
    %cst_9 = arith.constant 0.000000e+00 : f32
    %11 = vector.broadcast %cst_9 : f32 to vector<104x4xf32>
    %12 = arith.maximumf %10, %11 : vector<104x4xf32>
    %c0_10 = arith.constant 0 : index
    %c0_11 = arith.constant 0 : index
    %c0_12 = arith.constant 0 : index
    %13 = vector.load %arg4[%c0_10, %c0_11, %c0_12] : memref<7x4x128xf32, #tpu.memory_space<vmem>>, vector<1x4x128xf32>
    %14 = vector.shape_cast %13 : vector<1x4x128xf32> to vector<4x128xf32>
    %cst_13 = arith.constant dense<0.000000e+00> : vector<104x128xf32>
    %15 = tpu.matmul %12, %14, %cst_13 {dimension_numbers = #tpu.dot_dimension_numbers<[1], [0], [0], [1], [0, 0, 1, 1], [], []>} : vector<104x4xf32>, vector<4x128xf32>, vector<104x128xf32> -> vector<104x128xf32>
    %16 = arith.addf %3, %15 : vector<104x128xf32>
    %c0_14 = arith.constant 0 : index
    %c0_15 = arith.constant 0 : index
    %c0_16 = arith.constant 0 : index
    %17 = vector.load %arg6[%c0_14, %c0_15, %c0_16] : memref<7x1x128xf32, #tpu.memory_space<vmem>>, vector<1x1x128xf32>
    %18 = vector.shape_cast %17 : vector<1x1x128xf32> to vector<1x128xf32>
    %19 = vector.broadcast %18 : vector<1x128xf32> to vector<104x128xf32>
    %20 = arith.addf %16, %19 : vector<104x128xf32>
    %cst_17 = arith.constant 0.000000e+00 : f32
    %21 = vector.broadcast %cst_17 : f32 to vector<104x128xf32>
    %22 = arith.maximumf %20, %21 : vector<104x128xf32>
    %c1 = arith.constant 1 : index
    %c0_18 = arith.constant 0 : index
    %c0_19 = arith.constant 0 : index
    %23 = vector.load %arg3[%c1, %c0_18, %c0_19] : memref<7x128x4xf32, #tpu.memory_space<vmem>>, vector<1x128x4xf32>
    %24 = vector.shape_cast %23 : vector<1x128x4xf32> to vector<128x4xf32>
    %cst_20 = arith.constant dense<0.000000e+00> : vector<104x4xf32>
    %25 = tpu.matmul %22, %24, %cst_20 {dimension_numbers = #tpu.dot_dimension_numbers<[1], [0], [0], [1], [0, 0, 1, 1], [], []>} : vector<104x128xf32>, vector<128x4xf32>, vector<104x4xf32> -> vector<104x4xf32>
    %c1_21 = arith.constant 1 : index
    %c0_22 = arith.constant 0 : index
    %c0_23 = arith.constant 0 : index
    %26 = vector.load %arg5[%c1_21, %c0_22, %c0_23] : memref<7x1x4xf32, #tpu.memory_space<vmem>>, vector<1x1x4xf32>
    %27 = vector.shape_cast %26 : vector<1x1x4xf32> to vector<1x4xf32>
    %28 = vector.broadcast %27 : vector<1x4xf32> to vector<104x4xf32>
    %29 = arith.addf %25, %28 : vector<104x4xf32>
    %cst_24 = arith.constant 0.000000e+00 : f32
    %30 = vector.broadcast %cst_24 : f32 to vector<104x4xf32>
    %31 = arith.maximumf %29, %30 : vector<104x4xf32>
    %c1_25 = arith.constant 1 : index
    %c0_26 = arith.constant 0 : index
    %c0_27 = arith.constant 0 : index
    %32 = vector.load %arg4[%c1_25, %c0_26, %c0_27] : memref<7x4x128xf32, #tpu.memory_space<vmem>>, vector<1x4x128xf32>
    %33 = vector.shape_cast %32 : vector<1x4x128xf32> to vector<4x128xf32>
    %cst_28 = arith.constant dense<0.000000e+00> : vector<104x128xf32>
    %34 = tpu.matmul %31, %33, %cst_28 {dimension_numbers = #tpu.dot_dimension_numbers<[1], [0], [0], [1], [0, 0, 1, 1], [], []>} : vector<104x4xf32>, vector<4x128xf32>, vector<104x128xf32> -> vector<104x128xf32>
    %35 = arith.addf %22, %34 : vector<104x128xf32>
    %c1_29 = arith.constant 1 : index
    %c0_30 = arith.constant 0 : index
    %c0_31 = arith.constant 0 : index
    %36 = vector.load %arg6[%c1_29, %c0_30, %c0_31] : memref<7x1x128xf32, #tpu.memory_space<vmem>>, vector<1x1x128xf32>
    %37 = vector.shape_cast %36 : vector<1x1x128xf32> to vector<1x128xf32>
    %38 = vector.broadcast %37 : vector<1x128xf32> to vector<104x128xf32>
    %39 = arith.addf %35, %38 : vector<104x128xf32>
    %cst_32 = arith.constant 0.000000e+00 : f32
    %40 = vector.broadcast %cst_32 : f32 to vector<104x128xf32>
    %41 = arith.maximumf %39, %40 : vector<104x128xf32>
    %c2 = arith.constant 2 : index
    %c0_33 = arith.constant 0 : index
    %c0_34 = arith.constant 0 : index
    %42 = vector.load %arg3[%c2, %c0_33, %c0_34] : memref<7x128x4xf32, #tpu.memory_space<vmem>>, vector<1x128x4xf32>
    %43 = vector.shape_cast %42 : vector<1x128x4xf32> to vector<128x4xf32>
    %cst_35 = arith.constant dense<0.000000e+00> : vector<104x4xf32>
    %44 = tpu.matmul %41, %43, %cst_35 {dimension_numbers = #tpu.dot_dimension_numbers<[1], [0], [0], [1], [0, 0, 1, 1], [], []>} : vector<104x128xf32>, vector<128x4xf32>, vector<104x4xf32> -> vector<104x4xf32>
    %c2_36 = arith.constant 2 : index
    %c0_37 = arith.constant 0 : index
    %c0_38 = arith.constant 0 : index
    %45 = vector.load %arg5[%c2_36, %c0_37, %c0_38] : memref<7x1x4xf32, #tpu.memory_space<vmem>>, vector<1x1x4xf32>
    %46 = vector.shape_cast %45 : vector<1x1x4xf32> to vector<1x4xf32>
    %47 = vector.broadcast %46 : vector<1x4xf32> to vector<104x4xf32>
    %48 = arith.addf %44, %47 : vector<104x4xf32>
    %cst_39 = arith.constant 0.000000e+00 : f32
    %49 = vector.broadcast %cst_39 : f32 to vector<104x4xf32>
    %50 = arith.maximumf %48, %49 : vector<104x4xf32>
    %c2_40 = arith.constant 2 : index
    %c0_41 = arith.constant 0 : index
    %c0_42 = arith.constant 0 : index
    %51 = vector.load %arg4[%c2_40, %c0_41, %c0_42] : memref<7x4x128xf32, #tpu.memory_space<vmem>>, vector<1x4x128xf32>
    %52 = vector.shape_cast %51 : vector<1x4x128xf32> to vector<4x128xf32>
    %cst_43 = arith.constant dense<0.000000e+00> : vector<104x128xf32>
    %53 = tpu.matmul %50, %52, %cst_43 {dimension_numbers = #tpu.dot_dimension_numbers<[1], [0], [0], [1], [0, 0, 1, 1], [], []>} : vector<104x4xf32>, vector<4x128xf32>, vector<104x128xf32> -> vector<104x128xf32>
    %54 = arith.addf %41, %53 : vector<104x128xf32>
    %c2_44 = arith.constant 2 : index
    %c0_45 = arith.constant 0 : index
    %c0_46 = arith.constant 0 : index
    %55 = vector.load %arg6[%c2_44, %c0_45, %c0_46] : memref<7x1x128xf32, #tpu.memory_space<vmem>>, vector<1x1x128xf32>
    %56 = vector.shape_cast %55 : vector<1x1x128xf32> to vector<1x128xf32>
    %57 = vector.broadcast %56 : vector<1x128xf32> to vector<104x128xf32>
    %58 = arith.addf %54, %57 : vector<104x128xf32>
    %cst_47 = arith.constant 0.000000e+00 : f32
    %59 = vector.broadcast %cst_47 : f32 to vector<104x128xf32>
    %60 = arith.maximumf %58, %59 : vector<104x128xf32>
    %c3 = arith.constant 3 : index
    %c0_48 = arith.constant 0 : index
    %c0_49 = arith.constant 0 : index
    %61 = vector.load %arg3[%c3, %c0_48, %c0_49] : memref<7x128x4xf32, #tpu.memory_space<vmem>>, vector<1x128x4xf32>
    %62 = vector.shape_cast %61 : vector<1x128x4xf32> to vector<128x4xf32>
    %cst_50 = arith.constant dense<0.000000e+00> : vector<104x4xf32>
    %63 = tpu.matmul %60, %62, %cst_50 {dimension_numbers = #tpu.dot_dimension_numbers<[1], [0], [0], [1], [0, 0, 1, 1], [], []>} : vector<104x128xf32>, vector<128x4xf32>, vector<104x4xf32> -> vector<104x4xf32>
    %c3_51 = arith.constant 3 : index
    %c0_52 = arith.constant 0 : index
    %c0_53 = arith.constant 0 : index
    %64 = vector.load %arg5[%c3_51, %c0_52, %c0_53] : memref<7x1x4xf32, #tpu.memory_space<vmem>>, vector<1x1x4xf32>
    %65 = vector.shape_cast %64 : vector<1x1x4xf32> to vector<1x4xf32>
    %66 = vector.broadcast %65 : vector<1x4xf32> to vector<104x4xf32>
    %67 = arith.addf %63, %66 : vector<104x4xf32>
    %cst_54 = arith.constant 0.000000e+00 : f32
    %68 = vector.broadcast %cst_54 : f32 to vector<104x4xf32>
    %69 = arith.maximumf %67, %68 : vector<104x4xf32>
    %c3_55 = arith.constant 3 : index
    %c0_56 = arith.constant 0 : index
    %c0_57 = arith.constant 0 : index
    %70 = vector.load %arg4[%c3_55, %c0_56, %c0_57] : memref<7x4x128xf32, #tpu.memory_space<vmem>>, vector<1x4x128xf32>
    %71 = vector.shape_cast %70 : vector<1x4x128xf32> to vector<4x128xf32>
    %cst_58 = arith.constant dense<0.000000e+00> : vector<104x128xf32>
    %72 = tpu.matmul %69, %71, %cst_58 {dimension_numbers = #tpu.dot_dimension_numbers<[1], [0], [0], [1], [0, 0, 1, 1], [], []>} : vector<104x4xf32>, vector<4x128xf32>, vector<104x128xf32> -> vector<104x128xf32>
    %73 = arith.addf %60, %72 : vector<104x128xf32>
    %c3_59 = arith.constant 3 : index
    %c0_60 = arith.constant 0 : index
    %c0_61 = arith.constant 0 : index
    %74 = vector.load %arg6[%c3_59, %c0_60, %c0_61] : memref<7x1x128xf32, #tpu.memory_space<vmem>>, vector<1x1x128xf32>
    %75 = vector.shape_cast %74 : vector<1x1x128xf32> to vector<1x128xf32>
    %76 = vector.broadcast %75 : vector<1x128xf32> to vector<104x128xf32>
    %77 = arith.addf %73, %76 : vector<104x128xf32>
    %cst_62 = arith.constant 0.000000e+00 : f32
    %78 = vector.broadcast %cst_62 : f32 to vector<104x128xf32>
    %79 = arith.maximumf %77, %78 : vector<104x128xf32>
    %c4 = arith.constant 4 : index
    %c0_63 = arith.constant 0 : index
    %c0_64 = arith.constant 0 : index
    %80 = vector.load %arg3[%c4, %c0_63, %c0_64] : memref<7x128x4xf32, #tpu.memory_space<vmem>>, vector<1x128x4xf32>
    %81 = vector.shape_cast %80 : vector<1x128x4xf32> to vector<128x4xf32>
    %cst_65 = arith.constant dense<0.000000e+00> : vector<104x4xf32>
    %82 = tpu.matmul %79, %81, %cst_65 {dimension_numbers = #tpu.dot_dimension_numbers<[1], [0], [0], [1], [0, 0, 1, 1], [], []>} : vector<104x128xf32>, vector<128x4xf32>, vector<104x4xf32> -> vector<104x4xf32>
    %c4_66 = arith.constant 4 : index
    %c0_67 = arith.constant 0 : index
    %c0_68 = arith.constant 0 : index
    %83 = vector.load %arg5[%c4_66, %c0_67, %c0_68] : memref<7x1x4xf32, #tpu.memory_space<vmem>>, vector<1x1x4xf32>
    %84 = vector.shape_cast %83 : vector<1x1x4xf32> to vector<1x4xf32>
    %85 = vector.broadcast %84 : vector<1x4xf32> to vector<104x4xf32>
    %86 = arith.addf %82, %85 : vector<104x4xf32>
    %cst_69 = arith.constant 0.000000e+00 : f32
    %87 = vector.broadcast %cst_69 : f32 to vector<104x4xf32>
    %88 = arith.maximumf %86, %87 : vector<104x4xf32>
    %c4_70 = arith.constant 4 : index
    %c0_71 = arith.constant 0 : index
    %c0_72 = arith.constant 0 : index
    %89 = vector.load %arg4[%c4_70, %c0_71, %c0_72] : memref<7x4x128xf32, #tpu.memory_space<vmem>>, vector<1x4x128xf32>
    %90 = vector.shape_cast %89 : vector<1x4x128xf32> to vector<4x128xf32>
    %cst_73 = arith.constant dense<0.000000e+00> : vector<104x128xf32>
    %91 = tpu.matmul %88, %90, %cst_73 {dimension_numbers = #tpu.dot_dimension_numbers<[1], [0], [0], [1], [0, 0, 1, 1], [], []>} : vector<104x4xf32>, vector<4x128xf32>, vector<104x128xf32> -> vector<104x128xf32>
    %92 = arith.addf %79, %91 : vector<104x128xf32>
    %c4_74 = arith.constant 4 : index
    %c0_75 = arith.constant 0 : index
    %c0_76 = arith.constant 0 : index
    %93 = vector.load %arg6[%c4_74, %c0_75, %c0_76] : memref<7x1x128xf32, #tpu.memory_space<vmem>>, vector<1x1x128xf32>
    %94 = vector.shape_cast %93 : vector<1x1x128xf32> to vector<1x128xf32>
    %95 = vector.broadcast %94 : vector<1x128xf32> to vector<104x128xf32>
    %96 = arith.addf %92, %95 : vector<104x128xf32>
    %cst_77 = arith.constant 0.000000e+00 : f32
    %97 = vector.broadcast %cst_77 : f32 to vector<104x128xf32>
    %98 = arith.maximumf %96, %97 : vector<104x128xf32>
    %c5 = arith.constant 5 : index
    %c0_78 = arith.constant 0 : index
    %c0_79 = arith.constant 0 : index
    %99 = vector.load %arg3[%c5, %c0_78, %c0_79] : memref<7x128x4xf32, #tpu.memory_space<vmem>>, vector<1x128x4xf32>
    %100 = vector.shape_cast %99 : vector<1x128x4xf32> to vector<128x4xf32>
    %cst_80 = arith.constant dense<0.000000e+00> : vector<104x4xf32>
    %101 = tpu.matmul %98, %100, %cst_80 {dimension_numbers = #tpu.dot_dimension_numbers<[1], [0], [0], [1], [0, 0, 1, 1], [], []>} : vector<104x128xf32>, vector<128x4xf32>, vector<104x4xf32> -> vector<104x4xf32>
    %c5_81 = arith.constant 5 : index
    %c0_82 = arith.constant 0 : index
    %c0_83 = arith.constant 0 : index
    %102 = vector.load %arg5[%c5_81, %c0_82, %c0_83] : memref<7x1x4xf32, #tpu.memory_space<vmem>>, vector<1x1x4xf32>
    %103 = vector.shape_cast %102 : vector<1x1x4xf32> to vector<1x4xf32>
    %104 = vector.broadcast %103 : vector<1x4xf32> to vector<104x4xf32>
    %105 = arith.addf %101, %104 : vector<104x4xf32>
    %cst_84 = arith.constant 0.000000e+00 : f32
    %106 = vector.broadcast %cst_84 : f32 to vector<104x4xf32>
    %107 = arith.maximumf %105, %106 : vector<104x4xf32>
    %c5_85 = arith.constant 5 : index
    %c0_86 = arith.constant 0 : index
    %c0_87 = arith.constant 0 : index
    %108 = vector.load %arg4[%c5_85, %c0_86, %c0_87] : memref<7x4x128xf32, #tpu.memory_space<vmem>>, vector<1x4x128xf32>
    %109 = vector.shape_cast %108 : vector<1x4x128xf32> to vector<4x128xf32>
    %cst_88 = arith.constant dense<0.000000e+00> : vector<104x128xf32>
    %110 = tpu.matmul %107, %109, %cst_88 {dimension_numbers = #tpu.dot_dimension_numbers<[1], [0], [0], [1], [0, 0, 1, 1], [], []>} : vector<104x4xf32>, vector<4x128xf32>, vector<104x128xf32> -> vector<104x128xf32>
    %111 = arith.addf %98, %110 : vector<104x128xf32>
    %c5_89 = arith.constant 5 : index
    %c0_90 = arith.constant 0 : index
    %c0_91 = arith.constant 0 : index
    %112 = vector.load %arg6[%c5_89, %c0_90, %c0_91] : memref<7x1x128xf32, #tpu.memory_space<vmem>>, vector<1x1x128xf32>
    %113 = vector.shape_cast %112 : vector<1x1x128xf32> to vector<1x128xf32>
    %114 = vector.broadcast %113 : vector<1x128xf32> to vector<104x128xf32>
    %115 = arith.addf %111, %114 : vector<104x128xf32>
    %cst_92 = arith.constant 0.000000e+00 : f32
    %116 = vector.broadcast %cst_92 : f32 to vector<104x128xf32>
    %117 = arith.maximumf %115, %116 : vector<104x128xf32>
    %c6 = arith.constant 6 : index
    %c0_93 = arith.constant 0 : index
    %c0_94 = arith.constant 0 : index
    %118 = vector.load %arg3[%c6, %c0_93, %c0_94] : memref<7x128x4xf32, #tpu.memory_space<vmem>>, vector<1x128x4xf32>
    %119 = vector.shape_cast %118 : vector<1x128x4xf32> to vector<128x4xf32>
    %cst_95 = arith.constant dense<0.000000e+00> : vector<104x4xf32>
    %120 = tpu.matmul %117, %119, %cst_95 {dimension_numbers = #tpu.dot_dimension_numbers<[1], [0], [0], [1], [0, 0, 1, 1], [], []>} : vector<104x128xf32>, vector<128x4xf32>, vector<104x4xf32> -> vector<104x4xf32>
    %c6_96 = arith.constant 6 : index
    %c0_97 = arith.constant 0 : index
    %c0_98 = arith.constant 0 : index
    %121 = vector.load %arg5[%c6_96, %c0_97, %c0_98] : memref<7x1x4xf32, #tpu.memory_space<vmem>>, vector<1x1x4xf32>
    %122 = vector.shape_cast %121 : vector<1x1x4xf32> to vector<1x4xf32>
    %123 = vector.broadcast %122 : vector<1x4xf32> to vector<104x4xf32>
    %124 = arith.addf %120, %123 : vector<104x4xf32>
    %cst_99 = arith.constant 0.000000e+00 : f32
    %125 = vector.broadcast %cst_99 : f32 to vector<104x4xf32>
    %126 = arith.maximumf %124, %125 : vector<104x4xf32>
    %c6_100 = arith.constant 6 : index
    %c0_101 = arith.constant 0 : index
    %c0_102 = arith.constant 0 : index
    %127 = vector.load %arg4[%c6_100, %c0_101, %c0_102] : memref<7x4x128xf32, #tpu.memory_space<vmem>>, vector<1x4x128xf32>
    %128 = vector.shape_cast %127 : vector<1x4x128xf32> to vector<4x128xf32>
    %cst_103 = arith.constant dense<0.000000e+00> : vector<104x128xf32>
    %129 = tpu.matmul %126, %128, %cst_103 {dimension_numbers = #tpu.dot_dimension_numbers<[1], [0], [0], [1], [0, 0, 1, 1], [], []>} : vector<104x4xf32>, vector<4x128xf32>, vector<104x128xf32> -> vector<104x128xf32>
    %130 = arith.addf %117, %129 : vector<104x128xf32>
    %c6_104 = arith.constant 6 : index
    %c0_105 = arith.constant 0 : index
    %c0_106 = arith.constant 0 : index
    %131 = vector.load %arg6[%c6_104, %c0_105, %c0_106] : memref<7x1x128xf32, #tpu.memory_space<vmem>>, vector<1x1x128xf32>
    %132 = vector.shape_cast %131 : vector<1x1x128xf32> to vector<1x128xf32>
    %133 = vector.broadcast %132 : vector<1x128xf32> to vector<104x128xf32>
    %134 = arith.addf %130, %133 : vector<104x128xf32>
    %c0_107 = arith.constant 0 : index
    %c0_108 = arith.constant 0 : index
    %135 = vector.load %arg7[%c0_107, %c0_108] : memref<104x128xf32, #tpu.memory_space<vmem>>, vector<104x128xf32>
    tpu.vector_store %arg7[%c0_107, %c0_108], %134 {strides = array<i32>} : memref<104x128xf32, #tpu.memory_space<vmem>>, vector<104x128xf32>,
    return
  }
  func.func @transform_0(%arg0: i32) -> (i32, i32) {
    %c0_i32 = arith.constant 0 : i32
    %c0_i32_0 = arith.constant 0 : i32
    return %arg0, %c0_i32 : i32, i32
  }
  func.func @transform_1(%arg0: i32) -> (i32, i32) {
    %c0_i32 = arith.constant 0 : i32
    %c0_i32_0 = arith.constant 0 : i32
    %c0_i32_1 = arith.constant 0 : i32
    return %c0_i32, %c0_i32_0 : i32, i32
  }
  func.func @transform_2(%arg0: i32) -> (i32, i32, i32) {
    %c0_i32 = arith.constant 0 : i32
    %c0_i32_0 = arith.constant 0 : i32
    %c0_i32_1 = arith.constant 0 : i32
    %c0_i32_2 = arith.constant 0 : i32
    return %c0_i32, %c0_i32_0, %c0_i32_1 : i32, i32, i32
  }
  func.func @transform_3(%arg0: i32) -> (i32, i32, i32) {
    %c0_i32 = arith.constant 0 : i32
    %c0_i32_0 = arith.constant 0 : i32
    %c0_i32_1 = arith.constant 0 : i32
    %c0_i32_2 = arith.constant 0 : i32
    return %c0_i32, %c0_i32_0, %c0_i32_1 : i32, i32, i32
  }
  func.func @transform_4(%arg0: i32) -> (i32, i32, i32) {
    %c0_i32 = arith.constant 0 : i32
    %c0_i32_0 = arith.constant 0 : i32
    %c0_i32_1 = arith.constant 0 : i32
    %c0_i32_2 = arith.constant 0 : i32
    return %c0_i32, %c0_i32_0, %c0_i32_1 : i32, i32, i32
  }
  func.func @transform_5(%arg0: i32) -> (i32, i32, i32) {
    %c0_i32 = arith.constant 0 : i32
    %c0_i32_0 = arith.constant 0 : i32
    %c0_i32_1 = arith.constant 0 : i32
    %c0_i32_2 = arith.constant 0 : i32
    return %c0_i32, %c0_i32_0, %c0_i32_1 : i32, i32, i32
  }
  func.func @transform_6(%arg0: i32) -> (i32, i32) {
    %c0_i32 = arith.constant 0 : i32
    %c0_i32_0 = arith.constant 0 : i32
    return %arg0, %c0_i32 : i32, i32
  }
}

</mosaic_0001>

<bundles_post_ra>
// kernel: tpu_custom_call.1
= control target key start
LH: loop header
LB: loop body
LE: loop exit
PB: predicated region body
PF: predicated region fallthrough
CT: control target
= control target key end

     0   :  { %11 = vsyncpa [#allocation3], 0  ;;  %s6646_s0 = inlined_call_operand.vmem [shape: f32[200,128], index: 0, kind: input, shape index: {}]   ;;  %s6647_s1 = inlined_call_operand.vmem [shape: f32[1,128], index: 1, kind: input, shape index: {}]   ;;  %s6648_s2 = inlined_call_operand.vmem [shape: f32[7,128,4], index: 2, kind: input, shape index: {}]   ;;  %s6649_s3 = inlined_call_operand.vmem [shape: f32[7,4,128], index: 3, kind: input, shape index: {}]   ;;  %s6650_s4 = inlined_call_operand.vmem [shape: f32[7,1,4], index: 4, kind: input, shape index: {}]   ;;  %s6651_s5 = inlined_call_operand.vmem [shape: f32[7,1,128], index: 5, kind: input, shape index: {}]   ;;  %s6652_s6 = inlined_call_operand.hbm [shape: f32[200,128], index: 6, kind: output, shape index: {}]  }
   0x1   :  { %13 = vsyncpa [#allocation3 + $0x1], 0  ;;  %s4757_s21 = smov 0   ;;  %s4759_s22 = smov 0  }
   0x2   :  { %s4761_s23 = smov 0   ;;  %s4763_s24 = smov 0  }
   0x3 LB: > { %s4778_s25 = sadd.s32 4294967295, %s4714_s24   ;;  %s3113_s26 = sadd.s32 4294967294, %s4714_s24   ;;  %s4714_s24 = sphi %s4763_s24, %s6658_s24   ;;  %s4710_s23 = sphi %s4761_s23, %s6657_s23   ;;  %s4706_s22 = sphi %s4759_s22, %s6656_s22   ;;  %s4702_s21 = sphi %s4757_s21, %s6655_s21  }
   0x4   : > { %s4782_s27 = sadd.s32 1, %s4714_s24   ;;  %s157_s28 = sadd.s32 1, %s4710_s23 }
   0x5   : > { %s154_s29 = ssub.s32 %s4714_s24, %s4782_s27  ;;  %p167_p0 = scmp.ne.s32.totalorder %s4710_s23, %s4706_s22 }
   0x6   : > { %p155_p1 = scmp.eq.s32.totalorder %s154_s29, 0  ;;  %p168_p2 = scmp.eq.s32.totalorder %s4778_s25, 1 }
   0x7   : > { %p173_p3 = scmp.ne.s32.totalorder %s4706_s22, %s4702_s21  ;;  %p174_p4 = scmp.eq.s32.totalorder %s3113_s26, 1 }
   0x8   : > { %s4793_s30 = scalar_select %p155_p1, %s4710_s23, %s157_s28  }
   0x9   : > { %p4795_p5 = por %p168_p2, %p167_p0  ;;  %p4799_p6 = por %p174_p4, %p173_p3 }
   0xa   : > { %p3116_p7 = scmp.ge.s32.totalorder %s4714_s24, 1  ;;  %p224_p8 = scmp.lt.s32.totalorder %s4714_s24, 3 }
   0xc   : > { %p225_p9 = pnand %p3116_p7, %p224_p8 }
   0xd   : > { %v310_v0 = vld [vmem:[%s6648_s2] sm:$0xff] (!%p225_p9)  ;;  %v311_v1 = vld [vmem:[%s6648_s2 + $0x8] sm:$0xff] (!%p225_p9)  ;;  %v312_v2 = vld [vmem:[%s6648_s2 + $0x10] sm:$0xff] (!%p225_p9)  ;;  %v4716_v3 = vmov (!%p225_p9), 0.0|0.0   ;;  %vm4717_vm0 = vmmov (!%p225_p9), 0   ;;  %v4718_v6 = vmov (!%p225_p9), 0.0  }
   0xe   : > { %228 = sbr.rel (%p225_p9) target bundleno = 3160 (0xc58), region = 44  ;;  %4438 = vmatprep.subr.bf16.mxu0 (!%p225_p9), %v4716_v3  ;;  %v4439_v4 = vpack.c.bf16 (!%p225_p9), %v311_v1, %v310_v0  ;;  %v313_v5 = vld [vmem:[%s6648_s2 + $0x18] sm:$0xff] (!%p225_p9)  ;;  %3686 = vmatprep.mubr.msk.f32.mxu0 (!%p225_p9), %vm4717_vm0, %v4718_v6  ;;  %v314_v8 = vld [vmem:[%s6648_s2 + $0x20] sm:$0xff] (!%p225_p9)  ;;  %v315_v9 = vld [vmem:[%s6648_s2 + $0x28] sm:$0xff] (!%p225_p9)  ;;  %vm517_vm1 = vcmask (!%p225_p9), 1043456   ;;  %vm477_vm2 = vcmask (!%p225_p9), 31744  }
   0xf   : > { %3725 = vmatprep.subr.mxu1 (!%p225_p9), %v4718_v6  ;;  %3727 = vmatprep.mubr.msk.f32.mxu1 (!%p225_p9), %vm4717_vm0, %v4718_v6  ;;  %v4442_v7 = vpack.c.bf16 (!%p225_p9), %v313_v5, %v312_v2  ;;  %v4445_v10 = vpack.c.bf16 (!%p225_p9), %v315_v9, %v314_v8  ;;  %v316_v11 = vld [vmem:[%s6648_s2 + $0x30] sm:$0xff] (!%p225_p9)  ;;  %v317_v12 = vld [vmem:[%s6648_s2 + $0x38] sm:$0xff] (!%p225_p9)  ;;  %s4838_s10 = smul.u32 (!%p225_p9), 13, %s4778_s25  ;;  %v318_v14 = vld [vmem:[%s6648_s2 + $0x40] sm:$0xff] (!%p225_p9)  ;;  %s255_s14 = sand.u32 (!%p225_p9), 1, %s4706_s22  }
  0x10   : > { %4440 = vmatpush3.bf16.msra.mxu0 (!%p225_p9), %v4439_v4  ;;  %v4448_v13 = vpack.c.bf16 (!%p225_p9), %v317_v12, %v316_v11  ;;  %v319_v15 = vld [vmem:[%s6648_s2 + $0x48] sm:$0xff] (!%p225_p9)  ;;  %v320_v17 = vld [vmem:[%s6648_s2 + $0x50] sm:$0xff] (!%p225_p9)  ;;  %v321_v18 = vld [vmem:[%s6648_s2 + $0x58] sm:$0xff] (!%p225_p9)  ;;  %s4608_s15 = smul.u32 (!%p225_p9), 104, %s255_s14 }
  0x11   : > { %4441 = vmatprep.subr.bf16.mxu0 (!%p225_p9), %v4716_v3  ;;  %p263_p10 = scmp.lt.s32.totalorder (!%p225_p9), %s4838_s10, 24  ;;  %v4451_v16 = vpack.c.bf16 (!%p225_p9), %v319_v15, %v318_v14  ;;  %v4454_v19 = vpack.c.bf16 (!%p225_p9), %v321_v18, %v320_v17  ;;  %v322_v20 = vld [vmem:[%s6648_s2 + $0x60] sm:$0xff] (!%p225_p9)  ;;  %v323_v21 = vld [vmem:[%s6648_s2 + $0x68] sm:$0xff] (!%p225_p9)  ;;  %v324_v23 = vld [vmem:[%s6648_s2 + $0x70] sm:$0xff] (!%p225_p9) }
  0x12   : > { %v4457_v22 = vpack.c.bf16 (!%p225_p9), %v323_v21, %v322_v20  ;;  %v325_v24 = vld [vmem:[%s6648_s2 + $0x78] sm:$0xff] (!%p225_p9)  ;;  %v3118_v27 = vld [vmem:[%s6647_s1] ss:$0 sm:$0xff] (!%p225_p9)  ;;  %v3136_v56 = vld [vmem:[%s6648_s2 + $0x88] sm:$0xff] (!%p225_p9)  ;;  %s6532_s18 = scalar_lea.vmem (!%p225_p9), [#allocation2], %s4608_s15 }
  0x13   : > { %v4460_v25 = vpack.c.bf16 (!%p225_p9), %v325_v24, %v324_v23  ;;  %v476_v53 = vld [vmem:[%s6649_s3] sm:$0xf] (!%p225_p9)  ;;  %v3137_v62 = vld [vmem:[%s6648_s2 + $0x90] sm:$0xff] (!%p225_p9)  ;;  %v3138_v63 = vld [vmem:[%s6648_s2 + $0x98] sm:$0xff] (!%p225_p9) }
  0x14   : > { %4443 = vmatpush3.bf16.msra.mxu0 (!%p225_p9), %v4442_v7  ;;  %3726 = vmatpush3.msk.msra.mxu1 (!%p225_p9), %vm517_vm1, %v476_v53  ;;  %v4966_v54 = vld [vmem:[%s6650_s4] ss:$0 sm:$0xff] (!%p225_p9)  ;;  %v4466_v4 = vpack.c.bf16 (!%p225_p9), %v3138_v63, %v3137_v62  ;;  %v3140_v8 = vld [vmem:[%s6648_s2 + $0xa8] sm:$0xff] (!%p225_p9)  ;;  %v3141_v14 = vld [vmem:[%s6648_s2 + $0xb0] sm:$0xff] (!%p225_p9) }
  0x15   : > { %4444 = vmatprep.subr.bf16.mxu0 %v4716_v3  ;;  %s264_s19 = scalar_select %p263_p10, %s4838_s10, 24  ;;  %4462 = vmatprep.subr.bf16.mxu1 %v4716_v3  ;;  %v3135_v55 = vld [vmem:[%s6648_s2 + $0x80] sm:$0xff]  ;;  %v3142_v15 = vld [vmem:[%s6648_s2 + $0xb8] sm:$0xff] }
  0x16   : > { %v4463_v60 = vpack.c.bf16 %v3136_v56, %v3135_v55  ;;  %v3139_v7 = vld [vmem:[%s6648_s2 + $0xa0] sm:$0xff]  ;;  %s3040_s20 = ssub.s32 (%p4795_p5), 25, %s4838_s10 }
  0x17   : > { %s3117_s9 = sshll.u32 %s264_s19, 3  ;;  %v4469_v12 = vpack.c.bf16 %v3140_v8, %v3139_v7  ;;  %v3143_v21 = vld [vmem:[%s6648_s2 + $0xc0] sm:$0xff]  ;;  %s6585_s19 = scalar_lea.sflag [#allocation3], %s255_s14 }
  0x18   : > { %4446 = vmatpush3.bf16.msra.mxu0 %v4445_v10  ;;  %s4873_s17 = scalar_lea.vmem %s6646_s0, %s3117_s9  ;;  %p3041_p11 = scmp.lt.s32.totalorder (%p4795_p5), %s3040_s20, 13 }
  0x19   : > { %4447 = vmatprep.subr.bf16.mxu0 %v4716_v3  ;;  %v277_v26 = vld [vmem:[%s4873_s17] sm:$0xff]  ;;  %v278_v29 = vld [vmem:[%s4873_s17 + $0x8] sm:$0xff]  ;;  %v279_v31 = vld [vmem:[%s4873_s17 + $0x10] sm:$0xff] }
  0x1a   : > { %v4880_v28 = vmul.f32 %v3118_v27, %v277_v26  ;;  %v4885_v30 = vmul.f32 %v3118_v27, %v278_v29  ;;  %v4891_v32 = vmul.f32 %v3118_v27, %v279_v31  ;;  %v280_v33 = vld [vmem:[%s4873_s17 + $0x18] sm:$0xff]  ;;  %v281_v35 = vld [vmem:[%s4873_s17 + $0x20] sm:$0xff]  ;;  %v282_v37 = vld [vmem:[%s4873_s17 + $0x28] sm:$0xff] }
  0x1b   : > { %v4897_v34 = vmul.f32 %v3118_v27, %v280_v33  ;;  %v4903_v36 = vmul.f32 %v3118_v27, %v281_v35  ;;  %v4909_v38 = vmul.f32 %v3118_v27, %v282_v37  ;;  %v283_v39 = vld [vmem:[%s4873_s17 + $0x30] sm:$0xff]  ;;  %v284_v41 = vld [vmem:[%s4873_s17 + $0x38] sm:$0xff]  ;;  %v285_v43 = vld [vmem:[%s4873_s17 + $0x40] sm:$0xff] }
  0x1c   : > { %4449 = vmatpush3.bf16.msra.mxu0 %v4448_v13  ;;  %v4915_v40 = vmul.f32 %v3118_v27, %v283_v39  ;;  %v4921_v42 = vmul.f32 %v3118_v27, %v284_v41  ;;  %v4927_v44 = vmul.f32 %v3118_v27, %v285_v43  ;;  %v286_v45 = vld [vmem:[%s4873_s17 + $0x48] sm:$0xff]  ;;  %v287_v47 = vld [vmem:[%s4873_s17 + $0x50] sm:$0xff]  ;;  %v288_v49 = vld [vmem:[%s4873_s17 + $0x58] sm:$0xff] }
  0x1d   : > { %4450 = vmatprep.subr.bf16.mxu0 %v4716_v3  ;;  %v4933_v46 = vmul.f32 %v3118_v27, %v286_v45  ;;  %v4939_v48 = vmul.f32 %v3118_v27, %v287_v47  ;;  %v4945_v50 = vmul.f32 %v3118_v27, %v288_v49  ;;  %v289_v51 = vld [vmem:[%s4873_s17 + $0x60] sm:$0xff]  ;;  %v3145_v29 = vld [vmem:[%s6648_s2 + $0xd0] sm:$0xff]  ;;  %v3146_v31 = vld [vmem:[%s6648_s2 + $0xd8] sm:$0xff] }
  0x1e   : > { %v4951_v52 = vmul.f32 %v3118_v27, %v289_v51  ;;  %v4478_v39 = vpack.c.bf16 %v3146_v31, %v3145_v29  ;;  %v3147_v43 = vld [vmem:[%s6648_s2 + $0xe0] sm:$0xff]  ;;  %v3148_v45 = vld [vmem:[%s6648_s2 + $0xe8] sm:$0xff] }
  0x1f   : > { %v4481_v53 = vpack.c.bf16 %v3148_v45, %v3147_v43 }
  0x20   : > { %4452 = vmatpush3.bf16.msra.mxu0 %v4451_v16 }
  0x21   : > { %4453 = vmatprep.subr.bf16.mxu0 %v4716_v3 }
  0x24   : > { %4455 = vmatpush3.bf16.msra.mxu0 %v4454_v19  ;;  %v4472_v19 = vpack.c.bf16 %v3142_v15, %v3141_v14 }
  0x25   : > { %4456 = vmatprep.subr.bf16.mxu0 %v4716_v3 }
  0x28   : > { %4458 = vmatpush3.bf16.msra.mxu0 %v4457_v22  ;;  %v3144_v22 = vld [vmem:[%s6648_s2 + $0xc8] sm:$0xff] }
  0x29   : > { %4459 = vmatprep.subr.bf16.mxu0 %v4716_v3  ;;  %v4475_v26 = vpack.c.bf16 %v3144_v22, %v3143_v21  ;;  %v5084_v22 = vld [vmem:[%s6651_s5] ss:$0 sm:$0xff] }
  0x2c   : > { %4461 = vmatpush3.bf16.msra.mxu0 %v4460_v25 }
  0x2d   : > { %3837 = vmatprep.subr.mxu0 %v4718_v6 }
  0x2f   : > { %3687 = vmatmul.mubr.f32.vlgmr.msra.gmra.mrb[0].mxu0 %v4880_v28 }
  0x30   : > { %3689 = vmatprep.mubr.msk.f32.mxu0 %vm4717_vm0, %v4718_v6 }
  0x33   : > { %3690 = vmatmul.mubr.f32.gmra.mrb[2].mxu0 %v4885_v30 }
  0x34   : > { %3692 = vmatprep.mubr.msk.f32.mxu0 %vm4717_vm0, %v4718_v6 }
  0x37   : > { %3693 = vmatmul.mubr.f32.gmra.mrb[4].mxu0 %v4891_v32 }
  0x38   : > { %3695 = vmatprep.mubr.msk.f32.mxu0 %vm4717_vm0, %v4718_v6 }
  0x3b   : > { %3696 = vmatmul.mubr.f32.gmra.mrb[6].mxu0 %v4897_v34 }
  0x3c   : > { %3698 = vmatprep.mubr.msk.f32.mxu0 %vm4717_vm0, %v4718_v6 }
  0x3f   : > { %3699 = vmatmul.mubr.f32.gmra.mrb[8].mxu0 %v4903_v36 }
  0x40   : > { %3701 = vmatprep.mubr.msk.f32.mxu0 %vm4717_vm0, %v4718_v6 }
  0x43   : > { %3702 = vmatmul.mubr.f32.gmra.mrb[10].mxu0 %v4909_v38 }
  0x44   : > { %3704 = vmatprep.mubr.msk.f32.mxu0 %vm4717_vm0, %v4718_v6 }
  0x47   : > { %3705 = vmatmul.mubr.f32.gmra.mrb[12].mxu0 %v4915_v40 }
  0x48   : > { %3707 = vmatprep.mubr.msk.f32.mxu0 %vm4717_vm0, %v4718_v6 }
  0x4b   : > { %3708 = vmatmul.mubr.f32.gmra.mrb[14].mxu0 %v4921_v42 }
  0x4c   : > { %3710 = vmatprep.mubr.msk.f32.mxu0 %vm4717_vm0, %v4718_v6 }
  0x4f   : > { %3711 = vmatmul.mubr.f32.gmra.mrb[16].mxu0 %v4927_v44 }
  0x50   : > { %3713 = vmatprep.mubr.msk.f32.mxu0 %vm4717_vm0, %v4718_v6 }
  0x53   : > { %3714 = vmatmul.mubr.f32.gmra.mrb[18].mxu0 %v4933_v46 }
  0x54   : > { %3716 = vmatprep.mubr.msk.f32.mxu0 %vm4717_vm0, %v4718_v6 }
  0x57   : > { %3717 = vmatmul.mubr.f32.gmra.mrb[20].mxu0 %v4939_v48 }
  0x58   : > { %3719 = vmatprep.mubr.msk.f32.mxu0 %vm4717_vm0, %v4718_v6 }
  0x5b   : > { %3720 = vmatmul.mubr.f32.gmra.mrb[22].mxu0 %v4945_v50 }
  0x5c   : > { %3722 = vmatprep.mubr.msk.f32.mxu0 %vm4717_vm0, %v4718_v6 }
  0x5f   : > { %3723 = vmatmul.mubr.f32.gmra.mrb[24].mxu0 %v4951_v52 }
  0x60   : > { %3839 = vmatprep.mubr.msk.f32.mxu0 %vm4717_vm0, %v4718_v6 }
 0x102   : > { %v399_v57 = vpop.f32.mrb[0].mxu0 }
 0x103   : > { %v400_v58 = vadd.f32 %v4966_v54, %v399_v57  ;;  %v3688_v59 = vpop.f32.mrb[1].mxu0 }
 0x105   : > { %v463_v61 = vmax.f32 %v400_v58, 0.0 }
 0x106   : > { %v404_v0 = vpop.f32.mrb[2].mxu0 }
 0x107   : > { %v405_v1 = vadd.f32 %v4966_v54, %v404_v0  ;;  %v3691_v2 = vpop.f32.mrb[3].mxu0  ;;  %3728 = vmatmul.mubr.msk.f32.vlgmr.msra.gmra.mrb[0].mxu1 %vm477_vm2, %v463_v61 }
 0x108   : > { %3730 = vmatprep.mubr.msk.f32.mxu1 %vm4717_vm0, %v4718_v6  ;;  %4464 = vmatpush3.bf16.msra.mxu1 %v4463_v60 }
 0x109   : > { %v464_v5 = vmax.f32 %v405_v1, 0.0  ;;  %4465 = vmatprep.subr.bf16.mxu1 %v4716_v3 }
 0x10a   : > { %v409_v9 = vpop.f32.mrb[4].mxu0 }
 0x10b   : > { %v410_v10 = vadd.f32 %v4966_v54, %v409_v9  ;;  %v3694_v11 = vpop.f32.mrb[5].mxu0  ;;  %3731 = vmatmul.mubr.msk.f32.gmra.mrb[2].mxu1 %vm477_vm2, %v464_v5 }
 0x10c   : > { %3733 = vmatprep.mubr.msk.f32.mxu1 %vm4717_vm0, %v4718_v6  ;;  %4467 = vmatpush3.bf16.msra.mxu1 %v4466_v4 }
 0x10d   : > { %v465_v13 = vmax.f32 %v410_v10, 0.0  ;;  %4468 = vmatprep.subr.bf16.mxu1 %v4716_v3 }
 0x10e   : > { %v414_v16 = vpop.f32.mrb[6].mxu0 }
 0x10f   : > { %v415_v17 = vadd.f32 %v4966_v54, %v414_v16  ;;  %v3697_v18 = vpop.f32.mrb[7].mxu0  ;;  %3734 = vmatmul.mubr.msk.f32.gmra.mrb[4].mxu1 %vm477_vm2, %v465_v13 }
 0x110   : > { %3736 = vmatprep.mubr.msk.f32.mxu1 %vm4717_vm0, %v4718_v6  ;;  %4470 = vmatpush3.bf16.msra.mxu1 %v4469_v12  ;;  %v3149_v18 = vld [vmem:[%s6648_s2 + $0xf0] sm:$0xff] }
 0x111   : > { %v466_v20 = vmax.f32 %v415_v17, 0.0  ;;  %4471 = vmatprep.subr.bf16.mxu1 %v4716_v3 }
 0x112   : > { %v419_v23 = vpop.f32.mrb[8].mxu0 }
 0x113   : > { %v420_v24 = vadd.f32 %v4966_v54, %v419_v23  ;;  %v3700_v25 = vpop.f32.mrb[9].mxu0  ;;  %3737 = vmatmul.mubr.msk.f32.gmra.mrb[6].mxu1 %vm477_vm2, %v466_v20  ;;  %v3153_v20 = vld [vmem:[%s6649_s3 + $0x4] sm:$0xf] }
 0x114   : > { %3739 = vmatprep.mubr.msk.f32.mxu1 %vm4717_vm0, %v4718_v6  ;;  %4473 = vmatpush3.bf16.msra.mxu1 %v4472_v19 }
 0x115   : > { %v467_v27 = vmax.f32 %v420_v24, 0.0  ;;  %4474 = vmatprep.subr.bf16.mxu1 %v4716_v3  ;;  %3838 = vmatpush3.msk.msra.mxu0 %vm517_vm1, %v3153_v20 }
 0x116   : > { %v424_v33 = vpop.f32.mrb[10].mxu0  ;;  %3949 = vmatprep.subr.mxu0 %v4718_v6 }
 0x117   : > { %v425_v35 = vadd.f32 %v4966_v54, %v424_v33  ;;  %v3703_v37 = vpop.f32.mrb[11].mxu0  ;;  %3740 = vmatmul.mubr.msk.f32.gmra.mrb[8].mxu1 %vm477_vm2, %v467_v27 }
 0x118   : > { %3742 = vmatprep.mubr.msk.f32.mxu1 %vm4717_vm0, %v4718_v6  ;;  %4476 = vmatpush3.bf16.msra.mxu1 %v4475_v26 }
 0x119   : > { %v468_v41 = vmax.f32 %v425_v35, 0.0  ;;  %4477 = vmatprep.subr.bf16.mxu1 %v4716_v3 }
 0x11a   : > { %v429_v47 = vpop.f32.mrb[12].mxu0 }
 0x11b   : > { %v430_v49 = vadd.f32 %v4966_v54, %v429_v47  ;;  %v3706_v51 = vpop.f32.mrb[13].mxu0  ;;  %3743 = vmatmul.mubr.msk.f32.gmra.mrb[10].mxu1 %vm477_vm2, %v468_v41 }
 0x11c   : > { %3745 = vmatprep.mubr.msk.f32.mxu1 %vm4717_vm0, %v4718_v6  ;;  %4479 = vmatpush3.bf16.msra.mxu1 %v4478_v39 }
 0x11d   : > { %v469_v55 = vmax.f32 %v430_v49, 0.0  ;;  %4480 = vmatprep.subr.bf16.mxu1 %v4716_v3 }
 0x11e   : > { %v434_v56 = vpop.f32.mrb[14].mxu0 }
 0x11f   : > { %v435_v57 = vadd.f32 %v4966_v54, %v434_v56  ;;  %v3709_v58 = vpop.f32.mrb[15].mxu0  ;;  %3746 = vmatmul.mubr.msk.f32.gmra.mrb[12].mxu1 %vm477_vm2, %v469_v55 }
 0x120   : > { %3748 = vmatprep.mubr.msk.f32.mxu1 %vm4717_vm0, %v4718_v6  ;;  %4482 = vmatpush3.bf16.msra.mxu1 %v4481_v53 }
 0x121   : > { %v470_v59 = vmax.f32 %v435_v57, 0.0  ;;  %4483 = vmatprep.subr.bf16.mxu1 %v4716_v3 }
 0x122   : > { %v439_v60 = vpop.f32.mrb[16].mxu0 }
 0x123   : > { %v440_v61 = vadd.f32 %v4966_v54, %v439_v60  ;;  %v3712_v62 = vpop.f32.mrb[17].mxu0  ;;  %3749 = vmatmul.mubr.msk.f32.gmra.mrb[14].mxu1 %vm477_vm2, %v470_v59 }
 0x124   : > { %3751 = vmatprep.mubr.msk.f32.mxu1 %vm4717_vm0, %v4718_v6 }
 0x125   : > { %v471_v63 = vmax.f32 %v440_v61, 0.0 }
 0x126   : > { %v444_v0 = vpop.f32.mrb[18].mxu0 }
 0x127   : > { %v445_v1 = vadd.f32 %v4966_v54, %v444_v0  ;;  %v3715_v2 = vpop.f32.mrb[19].mxu0  ;;  %3752 = vmatmul.mubr.msk.f32.gmra.mrb[16].mxu1 %vm477_vm2, %v471_v63 }
 0x128   : > { %3754 = vmatprep.mubr.msk.f32.mxu1 %vm4717_vm0, %v4718_v6 }
 0x129   : > { %v472_v4 = vmax.f32 %v445_v1, 0.0 }
 0x12a   : > { %v449_v5 = vpop.f32.mrb[20].mxu0 }
 0x12b   : > { %v450_v7 = vadd.f32 %v4966_v54, %v449_v5  ;;  %v3718_v8 = vpop.f32.mrb[21].mxu0  ;;  %3755 = vmatmul.mubr.msk.f32.gmra.mrb[18].mxu1 %vm477_vm2, %v472_v4 }
 0x12c   : > { %3757 = vmatprep.mubr.msk.f32.mxu1 %vm4717_vm0, %v4718_v6 }
 0x12d   : > { %v473_v9 = vmax.f32 %v450_v7, 0.0 }
 0x12e   : > { %v454_v10 = vpop.f32.mrb[22].mxu0 }
 0x12f   : > { %v455_v11 = vadd.f32 %v4966_v54, %v454_v10  ;;  %v3721_v12 = vpop.f32.mrb[23].mxu0  ;;  %3758 = vmatmul.mubr.msk.f32.gmra.mrb[20].mxu1 %vm477_vm2, %v473_v9 }
 0x130   : > { %3760 = vmatprep.mubr.msk.f32.mxu1 %vm4717_vm0, %v4718_v6 }
 0x131   : > { %v474_v13 = vmax.f32 %v455_v11, 0.0 }
 0x132   : > { %v459_v14 = vpop.f32.mrb[24].mxu0 }
 0x133   : > { %v460_v15 = vadd.f32 %v4966_v54, %v459_v14  ;;  %v3724_v16 = vpop.f32.mrb[25].mxu0  ;;  %3761 = vmatmul.mubr.msk.f32.gmra.mrb[22].mxu1 %vm477_vm2, %v474_v13  ;;  %v3150_v54 = vld [vmem:[%s6648_s2 + $0xf8] sm:$0xff] }
 0x134   : > { %3763 = vmatprep.mubr.msk.f32.mxu1 %vm4717_vm0, %v4718_v6  ;;  %v4484_v19 = vpack.c.bf16 %v3150_v54, %v3149_v18 }
 0x135   : > { %v475_v17 = vmax.f32 %v460_v15, 0.0 }
 0x136   : > { %4485 = vmatpush3.bf16.msra.mxu1 %v4484_v19 }
 0x137   : > { %3764 = vmatmul.mubr.msk.f32.gmra.mrb[24].mxu1 %vm477_vm2, %v475_v17  ;;  %4486 = vmatprep.subr.bf16.mxu1 %v4716_v3 }
 0x138   : > { %3798 = vmatprep.mubr.msk.f32.mxu1 %vm4717_vm0, %v4718_v6 }
 0x1da   : > { %v587_v21 = vpop.f32.mrb[0].mxu1 }
 0x1db   : > { %v651_v23 = vadd.f32 %v587_v21, %v4880_v28  ;;  %v3729_v24 = vpop.f32.mrb[1].mxu1 }
 0x1dd   : > { %v5088_v25 = vadd.f32 %v5084_v22, %v651_v23 }
 0x1de   : > { %v592_v26 = vpop.f32.mrb[2].mxu1 }
 0x1df   : > { %v684_v27 = vmax.f32 %v5088_v25, 0.0  ;;  %v652_v29 = vadd.f32 %v592_v26, %v4885_v30  ;;  %v3732_v31 = vpop.f32.mrb[3].mxu1 }
 0x1e0   : > { %v3172_v31 = vld [vmem:[%s6648_s2 + $0x110] sm:$0xff] }
 0x1e1   : > { %v5093_v33 = vadd.f32 %v5084_v22, %v652_v29  ;;  %3799 = vmatmul.mubr.f32.vlgmr.msra.gmra.mrb[26].mxu1 %v684_v27 }
 0x1e2   : > { %v597_v35 = vpop.f32.mrb[4].mxu1  ;;  %3801 = vmatprep.mubr.msk.f32.mxu1 %vm4717_vm0, %v4718_v6 }
 0x1e3   : > { %v685_v28 = vmax.f32 %v5093_v33, 0.0  ;;  %v653_v37 = vadd.f32 %v597_v35, %v4891_v32  ;;  %v3735_v39 = vpop.f32.mrb[5].mxu1 }
 0x1e5   : > { %v5102_v41 = vadd.f32 %v5084_v22, %v653_v37  ;;  %3802 = vmatmul.mubr.f32.gmra.mrb[28].mxu1 %v685_v28  ;;  %v3173_v37 = vld [vmem:[%s6648_s2 + $0x118] sm:$0xff] }
 0x1e6   : > { %v602_v30 = vpop.f32.mrb[6].mxu1  ;;  %3804 = vmatprep.mubr.msk.f32.mxu1 %vm4717_vm0, %v4718_v6  ;;  %v4490_v39 = vpack.c.bf16 %v3173_v37, %v3172_v31 }
 0x1e7   : > { %v686_v43 = vmax.f32 %v5102_v41, 0.0  ;;  %v654_v45 = vadd.f32 %v602_v30, %v4897_v34  ;;  %v3738_v47 = vpop.f32.mrb[7].mxu1  ;;  %v3174_v30 = vld [vmem:[%s6648_s2 + $0x120] sm:$0xff] }
 0x1e9   : > { %v5111_v49 = vadd.f32 %v5084_v22, %v654_v45  ;;  %3805 = vmatmul.mubr.f32.gmra.mrb[30].mxu1 %v686_v43  ;;  %v3175_v45 = vld [vmem:[%s6648_s2 + $0x128] sm:$0xff] }
 0x1ea   : > { %v607_v32 = vpop.f32.mrb[8].mxu1  ;;  %3807 = vmatprep.mubr.msk.f32.mxu1 %vm4717_vm0, %v4718_v6  ;;  %v4493_v47 = vpack.c.bf16 %v3175_v45, %v3174_v30 }
 0x1eb   : > { %v687_v51 = vmax.f32 %v5111_v49, 0.0  ;;  %v655_v53 = vadd.f32 %v607_v32, %v4903_v36  ;;  %v3741_v55 = vpop.f32.mrb[9].mxu1  ;;  %v3176_v32 = vld [vmem:[%s6648_s2 + $0x130] sm:$0xff] }
 0x1ed   : > { %v5120_v56 = vadd.f32 %v5084_v22, %v655_v53  ;;  %3808 = vmatmul.mubr.f32.gmra.mrb[32].mxu1 %v687_v51  ;;  %v3177_v53 = vld [vmem:[%s6648_s2 + $0x138] sm:$0xff] }
 0x1ee   : > { %v612_v34 = vpop.f32.mrb[10].mxu1  ;;  %3810 = vmatprep.mubr.msk.f32.mxu1 %vm4717_vm0, %v4718_v6  ;;  %v4496_v55 = vpack.c.bf16 %v3177_v53, %v3176_v32 }
 0x1ef   : > { %v688_v57 = vmax.f32 %v5120_v56, 0.0  ;;  %v656_v58 = vadd.f32 %v612_v34, %v4909_v38  ;;  %v3744_v59 = vpop.f32.mrb[11].mxu1  ;;  %v3178_v34 = vld [vmem:[%s6648_s2 + $0x140] sm:$0xff] }
 0x1f1   : > { %v5129_v60 = vadd.f32 %v5084_v22, %v656_v58  ;;  %3811 = vmatmul.mubr.f32.gmra.mrb[34].mxu1 %v688_v57  ;;  %v3179_v58 = vld [vmem:[%s6648_s2 + $0x148] sm:$0xff] }
 0x1f2   : > { %v617_v36 = vpop.f32.mrb[12].mxu1  ;;  %3813 = vmatprep.mubr.msk.f32.mxu1 %vm4717_vm0, %v4718_v6  ;;  %v4499_v59 = vpack.c.bf16 %v3179_v58, %v3178_v34 }
 0x1f3   : > { %v689_v61 = vmax.f32 %v5129_v60, 0.0  ;;  %v657_v62 = vadd.f32 %v617_v36, %v4915_v40  ;;  %v3747_v63 = vpop.f32.mrb[13].mxu1  ;;  %v3180_v36 = vld [vmem:[%s6648_s2 + $0x150] sm:$0xff] }
 0x1f5   : > { %v5138_v0 = vadd.f32 %v5084_v22, %v657_v62  ;;  %3814 = vmatmul.mubr.f32.gmra.mrb[36].mxu1 %v689_v61  ;;  %v3181_v62 = vld [vmem:[%s6648_s2 + $0x158] sm:$0xff] }
 0x1f6   : > { %v622_v38 = vpop.f32.mrb[14].mxu1  ;;  %3816 = vmatprep.mubr.msk.f32.mxu1 %vm4717_vm0, %v4718_v6  ;;  %v4502_v63 = vpack.c.bf16 %v3181_v62, %v3180_v36 }
 0x1f7   : > { %v690_v1 = vmax.f32 %v5138_v0, 0.0  ;;  %v658_v2 = vadd.f32 %v622_v38, %v4921_v42  ;;  %v3750_v4 = vpop.f32.mrb[15].mxu1  ;;  %v3182_v38 = vld [vmem:[%s6648_s2 + $0x160] sm:$0xff] }
 0x1f9   : > { %v5147_v5 = vadd.f32 %v5084_v22, %v658_v2  ;;  %3817 = vmatmul.mubr.f32.gmra.mrb[38].mxu1 %v690_v1  ;;  %v3183_v2 = vld [vmem:[%s6648_s2 + $0x168] sm:$0xff] }
 0x1fa   : > { %v627_v40 = vpop.f32.mrb[16].mxu1  ;;  %3819 = vmatprep.mubr.msk.f32.mxu1 %vm4717_vm0, %v4718_v6  ;;  %v4505_v4 = vpack.c.bf16 %v3183_v2, %v3182_v38 }
 0x1fb   : > { %v691_v7 = vmax.f32 %v5147_v5, 0.0  ;;  %v659_v8 = vadd.f32 %v627_v40, %v4927_v44  ;;  %v3753_v9 = vpop.f32.mrb[17].mxu1  ;;  %v5255_v40 = vld [vmem:[%s6650_s4 + $0x1] ss:$0 sm:$0xff] }
 0x1fd   : > { %v5156_v10 = vadd.f32 %v5084_v22, %v659_v8  ;;  %3820 = vmatmul.mubr.f32.gmra.mrb[40].mxu1 %v691_v7 }
 0x1fe   : > { %v632_v42 = vpop.f32.mrb[18].mxu1  ;;  %3822 = vmatprep.mubr.msk.f32.mxu1 %vm4717_vm0, %v4718_v6 }
 0x1ff   : > { %v692_v11 = vmax.f32 %v5156_v10, 0.0  ;;  %v660_v12 = vadd.f32 %v632_v42, %v4933_v46  ;;  %v3756_v13 = vpop.f32.mrb[19].mxu1 }
 0x201   : > { %v5165_v14 = vadd.f32 %v5084_v22, %v660_v12  ;;  %3823 = vmatmul.mubr.f32.gmra.mrb[42].mxu1 %v692_v11 }
 0x202   : > { %v637_v44 = vpop.f32.mrb[20].mxu1  ;;  %3825 = vmatprep.mubr.msk.f32.mxu1 %vm4717_vm0, %v4718_v6 }
 0x203   : > { %v693_v15 = vmax.f32 %v5165_v14, 0.0  ;;  %v661_v16 = vadd.f32 %v637_v44, %v4939_v48  ;;  %v3759_v17 = vpop.f32.mrb[21].mxu1 }
 0x205   : > { %v5174_v18 = vadd.f32 %v5084_v22, %v661_v16  ;;  %3826 = vmatmul.mubr.f32.gmra.mrb[44].mxu1 %v693_v15 }
 0x206   : > { %v642_v46 = vpop.f32.mrb[22].mxu1  ;;  %3828 = vmatprep.mubr.msk.f32.mxu1 %vm4717_vm0, %v4718_v6 }
 0x207   : > { %v694_v54 = vmax.f32 %v5174_v18, 0.0  ;;  %v662_v19 = vadd.f32 %v642_v46, %v4945_v50  ;;  %v3762_v20 = vpop.f32.mrb[23].mxu1 }
 0x209   : > { %v5183_v21 = vadd.f32 %v5084_v22, %v662_v19  ;;  %3829 = vmatmul.mubr.f32.gmra.mrb[46].mxu1 %v694_v54 }
 0x20a   : > { %v647_v48 = vpop.f32.mrb[24].mxu1  ;;  %3831 = vmatprep.mubr.msk.f32.mxu1 %vm4717_vm0, %v4718_v6 }
 0x20b   : > { %v695_v23 = vmax.f32 %v5183_v21, 0.0  ;;  %v663_v24 = vadd.f32 %v647_v48, %v4951_v52  ;;  %v3765_v26 = vpop.f32.mrb[25].mxu1  ;;  %v3170_v52 = vld [vmem:[%s6648_s2 + $0x100] sm:$0xff] }
 0x20d   : > { %v5192_v29 = vadd.f32 %v5084_v22, %v663_v24  ;;  %3832 = vmatmul.mubr.f32.gmra.mrb[48].mxu1 %v695_v23  ;;  %v3171_v22 = vld [vmem:[%s6648_s2 + $0x108] sm:$0xff] }
 0x20e   : > { %3834 = vmatprep.mubr.msk.f32.mxu1 %vm4717_vm0, %v4718_v6  ;;  %v4487_v35 = vpack.c.bf16 %v3171_v22, %v3170_v52 }
 0x20f   : > { %v696_v50 = vmax.f32 %v5192_v29, 0.0  ;;  %v3205_v29 = vld [vmem:[%s6648_s2 + $0x180] sm:$0xff] }
 0x210   : > { %4488 = vmatpush3.bf16.msra.mxu1 %v4487_v35 }
 0x211   : > { %3835 = vmatmul.mubr.f32.gmra.mrb[50].mxu1 %v696_v50  ;;  %4489 = vmatprep.subr.bf16.mxu1 %v4716_v3 }
 0x212   : > { %3910 = vmatprep.mubr.msk.f32.mxu1 %vm4717_vm0, %v4718_v6 }
 0x214   : > { %4491 = vmatpush3.bf16.msra.mxu1 %v4490_v39 }
 0x215   : > { %4492 = vmatprep.subr.bf16.mxu1 %v4716_v3 }
 0x218   : > { %4494 = vmatpush3.bf16.msra.mxu1 %v4493_v47 }
 0x219   : > { %4495 = vmatprep.subr.bf16.mxu1 %v4716_v3 }
 0x21c   : > { %4497 = vmatpush3.bf16.msra.mxu1 %v4496_v55 }
 0x21d   : > { %4498 = vmatprep.subr.bf16.mxu1 %v4716_v3 }
 0x220   : > { %4500 = vmatpush3.bf16.msra.mxu1 %v4499_v59 }
 0x221   : > { %4501 = vmatprep.subr.bf16.mxu1 %v4716_v3 }
 0x224   : > { %4503 = vmatpush3.bf16.msra.mxu1 %v4502_v63 }
 0x225   : > { %4504 = vmatprep.subr.bf16.mxu1 %v4716_v3 }
 0x228   : > { %4506 = vmatpush3.bf16.msra.mxu1 %v4505_v4 }
 0x229   : > { %4507 = vmatprep.subr.bf16.mxu1 %v4716_v3 }
 0x2b4   : > { %v788_v8 = vpop.f32.mrb[26].mxu1 }
 0x2b5   : > { %v789_v9 = vadd.f32 %v5255_v40, %v788_v8  ;;  %v3800_v42 = vpop.f32.mrb[27].mxu1 }
 0x2b7   : > { %v852_v12 = vmax.f32 %v789_v9, 0.0 }
 0x2b8   : > { %v793_v13 = vpop.f32.mrb[28].mxu1 }
 0x2b9   : > { %v794_v44 = vadd.f32 %v5255_v40, %v793_v13  ;;  %v3803_v16 = vpop.f32.mrb[29].mxu1  ;;  %3840 = vmatmul.mubr.msk.f32.vlgmr.msra.gmra.mrb[26].mxu0 %vm477_vm2, %v852_v12 }
 0x2ba   : > { %3842 = vmatprep.mubr.msk.f32.mxu0 %vm4717_vm0, %v4718_v6 }
 0x2bb   : > { %v853_v17 = vmax.f32 %v794_v44, 0.0 }
 0x2bc   : > { %v798_v46 = vpop.f32.mrb[30].mxu1 }
 0x2bd   : > { %v799_v19 = vadd.f32 %v5255_v40, %v798_v46  ;;  %v3806_v20 = vpop.f32.mrb[31].mxu1  ;;  %3843 = vmatmul.mubr.msk.f32.gmra.mrb[28].mxu0 %vm477_vm2, %v853_v17 }
 0x2be   : > { %3845 = vmatprep.mubr.msk.f32.mxu0 %vm4717_vm0, %v4718_v6 }
 0x2bf   : > { %v854_v48 = vmax.f32 %v799_v19, 0.0 }
 0x2c0   : > { %v803_v24 = vpop.f32.mrb[32].mxu1 }
 0x2c1   : > { %v804_v26 = vadd.f32 %v5255_v40, %v803_v24  ;;  %v3809_v52 = vpop.f32.mrb[33].mxu1  ;;  %3846 = vmatmul.mubr.msk.f32.gmra.mrb[30].mxu0 %vm477_vm2, %v854_v48 }
 0x2c2   : > { %3848 = vmatprep.mubr.msk.f32.mxu0 %vm4717_vm0, %v4718_v6 }
 0x2c3   : > { %v855_v22 = vmax.f32 %v804_v26, 0.0 }
 0x2c4   : > { %v808_v31 = vpop.f32.mrb[34].mxu1 }
 0x2c5   : > { %v809_v35 = vadd.f32 %v5255_v40, %v808_v31  ;;  %v3812_v37 = vpop.f32.mrb[35].mxu1  ;;  %3849 = vmatmul.mubr.msk.f32.gmra.mrb[32].mxu0 %vm477_vm2, %v855_v22 }
 0x2c6   : > { %3851 = vmatprep.mubr.msk.f32.mxu0 %vm4717_vm0, %v4718_v6 }
 0x2c7   : > { %v856_v39 = vmax.f32 %v809_v35, 0.0  ;;  %v3184_v35 = vld [vmem:[%s6648_s2 + $0x170] sm:$0xff] }
 0x2c8   : > { %v813_v30 = vpop.f32.mrb[36].mxu1 }
 0x2c9   : > { %v814_v45 = vadd.f32 %v5255_v40, %v813_v30  ;;  %v3815_v47 = vpop.f32.mrb[37].mxu1  ;;  %3852 = vmatmul.mubr.msk.f32.gmra.mrb[34].mxu0 %vm477_vm2, %v856_v39  ;;  %v3188_v39 = vld [vmem:[%s6649_s3 + $0x8] sm:$0xf] }
 0x2ca   : > { %3854 = vmatprep.mubr.msk.f32.mxu0 %vm4717_vm0, %v4718_v6  ;;  %3950 = vmatpush3.msk.msra.mxu0 %vm517_vm1, %v3188_v39 }
 0x2cb   : > { %v857_v32 = vmax.f32 %v814_v45, 0.0  ;;  %4061 = vmatprep.subr.mxu0 %v4718_v6  ;;  %v5324_v45 = vld [vmem:[%s6651_s5 + $0x1] ss:$0 sm:$0xff] }
 0x2cc   : > { %v818_v53 = vpop.f32.mrb[38].mxu1 }
 0x2cd   : > { %v819_v55 = vadd.f32 %v5255_v40, %v818_v53  ;;  %v3818_v34 = vpop.f32.mrb[39].mxu1  ;;  %3855 = vmatmul.mubr.msk.f32.gmra.mrb[36].mxu0 %vm477_vm2, %v857_v32 }
 0x2ce   : > { %3857 = vmatprep.mubr.msk.f32.mxu0 %vm4717_vm0, %v4718_v6 }
 0x2cf   : > { %v858_v58 = vmax.f32 %v819_v55, 0.0 }
 0x2d0   : > { %v823_v59 = vpop.f32.mrb[40].mxu1 }
 0x2d1   : > { %v824_v36 = vadd.f32 %v5255_v40, %v823_v59  ;;  %v3821_v62 = vpop.f32.mrb[41].mxu1  ;;  %3858 = vmatmul.mubr.msk.f32.gmra.mrb[38].mxu0 %vm477_vm2, %v858_v58 }
 0x2d2   : > { %3860 = vmatprep.mubr.msk.f32.mxu0 %vm4717_vm0, %v4718_v6 }
 0x2d3   : > { %v859_v63 = vmax.f32 %v824_v36, 0.0 }
 0x2d4   : > { %v828_v38 = vpop.f32.mrb[42].mxu1 }
 0x2d5   : > { %v829_v2 = vadd.f32 %v5255_v40, %v828_v38  ;;  %v3824_v4 = vpop.f32.mrb[43].mxu1  ;;  %3861 = vmatmul.mubr.msk.f32.gmra.mrb[40].mxu0 %vm477_vm2, %v859_v63 }
 0x2d6   : > { %3863 = vmatprep.mubr.msk.f32.mxu0 %vm4717_vm0, %v4718_v6 }
 0x2d7   : > { %v860_v8 = vmax.f32 %v829_v2, 0.0 }
 0x2d8   : > { %v833_v9 = vpop.f32.mrb[44].mxu1 }
 0x2d9   : > { %v834_v42 = vadd.f32 %v5255_v40, %v833_v9  ;;  %v3827_v12 = vpop.f32.mrb[45].mxu1  ;;  %3864 = vmatmul.mubr.msk.f32.gmra.mrb[42].mxu0 %vm477_vm2, %v860_v8 }
 0x2da   : > { %3866 = vmatprep.mubr.msk.f32.mxu0 %vm4717_vm0, %v4718_v6 }
 0x2db   : > { %v861_v13 = vmax.f32 %v834_v42, 0.0 }
 0x2dc   : > { %v838_v44 = vpop.f32.mrb[46].mxu1 }
 0x2dd   : > { %v839_v16 = vadd.f32 %v5255_v40, %v838_v44  ;;  %v3830_v17 = vpop.f32.mrb[47].mxu1  ;;  %3867 = vmatmul.mubr.msk.f32.gmra.mrb[44].mxu0 %vm477_vm2, %v861_v13 }
 0x2de   : > { %3869 = vmatprep.mubr.msk.f32.mxu0 %vm4717_vm0, %v4718_v6 }
 0x2df   : > { %v862_v46 = vmax.f32 %v839_v16, 0.0 }
 0x2e0   : > { %v843_v19 = vpop.f32.mrb[48].mxu1 }
 0x2e1   : > { %v844_v20 = vadd.f32 %v5255_v40, %v843_v19  ;;  %v3833_v48 = vpop.f32.mrb[49].mxu1  ;;  %3870 = vmatmul.mubr.msk.f32.gmra.mrb[46].mxu0 %vm477_vm2, %v862_v46 }
 0x2e2   : > { %3872 = vmatprep.mubr.msk.f32.mxu0 %vm4717_vm0, %v4718_v6 }
 0x2e3   : > { %v863_v24 = vmax.f32 %v844_v20, 0.0 }
 0x2e4   : > { %v848_v26 = vpop.f32.mrb[50].mxu1 }
 0x2e5   : > { %v849_v52 = vadd.f32 %v5255_v40, %v848_v26  ;;  %v3836_v22 = vpop.f32.mrb[51].mxu1  ;;  %3873 = vmatmul.mubr.msk.f32.gmra.mrb[48].mxu0 %vm477_vm2, %v863_v24  ;;  %v3185_v40 = vld [vmem:[%s6648_s2 + $0x178] sm:$0xff] }
 0x2e6   : > { %3875 = vmatprep.mubr.msk.f32.mxu0 %vm4717_vm0, %v4718_v6  ;;  %v4508_v37 = vpack.c.bf16 %v3185_v40, %v3184_v35 }
 0x2e7   : > { %v864_v31 = vmax.f32 %v849_v52, 0.0 }
 0x2e8   : > { %4509 = vmatpush3.bf16.msra.mxu1 %v4508_v37 }
 0x2e9   : > { %3876 = vmatmul.mubr.msk.f32.gmra.mrb[50].mxu0 %vm477_vm2, %v864_v31  ;;  %4510 = vmatprep.subr.bf16.mxu1 %v4716_v3 }
 0x2ea   : > { %3951 = vmatprep.mubr.msk.f32.mxu0 %vm4717_vm0, %v4718_v6 }
 0x38c   : > { %v975_v30 = vpop.f32.mrb[26].mxu0 }
 0x38d   : > { %v1039_v47 = vadd.f32 %v975_v30, %v684_v27  ;;  %v3841_v32 = vpop.f32.mrb[27].mxu0 }
 0x38f   : > { %v5329_v53 = vadd.f32 %v5324_v45, %v1039_v47 }
 0x390   : > { %v980_v55 = vpop.f32.mrb[28].mxu0 }
 0x391   : > { %v1073_v34 = vmax.f32 %v5329_v53, 0.0  ;;  %v1040_v58 = vadd.f32 %v980_v55, %v685_v28  ;;  %v3844_v59 = vpop.f32.mrb[29].mxu0 }
 0x393   : > { %v5335_v36 = vadd.f32 %v5324_v45, %v1040_v58  ;;  %3911 = vmatmul.mubr.f32.vlgmr.msra.gmra.mrb[52].mxu1 %v1073_v34 }
 0x394   : > { %v985_v62 = vpop.f32.mrb[30].mxu0  ;;  %3913 = vmatprep.mubr.msk.f32.mxu1 %vm4717_vm0, %v4718_v6 }
 0x395   : > { %v1074_v25 = vmax.f32 %v5335_v36, 0.0  ;;  %v1041_v27 = vadd.f32 %v985_v62, %v686_v43  ;;  %v3847_v63 = vpop.f32.mrb[31].mxu0 }
 0x397   : > { %v5345_v33 = vadd.f32 %v5324_v45, %v1041_v27  ;;  %3914 = vmatmul.mubr.f32.gmra.mrb[54].mxu1 %v1074_v25  ;;  %v3208_v27 = vld [vmem:[%s6648_s2 + $0x198] sm:$0xff] }
 0x398   : > { %v990_v28 = vpop.f32.mrb[32].mxu0  ;;  %3916 = vmatprep.mubr.msk.f32.mxu1 %vm4717_vm0, %v4718_v6 }
 0x399   : > { %v1075_v38 = vmax.f32 %v5345_v33, 0.0  ;;  %v1042_v2 = vadd.f32 %v990_v28, %v687_v51  ;;  %v3850_v4 = vpop.f32.mrb[33].mxu0  ;;  %v3209_v28 = vld [vmem:[%s6648_s2 + $0x1a0] sm:$0xff] }
 0x39b   : > { %v5355_v41 = vadd.f32 %v5324_v45, %v1042_v2  ;;  %3917 = vmatmul.mubr.f32.gmra.mrb[56].mxu1 %v1075_v38  ;;  %v3210_v2 = vld [vmem:[%s6648_s2 + $0x1a8] sm:$0xff] }
 0x39c   : > { %v995_v43 = vpop.f32.mrb[34].mxu0  ;;  %3919 = vmatprep.mubr.msk.f32.mxu1 %vm4717_vm0, %v4718_v6  ;;  %v4517_v4 = vpack.c.bf16 %v3210_v2, %v3209_v28 }
 0x39d   : > { %v1076_v8 = vmax.f32 %v5355_v41, 0.0  ;;  %v1043_v9 = vadd.f32 %v995_v43, %v688_v57  ;;  %v3853_v42 = vpop.f32.mrb[35].mxu0  ;;  %v3211_v43 = vld [vmem:[%s6648_s2 + $0x1b0] sm:$0xff] }
 0x39f   : > { %v5365_v49 = vadd.f32 %v5324_v45, %v1043_v9  ;;  %3920 = vmatmul.mubr.f32.gmra.mrb[58].mxu1 %v1076_v8  ;;  %v3212_v9 = vld [vmem:[%s6648_s2 + $0x1b8] sm:$0xff] }
 0x3a0   : > { %v1000_v51 = vpop.f32.mrb[36].mxu0  ;;  %3922 = vmatprep.mubr.msk.f32.mxu1 %vm4717_vm0, %v4718_v6  ;;  %v4520_v42 = vpack.c.bf16 %v3212_v9, %v3211_v43 }
 0x3a1   : > { %v1077_v12 = vmax.f32 %v5365_v49, 0.0  ;;  %v1044_v13 = vadd.f32 %v1000_v51, %v689_v61  ;;  %v3856_v44 = vpop.f32.mrb[37].mxu0  ;;  %v3213_v51 = vld [vmem:[%s6648_s2 + $0x1c0] sm:$0xff] }
 0x3a3   : > { %v5375_v56 = vadd.f32 %v5324_v45, %v1044_v13  ;;  %3923 = vmatmul.mubr.f32.gmra.mrb[60].mxu1 %v1077_v12  ;;  %v3214_v13 = vld [vmem:[%s6648_s2 + $0x1c8] sm:$0xff] }
 0x3a4   : > { %v1005_v57 = vpop.f32.mrb[38].mxu0  ;;  %3925 = vmatprep.mubr.msk.f32.mxu1 %vm4717_vm0, %v4718_v6  ;;  %v4523_v44 = vpack.c.bf16 %v3214_v13, %v3213_v51 }
 0x3a5   : > { %v1078_v16 = vmax.f32 %v5375_v56, 0.0  ;;  %v1045_v17 = vadd.f32 %v1005_v57, %v690_v1  ;;  %v3859_v46 = vpop.f32.mrb[39].mxu0  ;;  %v3215_v57 = vld [vmem:[%s6648_s2 + $0x1d0] sm:$0xff] }
 0x3a7   : > { %v5385_v60 = vadd.f32 %v5324_v45, %v1045_v17  ;;  %3926 = vmatmul.mubr.f32.gmra.mrb[62].mxu1 %v1078_v16  ;;  %v3216_v17 = vld [vmem:[%s6648_s2 + $0x1d8] sm:$0xff] }
 0x3a8   : > { %v1010_v61 = vpop.f32.mrb[40].mxu0  ;;  %3928 = vmatprep.mubr.msk.f32.mxu1 %vm4717_vm0, %v4718_v6  ;;  %v4526_v46 = vpack.c.bf16 %v3216_v17, %v3215_v57 }
 0x3a9   : > { %v1079_v19 = vmax.f32 %v5385_v60, 0.0  ;;  %v1046_v20 = vadd.f32 %v1010_v61, %v691_v7  ;;  %v3862_v48 = vpop.f32.mrb[41].mxu0  ;;  %v3217_v61 = vld [vmem:[%s6648_s2 + $0x1e0] sm:$0xff] }
 0x3ab   : > { %v5395_v0 = vadd.f32 %v5324_v45, %v1046_v20  ;;  %3929 = vmatmul.mubr.f32.gmra.mrb[64].mxu1 %v1079_v19  ;;  %v3218_v20 = vld [vmem:[%s6648_s2 + $0x1e8] sm:$0xff] }
 0x3ac   : > { %v1015_v1 = vpop.f32.mrb[42].mxu0  ;;  %3931 = vmatprep.mubr.msk.f32.mxu1 %vm4717_vm0, %v4718_v6  ;;  %v4529_v48 = vpack.c.bf16 %v3218_v20, %v3217_v61 }
 0x3ad   : > { %v1080_v24 = vmax.f32 %v5395_v0, 0.0  ;;  %v1047_v26 = vadd.f32 %v1015_v1, %v692_v11  ;;  %v3865_v52 = vpop.f32.mrb[43].mxu0  ;;  %v5508_v1 = vld [vmem:[%s6650_s4 + $0x2] ss:$0 sm:$0xff] }
 0x3af   : > { %v5405_v5 = vadd.f32 %v5324_v45, %v1047_v26  ;;  %3932 = vmatmul.mubr.f32.gmra.mrb[66].mxu1 %v1080_v24 }
 0x3b0   : > { %v1020_v7 = vpop.f32.mrb[44].mxu0  ;;  %3934 = vmatprep.mubr.msk.f32.mxu1 %vm4717_vm0, %v4718_v6 }
 0x3b1   : > { %v1081_v22 = vmax.f32 %v5405_v5, 0.0  ;;  %v1048_v31 = vadd.f32 %v1020_v7, %v693_v15  ;;  %v3868_v35 = vpop.f32.mrb[45].mxu0 }
 0x3b3   : > { %v5415_v10 = vadd.f32 %v5324_v45, %v1048_v31  ;;  %3935 = vmatmul.mubr.f32.gmra.mrb[68].mxu1 %v1081_v22 }
 0x3b4   : > { %v1025_v11 = vpop.f32.mrb[46].mxu0  ;;  %3937 = vmatprep.mubr.msk.f32.mxu1 %vm4717_vm0, %v4718_v6 }
 0x3b5   : > { %v1082_v40 = vmax.f32 %v5415_v10, 0.0  ;;  %v1049_v37 = vadd.f32 %v1025_v11, %v694_v54  ;;  %v3871_v39 = vpop.f32.mrb[47].mxu0 }
 0x3b7   : > { %v5425_v14 = vadd.f32 %v5324_v45, %v1049_v37  ;;  %3938 = vmatmul.mubr.f32.gmra.mrb[70].mxu1 %v1082_v40 }
 0x3b8   : > { %v1030_v15 = vpop.f32.mrb[48].mxu0  ;;  %3940 = vmatprep.mubr.msk.f32.mxu1 %vm4717_vm0, %v4718_v6 }
 0x3b9   : > { %v1083_v30 = vmax.f32 %v5425_v14, 0.0  ;;  %v1050_v47 = vadd.f32 %v1030_v15, %v695_v23  ;;  %v3874_v32 = vpop.f32.mrb[49].mxu0 }
 0x3bb   : > { %v5435_v18 = vadd.f32 %v5324_v45, %v1050_v47  ;;  %3941 = vmatmul.mubr.f32.gmra.mrb[72].mxu1 %v1083_v30 }
 0x3bc   : > { %v1035_v54 = vpop.f32.mrb[50].mxu0  ;;  %3943 = vmatprep.mubr.msk.f32.mxu1 %vm4717_vm0, %v4718_v6 }
 0x3bd   : > { %v1084_v55 = vmax.f32 %v5435_v18, 0.0  ;;  %v1051_v58 = vadd.f32 %v1035_v54, %v696_v50  ;;  %v3877_v59 = vpop.f32.mrb[51].mxu0  ;;  %v3206_v50 = vld [vmem:[%s6648_s2 + $0x188] sm:$0xff] }
 0x3be   : > { %v4511_v62 = vpack.c.bf16 %v3206_v50, %v3205_v29 }
 0x3bf   : > { %v5445_v21 = vadd.f32 %v5324_v45, %v1051_v58  ;;  %3944 = vmatmul.mubr.f32.gmra.mrb[74].mxu1 %v1084_v55  ;;  %v3207_v45 = vld [vmem:[%s6648_s2 + $0x190] sm:$0xff] }
 0x3c0   : > { %3946 = vmatprep.mubr.msk.f32.mxu1 %vm4717_vm0, %v4718_v6  ;;  %4512 = vmatpush3.bf16.msra.mxu1 %v4511_v62  ;;  %v4514_v63 = vpack.c.bf16 %v3208_v27, %v3207_v45 }
 0x3c1   : > { %v1085_v23 = vmax.f32 %v5445_v21, 0.0  ;;  %4513 = vmatprep.subr.bf16.mxu1 %v4716_v3  ;;  %v3240_v21 = vld [vmem:[%s6648_s2 + $0x200] sm:$0xff] }
 0x3c3   : > { %3947 = vmatmul.mubr.f32.gmra.mrb[76].mxu1 %v1085_v23 }
 0x3c4   : > { %4022 = vmatprep.mubr.msk.f32.mxu1 %vm4717_vm0, %v4718_v6  ;;  %4515 = vmatpush3.bf16.msra.mxu1 %v4514_v63 }
 0x3c5   : > { %4516 = vmatprep.subr.bf16.mxu1 %v4716_v3 }
 0x3c8   : > { %4518 = vmatpush3.bf16.msra.mxu1 %v4517_v4 }
 0x3c9   : > { %4519 = vmatprep.subr.bf16.mxu1 %v4716_v3 }
 0x3cc   : > { %4521 = vmatpush3.bf16.msra.mxu1 %v4520_v42 }
 0x3cd   : > { %4522 = vmatprep.subr.bf16.mxu1 %v4716_v3 }
 0x3d0   : > { %4524 = vmatpush3.bf16.msra.mxu1 %v4523_v44 }
 0x3d1   : > { %4525 = vmatprep.subr.bf16.mxu1 %v4716_v3 }
 0x3d4   : > { %4527 = vmatpush3.bf16.msra.mxu1 %v4526_v46 }
 0x3d5   : > { %4528 = vmatprep.subr.bf16.mxu1 %v4716_v3 }
 0x3d8   : > { %4530 = vmatpush3.bf16.msra.mxu1 %v4529_v48 }
 0x3d9   : > { %4531 = vmatprep.subr.bf16.mxu1 %v4716_v3 }
 0x466   : > { %v1177_v26 = vpop.f32.mrb[52].mxu1 }
 0x467   : > { %v1178_v52 = vadd.f32 %v5508_v1, %v1177_v26  ;;  %v3912_v7 = vpop.f32.mrb[53].mxu1 }
 0x469   : > { %v1241_v31 = vmax.f32 %v1178_v52, 0.0 }
 0x46a   : > { %v1182_v35 = vpop.f32.mrb[54].mxu1 }
 0x46b   : > { %v1183_v11 = vadd.f32 %v5508_v1, %v1182_v35  ;;  %v3915_v37 = vpop.f32.mrb[55].mxu1  ;;  %3952 = vmatmul.mubr.msk.f32.vlgmr.msra.gmra.mrb[52].mxu0 %vm477_vm2, %v1241_v31 }
 0x46c   : > { %3954 = vmatprep.mubr.msk.f32.mxu0 %vm4717_vm0, %v4718_v6 }
 0x46d   : > { %v1242_v39 = vmax.f32 %v1183_v11, 0.0 }
 0x46e   : > { %v1187_v15 = vpop.f32.mrb[56].mxu1 }
 0x46f   : > { %v1188_v47 = vadd.f32 %v5508_v1, %v1187_v15  ;;  %v3918_v32 = vpop.f32.mrb[57].mxu1  ;;  %3955 = vmatmul.mubr.msk.f32.gmra.mrb[54].mxu0 %vm477_vm2, %v1242_v39 }
 0x470   : > { %3957 = vmatprep.mubr.msk.f32.mxu0 %vm4717_vm0, %v4718_v6 }
 0x471   : > { %v1243_v54 = vmax.f32 %v1188_v47, 0.0 }
 0x472   : > { %v1192_v58 = vpop.f32.mrb[58].mxu1 }
 0x473   : > { %v1193_v59 = vadd.f32 %v5508_v1, %v1192_v58  ;;  %v3921_v29 = vpop.f32.mrb[59].mxu1  ;;  %3958 = vmatmul.mubr.msk.f32.gmra.mrb[56].mxu0 %vm477_vm2, %v1243_v54 }
 0x474   : > { %3960 = vmatprep.mubr.msk.f32.mxu0 %vm4717_vm0, %v4718_v6 }
 0x475   : > { %v1244_v50 = vmax.f32 %v1193_v59, 0.0 }
 0x476   : > { %v1197_v45 = vpop.f32.mrb[60].mxu1 }
 0x477   : > { %v1198_v62 = vadd.f32 %v5508_v1, %v1197_v45  ;;  %v3924_v27 = vpop.f32.mrb[61].mxu1  ;;  %3961 = vmatmul.mubr.msk.f32.gmra.mrb[58].mxu0 %vm477_vm2, %v1244_v50 }
 0x478   : > { %3963 = vmatprep.mubr.msk.f32.mxu0 %vm4717_vm0, %v4718_v6 }
 0x479   : > { %v1245_v63 = vmax.f32 %v1198_v62, 0.0  ;;  %v3219_v62 = vld [vmem:[%s6648_s2 + $0x1f0] sm:$0xff] }
 0x47a   : > { %v1202_v28 = vpop.f32.mrb[62].mxu1 }
 0x47b   : > { %v1203_v2 = vadd.f32 %v5508_v1, %v1202_v28  ;;  %v3927_v4 = vpop.f32.mrb[63].mxu1  ;;  %3964 = vmatmul.mubr.msk.f32.gmra.mrb[60].mxu0 %vm477_vm2, %v1245_v63  ;;  %v3223_v63 = vld [vmem:[%s6649_s3 + $0xc] sm:$0xf] }
 0x47c   : > { %3966 = vmatprep.mubr.msk.f32.mxu0 %vm4717_vm0, %v4718_v6  ;;  %4062 = vmatpush3.msk.msra.mxu0 %vm517_vm1, %v3223_v63 }
 0x47d   : > { %v1246_v43 = vmax.f32 %v1203_v2, 0.0  ;;  %4173 = vmatprep.subr.mxu0 %v4718_v6  ;;  %v5577_v2 = vld [vmem:[%s6651_s5 + $0x2] ss:$0 sm:$0xff] }
 0x47e   : > { %v1207_v9 = vpop.f32.mrb[64].mxu1 }
 0x47f   : > { %v1208_v42 = vadd.f32 %v5508_v1, %v1207_v9  ;;  %v3930_v51 = vpop.f32.mrb[65].mxu1  ;;  %3967 = vmatmul.mubr.msk.f32.gmra.mrb[62].mxu0 %vm477_vm2, %v1246_v43 }
 0x480   : > { %3969 = vmatprep.mubr.msk.f32.mxu0 %vm4717_vm0, %v4718_v6 }
 0x481   : > { %v1247_v13 = vmax.f32 %v1208_v42, 0.0 }
 0x482   : > { %v1212_v44 = vpop.f32.mrb[66].mxu1 }
 0x483   : > { %v1213_v57 = vadd.f32 %v5508_v1, %v1212_v44  ;;  %v3933_v17 = vpop.f32.mrb[67].mxu1  ;;  %3970 = vmatmul.mubr.msk.f32.gmra.mrb[64].mxu0 %vm477_vm2, %v1247_v13 }
 0x484   : > { %3972 = vmatprep.mubr.msk.f32.mxu0 %vm4717_vm0, %v4718_v6 }
 0x485   : > { %v1248_v46 = vmax.f32 %v1213_v57, 0.0 }
 0x486   : > { %v1217_v61 = vpop.f32.mrb[68].mxu1 }
 0x487   : > { %v1218_v20 = vadd.f32 %v5508_v1, %v1217_v61  ;;  %v3936_v48 = vpop.f32.mrb[69].mxu1  ;;  %3973 = vmatmul.mubr.msk.f32.gmra.mrb[66].mxu0 %vm477_vm2, %v1248_v46 }
 0x488   : > { %3975 = vmatprep.mubr.msk.f32.mxu0 %vm4717_vm0, %v4718_v6 }
 0x489   : > { %v1249_v26 = vmax.f32 %v1218_v20, 0.0 }
 0x48a   : > { %v1222_v52 = vpop.f32.mrb[70].mxu1 }
 0x48b   : > { %v1223_v7 = vadd.f32 %v5508_v1, %v1222_v52  ;;  %v3939_v31 = vpop.f32.mrb[71].mxu1  ;;  %3976 = vmatmul.mubr.msk.f32.gmra.mrb[68].mxu0 %vm477_vm2, %v1249_v26 }
 0x48c   : > { %3978 = vmatprep.mubr.msk.f32.mxu0 %vm4717_vm0, %v4718_v6 }
 0x48d   : > { %v1250_v35 = vmax.f32 %v1223_v7, 0.0 }
 0x48e   : > { %v1227_v11 = vpop.f32.mrb[72].mxu1 }
 0x48f   : > { %v1228_v37 = vadd.f32 %v5508_v1, %v1227_v11  ;;  %v3942_v39 = vpop.f32.mrb[73].mxu1  ;;  %3979 = vmatmul.mubr.msk.f32.gmra.mrb[70].mxu0 %vm477_vm2, %v1250_v35 }
 0x490   : > { %3981 = vmatprep.mubr.msk.f32.mxu0 %vm4717_vm0, %v4718_v6 }
 0x491   : > { %v1251_v15 = vmax.f32 %v1228_v37, 0.0 }
 0x492   : > { %v1232_v47 = vpop.f32.mrb[74].mxu1 }
 0x493   : > { %v1233_v32 = vadd.f32 %v5508_v1, %v1232_v47  ;;  %v3945_v54 = vpop.f32.mrb[75].mxu1  ;;  %3982 = vmatmul.mubr.msk.f32.gmra.mrb[72].mxu0 %vm477_vm2, %v1251_v15 }
 0x494   : > { %3984 = vmatprep.mubr.msk.f32.mxu0 %vm4717_vm0, %v4718_v6 }
 0x495   : > { %v1252_v58 = vmax.f32 %v1233_v32, 0.0 }
 0x496   : > { %v1237_v59 = vpop.f32.mrb[76].mxu1 }
 0x497   : > { %v1238_v29 = vadd.f32 %v5508_v1, %v1237_v59  ;;  %v3948_v50 = vpop.f32.mrb[77].mxu1  ;;  %3985 = vmatmul.mubr.msk.f32.gmra.mrb[74].mxu0 %vm477_vm2, %v1252_v58  ;;  %v3220_v1 = vld [vmem:[%s6648_s2 + $0x1f8] sm:$0xff] }
 0x498   : > { %3987 = vmatprep.mubr.msk.f32.mxu0 %vm4717_vm0, %v4718_v6  ;;  %v4532_v27 = vpack.c.bf16 %v3220_v1, %v3219_v62 }
 0x499   : > { %v1253_v45 = vmax.f32 %v1238_v29, 0.0 }
 0x49a   : > { %4533 = vmatpush3.bf16.msra.mxu1 %v4532_v27 }
 0x49b   : > { %3988 = vmatmul.mubr.msk.f32.gmra.mrb[76].mxu0 %vm477_vm2, %v1253_v45  ;;  %4534 = vmatprep.subr.bf16.mxu1 %v4716_v3 }
 0x49c   : > { %4063 = vmatprep.mubr.msk.f32.mxu0 %vm4717_vm0, %v4718_v6 }
 0x53e   : > { %v1364_v28 = vpop.f32.mrb[52].mxu0 }
 0x53f   : > { %v1428_v4 = vadd.f32 %v1364_v28, %v1073_v34  ;;  %v3953_v43 = vpop.f32.mrb[53].mxu0 }
 0x541   : > { %v5582_v9 = vadd.f32 %v5577_v2, %v1428_v4 }
 0x542   : > { %v1369_v42 = vpop.f32.mrb[54].mxu0 }
 0x543   : > { %v1462_v51 = vmax.f32 %v5582_v9, 0.0  ;;  %v1429_v13 = vadd.f32 %v1369_v42, %v1074_v25  ;;  %v3956_v44 = vpop.f32.mrb[55].mxu0 }
 0x545   : > { %v5588_v57 = vadd.f32 %v5577_v2, %v1429_v13  ;;  %4023 = vmatmul.mubr.f32.vlgmr.msra.gmra.mrb[78].mxu1 %v1462_v51 }
 0x546   : > { %v1374_v17 = vpop.f32.mrb[56].mxu0  ;;  %4025 = vmatprep.mubr.msk.f32.mxu1 %vm4717_vm0, %v4718_v6 }
 0x547   : > { %v1463_v53 = vmax.f32 %v5588_v57, 0.0  ;;  %v1430_v34 = vadd.f32 %v1374_v17, %v1075_v38  ;;  %v3959_v46 = vpop.f32.mrb[57].mxu0 }
 0x549   : > { %v5598_v36 = vadd.f32 %v5577_v2, %v1430_v34  ;;  %4026 = vmatmul.mubr.f32.gmra.mrb[80].mxu1 %v1463_v53  ;;  %v3243_v34 = vld [vmem:[%s6648_s2 + $0x218] sm:$0xff] }
 0x54a   : > { %v1379_v25 = vpop.f32.mrb[58].mxu0  ;;  %4028 = vmatprep.mubr.msk.f32.mxu1 %vm4717_vm0, %v4718_v6 }
 0x54b   : > { %v1464_v61 = vmax.f32 %v5598_v36, 0.0  ;;  %v1431_v20 = vadd.f32 %v1379_v25, %v1076_v8  ;;  %v3962_v48 = vpop.f32.mrb[59].mxu0  ;;  %v3244_v25 = vld [vmem:[%s6648_s2 + $0x220] sm:$0xff] }
 0x54d   : > { %v5608_v33 = vadd.f32 %v5577_v2, %v1431_v20  ;;  %4029 = vmatmul.mubr.f32.gmra.mrb[82].mxu1 %v1464_v61  ;;  %v3245_v20 = vld [vmem:[%s6648_s2 + $0x228] sm:$0xff] }
 0x54e   : > { %v1384_v38 = vpop.f32.mrb[60].mxu0  ;;  %4031 = vmatprep.mubr.msk.f32.mxu1 %vm4717_vm0, %v4718_v6  ;;  %v4541_v48 = vpack.c.bf16 %v3245_v20, %v3244_v25 }
 0x54f   : > { %v1465_v26 = vmax.f32 %v5608_v33, 0.0  ;;  %v1432_v52 = vadd.f32 %v1384_v38, %v1077_v12  ;;  %v3965_v7 = vpop.f32.mrb[61].mxu0  ;;  %v3246_v38 = vld [vmem:[%s6648_s2 + $0x230] sm:$0xff] }
 0x551   : > { %v5618_v41 = vadd.f32 %v5577_v2, %v1432_v52  ;;  %4032 = vmatmul.mubr.f32.gmra.mrb[84].mxu1 %v1465_v26  ;;  %v3247_v52 = vld [vmem:[%s6648_s2 + $0x238] sm:$0xff] }
 0x552   : > { %v1389_v8 = vpop.f32.mrb[62].mxu0  ;;  %4034 = vmatprep.mubr.msk.f32.mxu1 %vm4717_vm0, %v4718_v6  ;;  %v4544_v7 = vpack.c.bf16 %v3247_v52, %v3246_v38 }
 0x553   : > { %v1466_v31 = vmax.f32 %v5618_v41, 0.0  ;;  %v1433_v35 = vadd.f32 %v1389_v8, %v1078_v16  ;;  %v3968_v11 = vpop.f32.mrb[63].mxu0  ;;  %v3248_v8 = vld [vmem:[%s6648_s2 + $0x240] sm:$0xff] }
 0x555   : > { %v5628_v49 = vadd.f32 %v5577_v2, %v1433_v35  ;;  %4035 = vmatmul.mubr.f32.gmra.mrb[86].mxu1 %v1466_v31  ;;  %v3249_v35 = vld [vmem:[%s6648_s2 + $0x248] sm:$0xff] }
 0x556   : > { %v1394_v12 = vpop.f32.mrb[64].mxu0  ;;  %4037 = vmatprep.mubr.msk.f32.mxu1 %vm4717_vm0, %v4718_v6  ;;  %v4547_v11 = vpack.c.bf16 %v3249_v35, %v3248_v8 }
 0x557   : > { %v1467_v37 = vmax.f32 %v5628_v49, 0.0  ;;  %v1434_v39 = vadd.f32 %v1394_v12, %v1079_v19  ;;  %v3971_v15 = vpop.f32.mrb[65].mxu0  ;;  %v3250_v12 = vld [vmem:[%s6648_s2 + $0x250] sm:$0xff] }
 0x559   : > { %v5638_v56 = vadd.f32 %v5577_v2, %v1434_v39  ;;  %4038 = vmatmul.mubr.f32.gmra.mrb[88].mxu1 %v1467_v37  ;;  %v3251_v39 = vld [vmem:[%s6648_s2 + $0x258] sm:$0xff] }
 0x55a   : > { %v1399_v16 = vpop.f32.mrb[66].mxu0  ;;  %4040 = vmatprep.mubr.msk.f32.mxu1 %vm4717_vm0, %v4718_v6  ;;  %v4550_v15 = vpack.c.bf16 %v3251_v39, %v3250_v12 }
 0x55b   : > { %v1468_v47 = vmax.f32 %v5638_v56, 0.0  ;;  %v1435_v32 = vadd.f32 %v1399_v16, %v1080_v24  ;;  %v3974_v54 = vpop.f32.mrb[67].mxu0  ;;  %v3252_v16 = vld [vmem:[%s6648_s2 + $0x260] sm:$0xff] }
 0x55d   : > { %v5648_v60 = vadd.f32 %v5577_v2, %v1435_v32  ;;  %4041 = vmatmul.mubr.f32.gmra.mrb[90].mxu1 %v1468_v47  ;;  %v3253_v32 = vld [vmem:[%s6648_s2 + $0x268] sm:$0xff] }
 0x55e   : > { %v1404_v19 = vpop.f32.mrb[68].mxu0  ;;  %4043 = vmatprep.mubr.msk.f32.mxu1 %vm4717_vm0, %v4718_v6  ;;  %v4553_v54 = vpack.c.bf16 %v3253_v32, %v3252_v16 }
 0x55f   : > { %v1469_v58 = vmax.f32 %v5648_v60, 0.0  ;;  %v1436_v59 = vadd.f32 %v1404_v19, %v1081_v22  ;;  %v3977_v29 = vpop.f32.mrb[69].mxu0  ;;  %v5761_v19 = vld [vmem:[%s6650_s4 + $0x3] ss:$0 sm:$0xff] }
 0x561   : > { %v5658_v0 = vadd.f32 %v5577_v2, %v1436_v59  ;;  %4044 = vmatmul.mubr.f32.gmra.mrb[92].mxu1 %v1469_v58 }
 0x562   : > { %v1409_v24 = vpop.f32.mrb[70].mxu0  ;;  %4046 = vmatprep.mubr.msk.f32.mxu1 %vm4717_vm0, %v4718_v6 }
 0x563   : > { %v1470_v50 = vmax.f32 %v5658_v0, 0.0  ;;  %v1437_v45 = vadd.f32 %v1409_v24, %v1082_v40  ;;  %v3980_v62 = vpop.f32.mrb[71].mxu0 }
 0x565   : > { %v5668_v5 = vadd.f32 %v5577_v2, %v1437_v45  ;;  %4047 = vmatmul.mubr.f32.gmra.mrb[94].mxu1 %v1470_v50 }
 0x566   : > { %v1414_v22 = vpop.f32.mrb[72].mxu0  ;;  %4049 = vmatprep.mubr.msk.f32.mxu1 %vm4717_vm0, %v4718_v6 }
 0x567   : > { %v1471_v1 = vmax.f32 %v5668_v5, 0.0  ;;  %v1438_v27 = vadd.f32 %v1414_v22, %v1083_v30  ;;  %v3983_v63 = vpop.f32.mrb[73].mxu0 }
 0x569   : > { %v5678_v10 = vadd.f32 %v5577_v2, %v1438_v27  ;;  %4050 = vmatmul.mubr.f32.gmra.mrb[96].mxu1 %v1471_v1 }
 0x56a   : > { %v1419_v40 = vpop.f32.mrb[74].mxu0  ;;  %4052 = vmatprep.mubr.msk.f32.mxu1 %vm4717_vm0, %v4718_v6 }
 0x56b   : > { %v1472_v28 = vmax.f32 %v5678_v10, 0.0  ;;  %v1439_v4 = vadd.f32 %v1419_v40, %v1084_v55  ;;  %v3986_v43 = vpop.f32.mrb[75].mxu0 }
 0x56d   : > { %v5688_v14 = vadd.f32 %v5577_v2, %v1439_v4  ;;  %4053 = vmatmul.mubr.f32.gmra.mrb[98].mxu1 %v1472_v28 }
 0x56e   : > { %v1424_v30 = vpop.f32.mrb[76].mxu0  ;;  %4055 = vmatprep.mubr.msk.f32.mxu1 %vm4717_vm0, %v4718_v6 }
 0x56f   : > { %v1473_v42 = vmax.f32 %v5688_v14, 0.0  ;;  %v1440_v13 = vadd.f32 %v1424_v30, %v1085_v23  ;;  %v3989_v44 = vpop.f32.mrb[77].mxu0  ;;  %v3241_v23 = vld [vmem:[%s6648_s2 + $0x208] sm:$0xff] }
 0x570   : > { %v4535_v17 = vpack.c.bf16 %v3241_v23, %v3240_v21 }
 0x571   : > { %v5698_v18 = vadd.f32 %v5577_v2, %v1440_v13  ;;  %4056 = vmatmul.mubr.f32.gmra.mrb[100].mxu1 %v1473_v42  ;;  %v3242_v2 = vld [vmem:[%s6648_s2 + $0x210] sm:$0xff] }
 0x572   : > { %4058 = vmatprep.mubr.msk.f32.mxu1 %vm4717_vm0, %v4718_v6  ;;  %4536 = vmatpush3.bf16.msra.mxu1 %v4535_v17  ;;  %v4538_v46 = vpack.c.bf16 %v3243_v34, %v3242_v2 }
 0x573   : > { %v1474_v55 = vmax.f32 %v5698_v18, 0.0  ;;  %4537 = vmatprep.subr.bf16.mxu1 %v4716_v3  ;;  %v3275_v18 = vld [vmem:[%s6648_s2 + $0x280] sm:$0xff] }
 0x575   : > { %4059 = vmatmul.mubr.f32.gmra.mrb[102].mxu1 %v1474_v55 }
 0x576   : > { %4134 = vmatprep.mubr.msk.f32.mxu1 %vm4717_vm0, %v4718_v6  ;;  %4539 = vmatpush3.bf16.msra.mxu1 %v4538_v46 }
 0x577   : > { %4540 = vmatprep.subr.bf16.mxu1 %v4716_v3 }
 0x57a   : > { %4542 = vmatpush3.bf16.msra.mxu1 %v4541_v48 }
 0x57b   : > { %4543 = vmatprep.subr.bf16.mxu1 %v4716_v3 }
 0x57e   : > { %4545 = vmatpush3.bf16.msra.mxu1 %v4544_v7 }
 0x57f   : > { %4546 = vmatprep.subr.bf16.mxu1 %v4716_v3 }
 0x582   : > { %4548 = vmatpush3.bf16.msra.mxu1 %v4547_v11 }
 0x583   : > { %4549 = vmatprep.subr.bf16.mxu1 %v4716_v3 }
 0x586   : > { %4551 = vmatpush3.bf16.msra.mxu1 %v4550_v15 }
 0x587   : > { %4552 = vmatprep.subr.bf16.mxu1 %v4716_v3 }
 0x58a   : > { %4554 = vmatpush3.bf16.msra.mxu1 %v4553_v54 }
 0x58b   : > { %4555 = vmatprep.subr.bf16.mxu1 %v4716_v3 }
 0x618   : > { %v1566_v59 = vpop.f32.mrb[78].mxu1 }
 0x619   : > { %v1567_v29 = vadd.f32 %v5761_v19, %v1566_v59  ;;  %v4024_v24 = vpop.f32.mrb[79].mxu1 }
 0x61b   : > { %v1630_v45 = vmax.f32 %v1567_v29, 0.0 }
 0x61c   : > { %v1571_v62 = vpop.f32.mrb[80].mxu1 }
 0x61d   : > { %v1572_v22 = vadd.f32 %v5761_v19, %v1571_v62  ;;  %v4027_v27 = vpop.f32.mrb[81].mxu1  ;;  %4064 = vmatmul.mubr.msk.f32.vlgmr.msra.gmra.mrb[78].mxu0 %vm477_vm2, %v1630_v45 }
 0x61e   : > { %4066 = vmatprep.mubr.msk.f32.mxu0 %vm4717_vm0, %v4718_v6 }
 0x61f   : > { %v1631_v63 = vmax.f32 %v1572_v22, 0.0 }
 0x620   : > { %v1576_v40 = vpop.f32.mrb[82].mxu1 }
 0x621   : > { %v1577_v4 = vadd.f32 %v5761_v19, %v1576_v40  ;;  %v4030_v43 = vpop.f32.mrb[83].mxu1  ;;  %4067 = vmatmul.mubr.msk.f32.gmra.mrb[80].mxu0 %vm477_vm2, %v1631_v63 }
 0x622   : > { %4069 = vmatprep.mubr.msk.f32.mxu0 %vm4717_vm0, %v4718_v6 }
 0x623   : > { %v1632_v30 = vmax.f32 %v1577_v4, 0.0 }
 0x624   : > { %v1581_v13 = vpop.f32.mrb[84].mxu1 }
 0x625   : > { %v1582_v44 = vadd.f32 %v5761_v19, %v1581_v13  ;;  %v4033_v21 = vpop.f32.mrb[85].mxu1  ;;  %4070 = vmatmul.mubr.msk.f32.gmra.mrb[82].mxu0 %vm477_vm2, %v1632_v30 }
 0x626   : > { %4072 = vmatprep.mubr.msk.f32.mxu0 %vm4717_vm0, %v4718_v6 }
 0x627   : > { %v1633_v23 = vmax.f32 %v1582_v44, 0.0 }
 0x628   : > { %v1586_v2 = vpop.f32.mrb[86].mxu1 }
 0x629   : > { %v1587_v17 = vadd.f32 %v5761_v19, %v1586_v2  ;;  %v4036_v34 = vpop.f32.mrb[87].mxu1  ;;  %4073 = vmatmul.mubr.msk.f32.gmra.mrb[84].mxu0 %vm477_vm2, %v1633_v23 }
 0x62a   : > { %4075 = vmatprep.mubr.msk.f32.mxu0 %vm4717_vm0, %v4718_v6 }
 0x62b   : > { %v1634_v46 = vmax.f32 %v1587_v17, 0.0  ;;  %v3254_v17 = vld [vmem:[%s6648_s2 + $0x270] sm:$0xff] }
 0x62c   : > { %v1591_v25 = vpop.f32.mrb[88].mxu1 }
 0x62d   : > { %v1592_v20 = vadd.f32 %v5761_v19, %v1591_v25  ;;  %v4039_v48 = vpop.f32.mrb[89].mxu1  ;;  %4076 = vmatmul.mubr.msk.f32.gmra.mrb[86].mxu0 %vm477_vm2, %v1634_v46  ;;  %v3258_v46 = vld [vmem:[%s6649_s3 + $0x10] sm:$0xf] }
 0x62e   : > { %4078 = vmatprep.mubr.msk.f32.mxu0 %vm4717_vm0, %v4718_v6  ;;  %4174 = vmatpush3.msk.msra.mxu0 %vm517_vm1, %v3258_v46 }
 0x62f   : > { %v1635_v38 = vmax.f32 %v1592_v20, 0.0  ;;  %4285 = vmatprep.subr.mxu0 %v4718_v6  ;;  %v5830_v20 = vld [vmem:[%s6651_s5 + $0x3] ss:$0 sm:$0xff] }
 0x630   : > { %v1596_v52 = vpop.f32.mrb[90].mxu1 }
 0x631   : > { %v1597_v7 = vadd.f32 %v5761_v19, %v1596_v52  ;;  %v4042_v8 = vpop.f32.mrb[91].mxu1  ;;  %4079 = vmatmul.mubr.msk.f32.gmra.mrb[88].mxu0 %vm477_vm2, %v1635_v38 }
 0x632   : > { %4081 = vmatprep.mubr.msk.f32.mxu0 %vm4717_vm0, %v4718_v6 }
 0x633   : > { %v1636_v35 = vmax.f32 %v1597_v7, 0.0 }
 0x634   : > { %v1601_v11 = vpop.f32.mrb[92].mxu1 }
 0x635   : > { %v1602_v12 = vadd.f32 %v5761_v19, %v1601_v11  ;;  %v4045_v39 = vpop.f32.mrb[93].mxu1  ;;  %4082 = vmatmul.mubr.msk.f32.gmra.mrb[90].mxu0 %vm477_vm2, %v1636_v35 }
 0x636   : > { %4084 = vmatprep.mubr.msk.f32.mxu0 %vm4717_vm0, %v4718_v6 }
 0x637   : > { %v1637_v15 = vmax.f32 %v1602_v12, 0.0 }
 0x638   : > { %v1606_v16 = vpop.f32.mrb[94].mxu1 }
 0x639   : > { %v1607_v32 = vadd.f32 %v5761_v19, %v1606_v16  ;;  %v4048_v54 = vpop.f32.mrb[95].mxu1  ;;  %4085 = vmatmul.mubr.msk.f32.gmra.mrb[92].mxu0 %vm477_vm2, %v1637_v15 }
 0x63a   : > { %4087 = vmatprep.mubr.msk.f32.mxu0 %vm4717_vm0, %v4718_v6 }
 0x63b   : > { %v1638_v59 = vmax.f32 %v1607_v32, 0.0 }
 0x63c   : > { %v1611_v29 = vpop.f32.mrb[96].mxu1 }
 0x63d   : > { %v1612_v24 = vadd.f32 %v5761_v19, %v1611_v29  ;;  %v4051_v45 = vpop.f32.mrb[97].mxu1  ;;  %4088 = vmatmul.mubr.msk.f32.gmra.mrb[94].mxu0 %vm477_vm2, %v1638_v59 }
 0x63e   : > { %4090 = vmatprep.mubr.msk.f32.mxu0 %vm4717_vm0, %v4718_v6 }
 0x63f   : > { %v1639_v62 = vmax.f32 %v1612_v24, 0.0 }
 0x640   : > { %v1616_v22 = vpop.f32.mrb[98].mxu1 }
 0x641   : > { %v1617_v27 = vadd.f32 %v5761_v19, %v1616_v22  ;;  %v4054_v63 = vpop.f32.mrb[99].mxu1  ;;  %4091 = vmatmul.mubr.msk.f32.gmra.mrb[96].mxu0 %vm477_vm2, %v1639_v62 }
 0x642   : > { %4093 = vmatprep.mubr.msk.f32.mxu0 %vm4717_vm0, %v4718_v6 }
 0x643   : > { %v1640_v40 = vmax.f32 %v1617_v27, 0.0 }
 0x644   : > { %v1621_v4 = vpop.f32.mrb[100].mxu1 }
 0x645   : > { %v1622_v43 = vadd.f32 %v5761_v19, %v1621_v4  ;;  %v4057_v30 = vpop.f32.mrb[101].mxu1  ;;  %4094 = vmatmul.mubr.msk.f32.gmra.mrb[98].mxu0 %vm477_vm2, %v1640_v40 }
 0x646   : > { %4096 = vmatprep.mubr.msk.f32.mxu0 %vm4717_vm0, %v4718_v6 }
 0x647   : > { %v1641_v13 = vmax.f32 %v1622_v43, 0.0 }
 0x648   : > { %v1626_v44 = vpop.f32.mrb[102].mxu1 }
 0x649   : > { %v1627_v21 = vadd.f32 %v5761_v19, %v1626_v44  ;;  %v4060_v23 = vpop.f32.mrb[103].mxu1  ;;  %4097 = vmatmul.mubr.msk.f32.gmra.mrb[100].mxu0 %vm477_vm2, %v1641_v13  ;;  %v3255_v19 = vld [vmem:[%s6648_s2 + $0x278] sm:$0xff] }
 0x64a   : > { %4099 = vmatprep.mubr.msk.f32.mxu0 %vm4717_vm0, %v4718_v6  ;;  %v4556_v34 = vpack.c.bf16 %v3255_v19, %v3254_v17 }
 0x64b   : > { %v1642_v2 = vmax.f32 %v1627_v21, 0.0 }
 0x64c   : > { %4557 = vmatpush3.bf16.msra.mxu1 %v4556_v34 }
 0x64d   : > { %4100 = vmatmul.mubr.msk.f32.gmra.mrb[102].mxu0 %vm477_vm2, %v1642_v2  ;;  %4558 = vmatprep.subr.bf16.mxu1 %v4716_v3 }
 0x64e   : > { %4175 = vmatprep.mubr.msk.f32.mxu0 %vm4717_vm0, %v4718_v6 }
 0x6f0   : > { %v1753_v25 = vpop.f32.mrb[78].mxu0 }
 0x6f1   : > { %v1817_v48 = vadd.f32 %v1753_v25, %v1462_v51  ;;  %v4065_v38 = vpop.f32.mrb[79].mxu0 }
 0x6f3   : > { %v5835_v52 = vadd.f32 %v5830_v20, %v1817_v48 }
 0x6f4   : > { %v1758_v7 = vpop.f32.mrb[80].mxu0 }
 0x6f5   : > { %v1851_v8 = vmax.f32 %v5835_v52, 0.0  ;;  %v1818_v35 = vadd.f32 %v1758_v7, %v1463_v53  ;;  %v4068_v11 = vpop.f32.mrb[81].mxu0 }
 0x6f7   : > { %v5841_v12 = vadd.f32 %v5830_v20, %v1818_v35  ;;  %4135 = vmatmul.mubr.f32.vlgmr.msra.gmra.mrb[104].mxu1 %v1851_v8 }
 0x6f8   : > { %v1763_v39 = vpop.f32.mrb[82].mxu0  ;;  %4137 = vmatprep.mubr.msk.f32.mxu1 %vm4717_vm0, %v4718_v6 }
 0x6f9   : > { %v1852_v9 = vmax.f32 %v5841_v12, 0.0  ;;  %v1819_v51 = vadd.f32 %v1763_v39, %v1464_v61  ;;  %v4071_v15 = vpop.f32.mrb[83].mxu0 }
 0x6fb   : > { %v5851_v57 = vadd.f32 %v5830_v20, %v1819_v51  ;;  %4138 = vmatmul.mubr.f32.gmra.mrb[106].mxu1 %v1852_v9  ;;  %v3278_v51 = vld [vmem:[%s6648_s2 + $0x298] sm:$0xff] }
 0x6fc   : > { %v1768_v53 = vpop.f32.mrb[84].mxu0  ;;  %4140 = vmatprep.mubr.msk.f32.mxu1 %vm4717_vm0, %v4718_v6 }
 0x6fd   : > { %v1853_v16 = vmax.f32 %v5851_v57, 0.0  ;;  %v1820_v32 = vadd.f32 %v1768_v53, %v1465_v26  ;;  %v4074_v54 = vpop.f32.mrb[85].mxu0  ;;  %v3279_v53 = vld [vmem:[%s6648_s2 + $0x2a0] sm:$0xff] }
 0x6ff   : > { %v5861_v36 = vadd.f32 %v5830_v20, %v1820_v32  ;;  %4141 = vmatmul.mubr.f32.gmra.mrb[108].mxu1 %v1853_v16  ;;  %v3280_v32 = vld [vmem:[%s6648_s2 + $0x2a8] sm:$0xff] }
 0x700   : > { %v1773_v61 = vpop.f32.mrb[86].mxu0  ;;  %4143 = vmatprep.mubr.msk.f32.mxu1 %vm4717_vm0, %v4718_v6  ;;  %v4565_v54 = vpack.c.bf16 %v3280_v32, %v3279_v53 }
 0x701   : > { %v1854_v59 = vmax.f32 %v5861_v36, 0.0  ;;  %v1821_v29 = vadd.f32 %v1773_v61, %v1466_v31  ;;  %v4077_v24 = vpop.f32.mrb[87].mxu0  ;;  %v3281_v61 = vld [vmem:[%s6648_s2 + $0x2b0] sm:$0xff] }
 0x703   : > { %v5871_v33 = vadd.f32 %v5830_v20, %v1821_v29  ;;  %4144 = vmatmul.mubr.f32.gmra.mrb[110].mxu1 %v1854_v59  ;;  %v3282_v29 = vld [vmem:[%s6648_s2 + $0x2b8] sm:$0xff] }
 0x704   : > { %v1778_v26 = vpop.f32.mrb[88].mxu0  ;;  %4146 = vmatprep.mubr.msk.f32.mxu1 %vm4717_vm0, %v4718_v6  ;;  %v4568_v24 = vpack.c.bf16 %v3282_v29, %v3281_v61 }
 0x705   : > { %v1855_v45 = vmax.f32 %v5871_v33, 0.0  ;;  %v1822_v62 = vadd.f32 %v1778_v26, %v1467_v37  ;;  %v4080_v22 = vpop.f32.mrb[89].mxu0  ;;  %v3283_v26 = vld [vmem:[%s6648_s2 + $0x2c0] sm:$0xff] }
 0x707   : > { %v5881_v41 = vadd.f32 %v5830_v20, %v1822_v62  ;;  %4147 = vmatmul.mubr.f32.gmra.mrb[112].mxu1 %v1855_v45  ;;  %v3284_v62 = vld [vmem:[%s6648_s2 + $0x2c8] sm:$0xff] }
 0x708   : > { %v1783_v31 = vpop.f32.mrb[90].mxu0  ;;  %4149 = vmatprep.mubr.msk.f32.mxu1 %vm4717_vm0, %v4718_v6  ;;  %v4571_v22 = vpack.c.bf16 %v3284_v62, %v3283_v26 }
 0x709   : > { %v1856_v27 = vmax.f32 %v5881_v41, 0.0  ;;  %v1823_v63 = vadd.f32 %v1783_v31, %v1468_v47  ;;  %v4083_v40 = vpop.f32.mrb[91].mxu0  ;;  %v3285_v31 = vld [vmem:[%s6648_s2 + $0x2d0] sm:$0xff] }
 0x70b   : > { %v5891_v49 = vadd.f32 %v5830_v20, %v1823_v63  ;;  %4150 = vmatmul.mubr.f32.gmra.mrb[114].mxu1 %v1856_v27  ;;  %v3286_v63 = vld [vmem:[%s6648_s2 + $0x2d8] sm:$0xff] }
 0x70c   : > { %v1788_v37 = vpop.f32.mrb[92].mxu0  ;;  %4152 = vmatprep.mubr.msk.f32.mxu1 %vm4717_vm0, %v4718_v6  ;;  %v4574_v40 = vpack.c.bf16 %v3286_v63, %v3285_v31 }
 0x70d   : > { %v1857_v4 = vmax.f32 %v5891_v49, 0.0  ;;  %v1824_v43 = vadd.f32 %v1788_v37, %v1469_v58  ;;  %v4086_v30 = vpop.f32.mrb[93].mxu0  ;;  %v3287_v37 = vld [vmem:[%s6648_s2 + $0x2e0] sm:$0xff] }
 0x70f   : > { %v5901_v56 = vadd.f32 %v5830_v20, %v1824_v43  ;;  %4153 = vmatmul.mubr.f32.gmra.mrb[116].mxu1 %v1857_v4  ;;  %v3288_v43 = vld [vmem:[%s6648_s2 + $0x2e8] sm:$0xff] }
 0x710   : > { %v1793_v47 = vpop.f32.mrb[94].mxu0  ;;  %4155 = vmatprep.mubr.msk.f32.mxu1 %vm4717_vm0, %v4718_v6  ;;  %v4577_v30 = vpack.c.bf16 %v3288_v43, %v3287_v37 }
 0x711   : > { %v1858_v13 = vmax.f32 %v5901_v56, 0.0  ;;  %v1825_v44 = vadd.f32 %v1793_v47, %v1470_v50  ;;  %v4089_v21 = vpop.f32.mrb[95].mxu0  ;;  %v6014_v47 = vld [vmem:[%s6650_s4 + $0x4] ss:$0 sm:$0xff] }
 0x713   : > { %v5911_v60 = vadd.f32 %v5830_v20, %v1825_v44  ;;  %4156 = vmatmul.mubr.f32.gmra.mrb[118].mxu1 %v1858_v13 }
 0x714   : > { %v1798_v58 = vpop.f32.mrb[96].mxu0  ;;  %4158 = vmatprep.mubr.msk.f32.mxu1 %vm4717_vm0, %v4718_v6 }
 0x715   : > { %v1859_v23 = vmax.f32 %v5911_v60, 0.0  ;;  %v1826_v2 = vadd.f32 %v1798_v58, %v1471_v1  ;;  %v4092_v17 = vpop.f32.mrb[97].mxu0 }
 0x717   : > { %v5921_v0 = vadd.f32 %v5830_v20, %v1826_v2  ;;  %4159 = vmatmul.mubr.f32.gmra.mrb[120].mxu1 %v1859_v23 }
 0x718   : > { %v1803_v50 = vpop.f32.mrb[98].mxu0  ;;  %4161 = vmatprep.mubr.msk.f32.mxu1 %vm4717_vm0, %v4718_v6 }
 0x719   : > { %v1860_v19 = vmax.f32 %v5921_v0, 0.0  ;;  %v1827_v34 = vadd.f32 %v1803_v50, %v1472_v28  ;;  %v4095_v46 = vpop.f32.mrb[99].mxu0 }
 0x71b   : > { %v5931_v5 = vadd.f32 %v5830_v20, %v1827_v34  ;;  %4162 = vmatmul.mubr.f32.gmra.mrb[122].mxu1 %v1860_v19 }
 0x71c   : > { %v1808_v1 = vpop.f32.mrb[100].mxu0  ;;  %4164 = vmatprep.mubr.msk.f32.mxu1 %vm4717_vm0, %v4718_v6 }
 0x71d   : > { %v1861_v25 = vmax.f32 %v5931_v5, 0.0  ;;  %v1828_v48 = vadd.f32 %v1808_v1, %v1473_v42  ;;  %v4098_v38 = vpop.f32.mrb[101].mxu0 }
 0x71f   : > { %v5941_v10 = vadd.f32 %v5830_v20, %v1828_v48  ;;  %4165 = vmatmul.mubr.f32.gmra.mrb[124].mxu1 %v1861_v25 }
 0x720   : > { %v1813_v28 = vpop.f32.mrb[102].mxu0  ;;  %4167 = vmatprep.mubr.msk.f32.mxu1 %vm4717_vm0, %v4718_v6 }
 0x721   : > { %v1862_v7 = vmax.f32 %v5941_v10, 0.0  ;;  %v1829_v35 = vadd.f32 %v1813_v28, %v1474_v55  ;;  %v4101_v11 = vpop.f32.mrb[103].mxu0  ;;  %v3276_v55 = vld [vmem:[%s6648_s2 + $0x288] sm:$0xff] }
 0x722   : > { %v4559_v39 = vpack.c.bf16 %v3276_v55, %v3275_v18 }
 0x723   : > { %v5951_v14 = vadd.f32 %v5830_v20, %v1829_v35  ;;  %4168 = vmatmul.mubr.f32.gmra.mrb[126].mxu1 %v1862_v7  ;;  %v3277_v20 = vld [vmem:[%s6648_s2 + $0x290] sm:$0xff] }
 0x724   : > { %4170 = vmatprep.mubr.msk.f32.mxu1 %vm4717_vm0, %v4718_v6  ;;  %4560 = vmatpush3.bf16.msra.mxu1 %v4559_v39  ;;  %v4562_v15 = vpack.c.bf16 %v3278_v51, %v3277_v20 }
 0x725   : > { %v1863_v42 = vmax.f32 %v5951_v14, 0.0  ;;  %4561 = vmatprep.subr.bf16.mxu1 %v4716_v3  ;;  %v3310_v14 = vld [vmem:[%s6648_s2 + $0x300] sm:$0xff] }
 0x727   : > { %4171 = vmatmul.mubr.f32.gmra.mrb[128].mxu1 %v1863_v42 }
 0x728   : > { %4246 = vmatprep.mubr.msk.f32.mxu1 %vm4717_vm0, %v4718_v6  ;;  %4563 = vmatpush3.bf16.msra.mxu1 %v4562_v15 }
 0x729   : > { %4564 = vmatprep.subr.bf16.mxu1 %v4716_v3 }
 0x72c   : > { %4566 = vmatpush3.bf16.msra.mxu1 %v4565_v54 }
 0x72d   : > { %4567 = vmatprep.subr.bf16.mxu1 %v4716_v3 }
 0x730   : > { %4569 = vmatpush3.bf16.msra.mxu1 %v4568_v24 }
 0x731   : > { %4570 = vmatprep.subr.bf16.mxu1 %v4716_v3 }
 0x734   : > { %4572 = vmatpush3.bf16.msra.mxu1 %v4571_v22 }
 0x735   : > { %4573 = vmatprep.subr.bf16.mxu1 %v4716_v3 }
 0x738   : > { %4575 = vmatpush3.bf16.msra.mxu1 %v4574_v40 }
 0x739   : > { %4576 = vmatprep.subr.bf16.mxu1 %v4716_v3 }
 0x73c   : > { %4578 = vmatpush3.bf16.msra.mxu1 %v4577_v30 }
 0x73d   : > { %4579 = vmatprep.subr.bf16.mxu1 %v4716_v3 }
 0x7ca   : > { %v1955_v44 = vpop.f32.mrb[104].mxu1 }
 0x7cb   : > { %v1956_v21 = vadd.f32 %v6014_v47, %v1955_v44  ;;  %v4136_v58 = vpop.f32.mrb[105].mxu1 }
 0x7cd   : > { %v2019_v2 = vmax.f32 %v1956_v21, 0.0 }
 0x7ce   : > { %v1960_v17 = vpop.f32.mrb[106].mxu1 }
 0x7cf   : > { %v1961_v50 = vadd.f32 %v6014_v47, %v1960_v17  ;;  %v4139_v34 = vpop.f32.mrb[107].mxu1  ;;  %4176 = vmatmul.mubr.msk.f32.vlgmr.msra.gmra.mrb[104].mxu0 %vm477_vm2, %v2019_v2 }
 0x7d0   : > { %4178 = vmatprep.mubr.msk.f32.mxu0 %vm4717_vm0, %v4718_v6 }
 0x7d1   : > { %v2020_v46 = vmax.f32 %v1961_v50, 0.0 }
 0x7d2   : > { %v1965_v1 = vpop.f32.mrb[108].mxu1 }
 0x7d3   : > { %v1966_v48 = vadd.f32 %v6014_v47, %v1965_v1  ;;  %v4142_v38 = vpop.f32.mrb[109].mxu1  ;;  %4179 = vmatmul.mubr.msk.f32.gmra.mrb[106].mxu0 %vm477_vm2, %v2020_v46 }
 0x7d4   : > { %4181 = vmatprep.mubr.msk.f32.mxu0 %vm4717_vm0, %v4718_v6 }
 0x7d5   : > { %v2021_v28 = vmax.f32 %v1966_v48, 0.0 }
 0x7d6   : > { %v1970_v35 = vpop.f32.mrb[110].mxu1 }
 0x7d7   : > { %v1971_v11 = vadd.f32 %v6014_v47, %v1970_v35  ;;  %v4145_v18 = vpop.f32.mrb[111].mxu1  ;;  %4182 = vmatmul.mubr.msk.f32.gmra.mrb[108].mxu0 %vm477_vm2, %v2021_v28 }
 0x7d8   : > { %4184 = vmatprep.mubr.msk.f32.mxu0 %vm4717_vm0, %v4718_v6 }
 0x7d9   : > { %v2022_v55 = vmax.f32 %v1971_v11, 0.0 }
 0x7da   : > { %v1975_v20 = vpop.f32.mrb[112].mxu1 }
 0x7db   : > { %v1976_v39 = vadd.f32 %v6014_v47, %v1975_v20  ;;  %v4148_v51 = vpop.f32.mrb[113].mxu1  ;;  %4185 = vmatmul.mubr.msk.f32.gmra.mrb[110].mxu0 %vm477_vm2, %v2022_v55 }
 0x7dc   : > { %4187 = vmatprep.mubr.msk.f32.mxu0 %vm4717_vm0, %v4718_v6 }
 0x7dd   : > { %v2023_v15 = vmax.f32 %v1976_v39, 0.0  ;;  %v3289_v39 = vld [vmem:[%s6648_s2 + $0x2f0] sm:$0xff] }
 0x7de   : > { %v1980_v53 = vpop.f32.mrb[114].mxu1 }
 0x7df   : > { %v1981_v32 = vadd.f32 %v6014_v47, %v1980_v53  ;;  %v4151_v54 = vpop.f32.mrb[115].mxu1  ;;  %4188 = vmatmul.mubr.msk.f32.gmra.mrb[112].mxu0 %vm477_vm2, %v2023_v15  ;;  %v3293_v15 = vld [vmem:[%s6649_s3 + $0x14] sm:$0xf] }
 0x7e0   : > { %4190 = vmatprep.mubr.msk.f32.mxu0 %vm4717_vm0, %v4718_v6  ;;  %4286 = vmatpush3.msk.msra.mxu0 %vm517_vm1, %v3293_v15 }
 0x7e1   : > { %v2024_v61 = vmax.f32 %v1981_v32, 0.0  ;;  %4397 = vmatprep.subr.mxu0 %v4718_v6  ;;  %v6083_v32 = vld [vmem:[%s6651_s5 + $0x4] ss:$0 sm:$0xff] }
 0x7e2   : > { %v1985_v29 = vpop.f32.mrb[116].mxu1 }
 0x7e3   : > { %v1986_v24 = vadd.f32 %v6014_v47, %v1985_v29  ;;  %v4154_v26 = vpop.f32.mrb[117].mxu1  ;;  %4191 = vmatmul.mubr.msk.f32.gmra.mrb[114].mxu0 %vm477_vm2, %v2024_v61 }
 0x7e4   : > { %4193 = vmatprep.mubr.msk.f32.mxu0 %vm4717_vm0, %v4718_v6 }
 0x7e5   : > { %v2025_v62 = vmax.f32 %v1986_v24, 0.0 }
 0x7e6   : > { %v1990_v22 = vpop.f32.mrb[118].mxu1 }
 0x7e7   : > { %v1991_v31 = vadd.f32 %v6014_v47, %v1990_v22  ;;  %v4157_v63 = vpop.f32.mrb[119].mxu1  ;;  %4194 = vmatmul.mubr.msk.f32.gmra.mrb[116].mxu0 %vm477_vm2, %v2025_v62 }
 0x7e8   : > { %4196 = vmatprep.mubr.msk.f32.mxu0 %vm4717_vm0, %v4718_v6 }
 0x7e9   : > { %v2026_v40 = vmax.f32 %v1991_v31, 0.0 }
 0x7ea   : > { %v1995_v37 = vpop.f32.mrb[120].mxu1 }
 0x7eb   : > { %v1996_v43 = vadd.f32 %v6014_v47, %v1995_v37  ;;  %v4160_v30 = vpop.f32.mrb[121].mxu1  ;;  %4197 = vmatmul.mubr.msk.f32.gmra.mrb[118].mxu0 %vm477_vm2, %v2026_v40 }
 0x7ec   : > { %4199 = vmatprep.mubr.msk.f32.mxu0 %vm4717_vm0, %v4718_v6 }
 0x7ed   : > { %v2027_v44 = vmax.f32 %v1996_v43, 0.0 }
 0x7ee   : > { %v2000_v21 = vpop.f32.mrb[122].mxu1 }
 0x7ef   : > { %v2001_v58 = vadd.f32 %v6014_v47, %v2000_v21  ;;  %v4163_v2 = vpop.f32.mrb[123].mxu1  ;;  %4200 = vmatmul.mubr.msk.f32.gmra.mrb[120].mxu0 %vm477_vm2, %v2027_v44 }
 0x7f0   : > { %4202 = vmatprep.mubr.msk.f32.mxu0 %vm4717_vm0, %v4718_v6 }
 0x7f1   : > { %v2028_v17 = vmax.f32 %v2001_v58, 0.0 }
 0x7f2   : > { %v2005_v50 = vpop.f32.mrb[124].mxu1 }
 0x7f3   : > { %v2006_v34 = vadd.f32 %v6014_v47, %v2005_v50  ;;  %v4166_v46 = vpop.f32.mrb[125].mxu1  ;;  %4203 = vmatmul.mubr.msk.f32.gmra.mrb[122].mxu0 %vm477_vm2, %v2028_v17 }
 0x7f4   : > { %4205 = vmatprep.mubr.msk.f32.mxu0 %vm4717_vm0, %v4718_v6 }
 0x7f5   : > { %v2029_v1 = vmax.f32 %v2006_v34, 0.0 }
 0x7f6   : > { %v2010_v48 = vpop.f32.mrb[126].mxu1 }
 0x7f7   : > { %v2011_v38 = vadd.f32 %v6014_v47, %v2010_v48  ;;  %v4169_v28 = vpop.f32.mrb[127].mxu1  ;;  %4206 = vmatmul.mubr.msk.f32.gmra.mrb[124].mxu0 %vm477_vm2, %v2029_v1 }
 0x7f8   : > { %4208 = vmatprep.mubr.msk.f32.mxu0 %vm4717_vm0, %v4718_v6 }
 0x7f9   : > { %v2030_v35 = vmax.f32 %v2011_v38, 0.0 }
 0x7fa   : > { %v2015_v11 = vpop.f32.mrb[128].mxu1 }
 0x7fb   : > { %v2016_v18 = vadd.f32 %v6014_v47, %v2015_v11  ;;  %v4172_v55 = vpop.f32.mrb[129].mxu1  ;;  %4209 = vmatmul.mubr.msk.f32.gmra.mrb[126].mxu0 %vm477_vm2, %v2030_v35  ;;  %v3290_v47 = vld [vmem:[%s6648_s2 + $0x2f8] sm:$0xff] }
 0x7fc   : > { %4211 = vmatprep.mubr.msk.f32.mxu0 %vm4717_vm0, %v4718_v6  ;;  %v4580_v51 = vpack.c.bf16 %v3290_v47, %v3289_v39 }
 0x7fd   : > { %v2031_v20 = vmax.f32 %v2016_v18, 0.0 }
 0x7fe   : > { %4581 = vmatpush3.bf16.msra.mxu1 %v4580_v51 }
 0x7ff   : > { %4212 = vmatmul.mubr.msk.f32.gmra.mrb[128].mxu0 %vm477_vm2, %v2031_v20  ;;  %4582 = vmatprep.subr.bf16.mxu1 %v4716_v3 }
 0x800   : > { %4287 = vmatprep.mubr.msk.f32.mxu0 %vm4717_vm0, %v4718_v6 }
 0x8a2   : > { %v2142_v53 = vpop.f32.mrb[104].mxu0 }
 0x8a3   : > { %v2206_v54 = vadd.f32 %v2142_v53, %v1851_v8  ;;  %v4177_v61 = vpop.f32.mrb[105].mxu0 }
 0x8a5   : > { %v6088_v29 = vadd.f32 %v6083_v32, %v2206_v54 }
 0x8a6   : > { %v2147_v24 = vpop.f32.mrb[106].mxu0 }
 0x8a7   : > { %v2240_v26 = vmax.f32 %v6088_v29, 0.0  ;;  %v2207_v62 = vadd.f32 %v2147_v24, %v1852_v9  ;;  %v4180_v22 = vpop.f32.mrb[107].mxu0 }
 0x8a9   : > { %v6094_v31 = vadd.f32 %v6083_v32, %v2207_v62  ;;  %4247 = vmatmul.mubr.f32.vlgmr.msra.gmra.mrb[130].mxu1 %v2240_v26 }
 0x8aa   : > { %v2152_v63 = vpop.f32.mrb[108].mxu0  ;;  %4249 = vmatprep.mubr.msk.f32.mxu1 %vm4717_vm0, %v4718_v6 }
 0x8ab   : > { %v2241_v52 = vmax.f32 %v6094_v31, 0.0  ;;  %v2208_v8 = vadd.f32 %v2152_v63, %v1853_v16  ;;  %v4183_v40 = vpop.f32.mrb[109].mxu0 }
 0x8ad   : > { %v6104_v12 = vadd.f32 %v6083_v32, %v2208_v8  ;;  %4250 = vmatmul.mubr.f32.gmra.mrb[132].mxu1 %v2241_v52  ;;  %v3313_v8 = vld [vmem:[%s6648_s2 + $0x318] sm:$0xff] }
 0x8ae   : > { %v2157_v9 = vpop.f32.mrb[110].mxu0  ;;  %4252 = vmatprep.mubr.msk.f32.mxu1 %vm4717_vm0, %v4718_v6 }
 0x8af   : > { %v2242_v37 = vmax.f32 %v6104_v12, 0.0  ;;  %v2209_v43 = vadd.f32 %v2157_v9, %v1854_v59  ;;  %v4186_v30 = vpop.f32.mrb[111].mxu0  ;;  %v3314_v9 = vld [vmem:[%s6648_s2 + $0x320] sm:$0xff] }
 0x8b1   : > { %v6114_v57 = vadd.f32 %v6083_v32, %v2209_v43  ;;  %4253 = vmatmul.mubr.f32.gmra.mrb[134].mxu1 %v2242_v37  ;;  %v3315_v43 = vld [vmem:[%s6648_s2 + $0x328] sm:$0xff] }
 0x8b2   : > { %v2162_v16 = vpop.f32.mrb[112].mxu0  ;;  %4255 = vmatprep.mubr.msk.f32.mxu1 %vm4717_vm0, %v4718_v6  ;;  %v4589_v30 = vpack.c.bf16 %v3315_v43, %v3314_v9 }
 0x8b3   : > { %v2243_v44 = vmax.f32 %v6114_v57, 0.0  ;;  %v2210_v21 = vadd.f32 %v2162_v16, %v1855_v45  ;;  %v4189_v58 = vpop.f32.mrb[113].mxu0  ;;  %v3316_v16 = vld [vmem:[%s6648_s2 + $0x330] sm:$0xff] }
 0x8b5   : > { %v6124_v36 = vadd.f32 %v6083_v32, %v2210_v21  ;;  %4256 = vmatmul.mubr.f32.gmra.mrb[136].mxu1 %v2243_v44  ;;  %v3317_v21 = vld [vmem:[%s6648_s2 + $0x338] sm:$0xff] }
 0x8b6   : > { %v2167_v59 = vpop.f32.mrb[114].mxu0  ;;  %4258 = vmatprep.mubr.msk.f32.mxu1 %vm4717_vm0, %v4718_v6  ;;  %v4592_v58 = vpack.c.bf16 %v3317_v21, %v3316_v16 }
 0x8b7   : > { %v2244_v2 = vmax.f32 %v6124_v36, 0.0  ;;  %v2211_v17 = vadd.f32 %v2167_v59, %v1856_v27  ;;  %v4192_v50 = vpop.f32.mrb[115].mxu0  ;;  %v3318_v59 = vld [vmem:[%s6648_s2 + $0x340] sm:$0xff] }
 0x8b9   : > { %v6134_v33 = vadd.f32 %v6083_v32, %v2211_v17  ;;  %4259 = vmatmul.mubr.f32.gmra.mrb[138].mxu1 %v2244_v2  ;;  %v3319_v17 = vld [vmem:[%s6648_s2 + $0x348] sm:$0xff] }
 0x8ba   : > { %v2172_v45 = vpop.f32.mrb[116].mxu0  ;;  %4261 = vmatprep.mubr.msk.f32.mxu1 %vm4717_vm0, %v4718_v6  ;;  %v4595_v50 = vpack.c.bf16 %v3319_v17, %v3318_v59 }
 0x8bb   : > { %v2245_v34 = vmax.f32 %v6134_v33, 0.0  ;;  %v2212_v46 = vadd.f32 %v2172_v45, %v1857_v4  ;;  %v4195_v1 = vpop.f32.mrb[117].mxu0  ;;  %v3320_v45 = vld [vmem:[%s6648_s2 + $0x350] sm:$0xff] }
 0x8bd   : > { %v6144_v41 = vadd.f32 %v6083_v32, %v2212_v46  ;;  %4262 = vmatmul.mubr.f32.gmra.mrb[140].mxu1 %v2245_v34  ;;  %v3321_v46 = vld [vmem:[%s6648_s2 + $0x358] sm:$0xff] }
 0x8be   : > { %v2177_v27 = vpop.f32.mrb[118].mxu0  ;;  %4264 = vmatprep.mubr.msk.f32.mxu1 %vm4717_vm0, %v4718_v6  ;;  %v4598_v1 = vpack.c.bf16 %v3321_v46, %v3320_v45 }
 0x8bf   : > { %v2246_v48 = vmax.f32 %v6144_v41, 0.0  ;;  %v2213_v38 = vadd.f32 %v2177_v27, %v1858_v13  ;;  %v4198_v28 = vpop.f32.mrb[119].mxu0  ;;  %v3322_v27 = vld [vmem:[%s6648_s2 + $0x360] sm:$0xff] }
 0x8c1   : > { %v6154_v49 = vadd.f32 %v6083_v32, %v2213_v38  ;;  %4265 = vmatmul.mubr.f32.gmra.mrb[142].mxu1 %v2246_v48  ;;  %v3323_v38 = vld [vmem:[%s6648_s2 + $0x368] sm:$0xff] }
 0x8c2   : > { %v2182_v4 = vpop.f32.mrb[120].mxu0  ;;  %4267 = vmatprep.mubr.msk.f32.mxu1 %vm4717_vm0, %v4718_v6  ;;  %v4601_v28 = vpack.c.bf16 %v3323_v38, %v3322_v27 }
 0x8c3   : > { %v2247_v35 = vmax.f32 %v6154_v49, 0.0  ;;  %v2214_v11 = vadd.f32 %v2182_v4, %v1859_v23  ;;  %v4201_v18 = vpop.f32.mrb[121].mxu0  ;;  %v6267_v4 = vld [vmem:[%s6650_s4 + $0x5] ss:$0 sm:$0xff] }
 0x8c5   : > { %v6164_v56 = vadd.f32 %v6083_v32, %v2214_v11  ;;  %4268 = vmatmul.mubr.f32.gmra.mrb[144].mxu1 %v2247_v35 }
 0x8c6   : > { %v2187_v13 = vpop.f32.mrb[122].mxu0  ;;  %4270 = vmatprep.mubr.msk.f32.mxu1 %vm4717_vm0, %v4718_v6 }
 0x8c7   : > { %v2248_v55 = vmax.f32 %v6164_v56, 0.0  ;;  %v2215_v20 = vadd.f32 %v2187_v13, %v1860_v19  ;;  %v4204_v39 = vpop.f32.mrb[123].mxu0 }
 0x8c9   : > { %v6174_v60 = vadd.f32 %v6083_v32, %v2215_v20  ;;  %4271 = vmatmul.mubr.f32.gmra.mrb[146].mxu1 %v2248_v55 }
 0x8ca   : > { %v2192_v23 = vpop.f32.mrb[124].mxu0  ;;  %4273 = vmatprep.mubr.msk.f32.mxu1 %vm4717_vm0, %v4718_v6 }
 0x8cb   : > { %v2249_v47 = vmax.f32 %v6174_v60, 0.0  ;;  %v2216_v51 = vadd.f32 %v2192_v23, %v1861_v25  ;;  %v4207_v15 = vpop.f32.mrb[125].mxu0 }
 0x8cd   : > { %v6184_v0 = vadd.f32 %v6083_v32, %v2216_v51  ;;  %4274 = vmatmul.mubr.f32.gmra.mrb[148].mxu1 %v2249_v47 }
 0x8ce   : > { %v2197_v19 = vpop.f32.mrb[126].mxu0  ;;  %4276 = vmatprep.mubr.msk.f32.mxu1 %vm4717_vm0, %v4718_v6 }
 0x8cf   : > { %v2250_v53 = vmax.f32 %v6184_v0, 0.0  ;;  %v2217_v54 = vadd.f32 %v2197_v19, %v1862_v7  ;;  %v4210_v61 = vpop.f32.mrb[127].mxu0 }
 0x8d1   : > { %v6194_v5 = vadd.f32 %v6083_v32, %v2217_v54  ;;  %4277 = vmatmul.mubr.f32.gmra.mrb[150].mxu1 %v2250_v53 }
 0x8d2   : > { %v2202_v25 = vpop.f32.mrb[128].mxu0  ;;  %4279 = vmatprep.mubr.msk.f32.mxu1 %vm4717_vm0, %v4718_v6 }
 0x8d3   : > { %v2251_v24 = vmax.f32 %v6194_v5, 0.0  ;;  %v2218_v62 = vadd.f32 %v2202_v25, %v1863_v42  ;;  %v4213_v22 = vpop.f32.mrb[129].mxu0  ;;  %v3311_v42 = vld [vmem:[%s6648_s2 + $0x308] sm:$0xff] }
 0x8d4   : > { %v4583_v63 = vpack.c.bf16 %v3311_v42, %v3310_v14 }
 0x8d5   : > { %v6204_v10 = vadd.f32 %v6083_v32, %v2218_v62  ;;  %4280 = vmatmul.mubr.f32.gmra.mrb[152].mxu1 %v2251_v24  ;;  %v3312_v32 = vld [vmem:[%s6648_s2 + $0x310] sm:$0xff] }
 0x8d6   : > { %4282 = vmatprep.mubr.msk.f32.mxu1 %vm4717_vm0, %v4718_v6  ;;  %4584 = vmatpush3.bf16.msra.mxu1 %v4583_v63  ;;  %v4586_v40 = vpack.c.bf16 %v3313_v8, %v3312_v32 }
 0x8d7   : > { %v2252_v7 = vmax.f32 %v6204_v10, 0.0  ;;  %4585 = vmatprep.subr.bf16.mxu1 %v4716_v3  ;;  %v6471_v10 = vld [vmem:[%s6650_s4 + $0x6] ss:$0 sm:$0xff] }
 0x8d9   : > { %4283 = vmatmul.mubr.f32.gmra.mrb[154].mxu1 %v2252_v7 }
 0x8da   : > { %4358 = vmatprep.mubr.msk.f32.mxu1 %vm4717_vm0, %v4718_v6  ;;  %4587 = vmatpush3.bf16.msra.mxu1 %v4586_v40 }
 0x8db   : > { %4588 = vmatprep.subr.bf16.mxu1 %v4716_v3 }
 0x8de   : > { %4590 = vmatpush3.bf16.msra.mxu1 %v4589_v30 }
 0x8df   : > { %4591 = vmatprep.subr.bf16.mxu1 %v4716_v3 }
 0x8e2   : > { %4593 = vmatpush3.bf16.msra.mxu1 %v4592_v58 }
 0x8e3   : > { %4594 = vmatprep.subr.bf16.mxu1 %v4716_v3 }
 0x8e6   : > { %4596 = vmatpush3.bf16.msra.mxu1 %v4595_v50 }
 0x8e7   : > { %4597 = vmatprep.subr.bf16.mxu1 %v4716_v3 }
 0x8ea   : > { %4599 = vmatpush3.bf16.msra.mxu1 %v4598_v1 }
 0x8eb   : > { %4600 = vmatprep.subr.bf16.mxu1 %v4716_v3 }
 0x8ee   : > { %4602 = vmatpush3.bf16.msra.mxu1 %v4601_v28 }
 0x8ef   : > { %4603 = vmatprep.subr.bf16.mxu1 %v4716_v3 }
 0x97c   : > { %v2344_v11 = vpop.f32.mrb[130].mxu1 }
 0x97d   : > { %v2345_v18 = vadd.f32 %v6267_v4, %v2344_v11  ;;  %v4248_v13 = vpop.f32.mrb[131].mxu1 }
 0x97f   : > { %v2408_v20 = vmax.f32 %v2345_v18, 0.0 }
 0x980   : > { %v2349_v39 = vpop.f32.mrb[132].mxu1 }
 0x981   : > { %v2350_v23 = vadd.f32 %v6267_v4, %v2349_v39  ;;  %v4251_v51 = vpop.f32.mrb[133].mxu1  ;;  %4288 = vmatmul.mubr.msk.f32.vlgmr.msra.gmra.mrb[130].mxu0 %vm477_vm2, %v2408_v20 }
 0x982   : > { %4290 = vmatprep.mubr.msk.f32.mxu0 %vm4717_vm0, %v4718_v6 }
 0x983   : > { %v2409_v3 = vmax.f32 %v2350_v23, 0.0 }
 0x984   : > { %v2354_v15 = vpop.f32.mrb[134].mxu1 }
 0x985   : > { %v2355_v19 = vadd.f32 %v6267_v4, %v2354_v15  ;;  %v4254_v54 = vpop.f32.mrb[135].mxu1  ;;  %4291 = vmatmul.mubr.msk.f32.gmra.mrb[132].mxu0 %vm477_vm2, %v2409_v3 }
 0x986   : > { %4293 = vmatprep.mubr.msk.f32.mxu0 %vm4717_vm0, %v4718_v6 }
 0x987   : > { %v2410_v61 = vmax.f32 %v2355_v19, 0.0 }
 0x988   : > { %v2359_v25 = vpop.f32.mrb[136].mxu1 }
 0x989   : > { %v2360_v62 = vadd.f32 %v6267_v4, %v2359_v25  ;;  %v4257_v22 = vpop.f32.mrb[137].mxu1  ;;  %4294 = vmatmul.mubr.msk.f32.gmra.mrb[134].mxu0 %vm477_vm2, %v2410_v61 }
 0x98a   : > { %4296 = vmatprep.mubr.msk.f32.mxu0 %vm4717_vm0, %v4718_v6 }
 0x98b   : > { %v2411_v14 = vmax.f32 %v2360_v62, 0.0 }
 0x98c   : > { %v2364_v42 = vpop.f32.mrb[138].mxu1 }
 0x98d   : > { %v2365_v32 = vadd.f32 %v6267_v4, %v2364_v42  ;;  %v4260_v63 = vpop.f32.mrb[139].mxu1  ;;  %4297 = vmatmul.mubr.msk.f32.gmra.mrb[136].mxu0 %vm477_vm2, %v2411_v14  ;;  %v3324_v42 = vld [vmem:[%s6648_s2 + $0x370] sm:$0xff] }
 0x98e   : > { %4299 = vmatprep.mubr.msk.f32.mxu0 %vm4717_vm0, %v4718_v6  ;;  %v3328_v63 = vld [vmem:[%s6649_s3 + $0x18] sm:$0xf] }
 0x98f   : > { %v2412_v8 = vmax.f32 %v2365_v32, 0.0  ;;  %4398 = vmatpush3.msk.msra.mxu0 %vm517_vm1, %v3328_v63 }
 0x990   : > { %v2369_v40 = vpop.f32.mrb[140].mxu1 }
 0x991   : > { %v2370_v9 = vadd.f32 %v6267_v4, %v2369_v40  ;;  %v4263_v43 = vpop.f32.mrb[141].mxu1  ;;  %4300 = vmatmul.mubr.msk.f32.gmra.mrb[138].mxu0 %vm477_vm2, %v2412_v8  ;;  %v6335_v40 = vld [vmem:[%s6651_s5 + $0x5] ss:$0 sm:$0xff] }
 0x992   : > { %4302 = vmatprep.mubr.msk.f32.mxu0 %vm4717_vm0, %v4718_v6 }
 0x993   : > { %v2413_v30 = vmax.f32 %v2370_v9, 0.0 }
 0x994   : > { %v2374_v16 = vpop.f32.mrb[142].mxu1 }
 0x995   : > { %v2375_v21 = vadd.f32 %v6267_v4, %v2374_v16  ;;  %v4266_v58 = vpop.f32.mrb[143].mxu1  ;;  %4303 = vmatmul.mubr.msk.f32.gmra.mrb[140].mxu0 %vm477_vm2, %v2413_v30 }
 0x996   : > { %4305 = vmatprep.mubr.msk.f32.mxu0 %vm4717_vm0, %v4718_v6 }
 0x997   : > { %v2414_v59 = vmax.f32 %v2375_v21, 0.0 }
 0x998   : > { %v2379_v17 = vpop.f32.mrb[144].mxu1 }
 0x999   : > { %v2380_v50 = vadd.f32 %v6267_v4, %v2379_v17  ;;  %v4269_v45 = vpop.f32.mrb[145].mxu1  ;;  %4306 = vmatmul.mubr.msk.f32.gmra.mrb[142].mxu0 %vm477_vm2, %v2414_v59 }
 0x99a   : > { %4308 = vmatprep.mubr.msk.f32.mxu0 %vm4717_vm0, %v4718_v6 }
 0x99b   : > { %v2415_v46 = vmax.f32 %v2380_v50, 0.0 }
 0x99c   : > { %v2384_v1 = vpop.f32.mrb[146].mxu1 }
 0x99d   : > { %v2385_v27 = vadd.f32 %v6267_v4, %v2384_v1  ;;  %v4272_v38 = vpop.f32.mrb[147].mxu1  ;;  %4309 = vmatmul.mubr.msk.f32.gmra.mrb[144].mxu0 %vm477_vm2, %v2415_v46 }
 0x99e   : > { %4311 = vmatprep.mubr.msk.f32.mxu0 %vm4717_vm0, %v4718_v6 }
 0x99f   : > { %v2416_v28 = vmax.f32 %v2385_v27, 0.0 }
 0x9a0   : > { %v2389_v11 = vpop.f32.mrb[148].mxu1 }
 0x9a1   : > { %v2390_v18 = vadd.f32 %v6267_v4, %v2389_v11  ;;  %v4275_v13 = vpop.f32.mrb[149].mxu1  ;;  %4312 = vmatmul.mubr.msk.f32.gmra.mrb[146].mxu0 %vm477_vm2, %v2416_v28 }
 0x9a2   : > { %4314 = vmatprep.mubr.msk.f32.mxu0 %vm4717_vm0, %v4718_v6 }
 0x9a3   : > { %v2417_v20 = vmax.f32 %v2390_v18, 0.0 }
 0x9a4   : > { %v2394_v39 = vpop.f32.mrb[150].mxu1 }
 0x9a5   : > { %v2395_v23 = vadd.f32 %v6267_v4, %v2394_v39  ;;  %v4278_v51 = vpop.f32.mrb[151].mxu1  ;;  %4315 = vmatmul.mubr.msk.f32.gmra.mrb[148].mxu0 %vm477_vm2, %v2417_v20 }
 0x9a6   : > { %4317 = vmatprep.mubr.msk.f32.mxu0 %vm4717_vm0, %v4718_v6 }
 0x9a7   : > { %v2418_v3 = vmax.f32 %v2395_v23, 0.0 }
 0x9a8   : > { %v2399_v15 = vpop.f32.mrb[152].mxu1 }
 0x9a9   : > { %v2400_v19 = vadd.f32 %v6267_v4, %v2399_v15  ;;  %v4281_v54 = vpop.f32.mrb[153].mxu1  ;;  %4318 = vmatmul.mubr.msk.f32.gmra.mrb[150].mxu0 %vm477_vm2, %v2418_v3 }
 0x9aa   : > { %4320 = vmatprep.mubr.msk.f32.mxu0 %vm4717_vm0, %v4718_v6 }
 0x9ab   : > { %v2419_v61 = vmax.f32 %v2400_v19, 0.0 }
 0x9ac   : > { %v2404_v25 = vpop.f32.mrb[154].mxu1 }
 0x9ad   : > { %v2405_v62 = vadd.f32 %v6267_v4, %v2404_v25  ;;  %v4284_v22 = vpop.f32.mrb[155].mxu1  ;;  %4321 = vmatmul.mubr.msk.f32.gmra.mrb[152].mxu0 %vm477_vm2, %v2419_v61  ;;  %v3325_v4 = vld [vmem:[%s6648_s2 + $0x378] sm:$0xff] }
 0x9ae   : > { %4323 = vmatprep.mubr.msk.f32.mxu0 %vm4717_vm0, %v4718_v6  ;;  %v4604_v32 = vpack.c.bf16 %v3325_v4, %v3324_v42 }
 0x9af   : > { %v2420_v14 = vmax.f32 %v2405_v62, 0.0 }
 0x9b0   : > { %4605 = vmatpush3.bf16.msra.mxu1 %v4604_v32 }
 0x9b1   : > { %4324 = vmatmul.mubr.msk.f32.gmra.mrb[154].mxu0 %vm477_vm2, %v2420_v14  ;;  %4606 = vmatprep.subr.mxu1 %v4718_v6 }
 0x9b2   : > { %4399 = vmatprep.mubr.msk.f32.mxu0 %vm4717_vm0, %v4718_v6 }
 0xa54   : > { %v2531_v8 = vpop.f32.mrb[130].mxu0 }
 0xa55   : > { %v2595_v9 = vadd.f32 %v2531_v8, %v2240_v26  ;;  %v4289_v43 = vpop.f32.mrb[131].mxu0 }
 0xa57   : > { %v6340_v30 = vadd.f32 %v6335_v40, %v2595_v9 }
 0xa58   : > { %v2536_v16 = vpop.f32.mrb[132].mxu0 }
 0xa59   : > { %v2629_v21 = vmax.f32 %v6340_v30, 0.0  ;;  %v2596_v58 = vadd.f32 %v2536_v16, %v2241_v52  ;;  %v4292_v59 = vpop.f32.mrb[133].mxu0 }
 0xa5b   : > { %v6346_v17 = vadd.f32 %v6335_v40, %v2596_v58  ;;  %4359 = vmatmul.mubr.f32.vlgmr.msra.gmra.mrb[156].mxu1 %v2629_v21 }
 0xa5c   : > { %v2541_v50 = vpop.f32.mrb[134].mxu0  ;;  %4361 = vmatprep.mubr.msk.f32.mxu1 %vm4717_vm0, %v4718_v6  ;;  %4607 = vmatpush3.msk.msra.mxu1 %vm517_vm1, %v3328_v63 }
 0xa5d   : > { %v2630_v29 = vmax.f32 %v6346_v17, 0.0  ;;  %v2597_v26 = vadd.f32 %v2541_v50, %v2242_v37  ;;  %v4295_v31 = vpop.f32.mrb[135].mxu0 }
 0xa5f   : > { %v6357_v52 = vadd.f32 %v6335_v40, %v2597_v26  ;;  %4362 = vmatmul.mubr.f32.gmra.mrb[158].mxu1 %v2630_v29 }
 0xa60   : > { %v2546_v45 = vpop.f32.mrb[136].mxu0  ;;  %4364 = vmatprep.mubr.msk.f32.mxu1 %vm4717_vm0, %v4718_v6 }
 0xa61   : > { %v2631_v46 = vmax.f32 %v6357_v52, 0.0  ;;  %v2598_v1 = vadd.f32 %v2546_v45, %v2243_v44  ;;  %v4298_v27 = vpop.f32.mrb[137].mxu0 }
 0xa63   : > { %v6367_v12 = vadd.f32 %v6335_v40, %v2598_v1  ;;  %4365 = vmatmul.mubr.f32.gmra.mrb[160].mxu1 %v2631_v46 }
 0xa64   : > { %v2551_v37 = vpop.f32.mrb[138].mxu0  ;;  %4367 = vmatprep.mubr.msk.f32.mxu1 %vm4717_vm0, %v4718_v6 }
 0xa65   : > { %v2632_v38 = vmax.f32 %v6367_v12, 0.0  ;;  %v2599_v28 = vadd.f32 %v2551_v37, %v2244_v2  ;;  %v4301_v11 = vpop.f32.mrb[139].mxu0 }
 0xa67   : > { %v6377_v57 = vadd.f32 %v6335_v40, %v2599_v28  ;;  %4368 = vmatmul.mubr.f32.gmra.mrb[162].mxu1 %v2632_v38 }
 0xa68   : > { %v2556_v44 = vpop.f32.mrb[140].mxu0  ;;  %4370 = vmatprep.mubr.msk.f32.mxu1 %vm4717_vm0, %v4718_v6 }
 0xa69   : > { %v2633_v18 = vmax.f32 %v6377_v57, 0.0  ;;  %v2600_v13 = vadd.f32 %v2556_v44, %v2245_v34  ;;  %v4304_v20 = vpop.f32.mrb[141].mxu0 }
 0xa6b   : > { %v6387_v36 = vadd.f32 %v6335_v40, %v2600_v13  ;;  %4371 = vmatmul.mubr.f32.gmra.mrb[164].mxu1 %v2633_v18 }
 0xa6c   : > { %v2561_v2 = vpop.f32.mrb[142].mxu0  ;;  %4373 = vmatprep.mubr.msk.f32.mxu1 %vm4717_vm0, %v4718_v6 }
 0xa6d   : > { %v2634_v39 = vmax.f32 %v6387_v36, 0.0  ;;  %v2601_v23 = vadd.f32 %v2561_v2, %v2246_v48  ;;  %v4307_v51 = vpop.f32.mrb[143].mxu0 }
 0xa6f   : > { %v6397_v33 = vadd.f32 %v6335_v40, %v2601_v23  ;;  %4374 = vmatmul.mubr.f32.gmra.mrb[166].mxu1 %v2634_v39 }
 0xa70   : > { %v2566_v34 = vpop.f32.mrb[144].mxu0  ;;  %4376 = vmatprep.mubr.msk.f32.mxu1 %vm4717_vm0, %v4718_v6 }
 0xa71   : > { %v2635_v3 = vmax.f32 %v6397_v33, 0.0  ;;  %v2602_v15 = vadd.f32 %v2566_v34, %v2247_v35  ;;  %v4310_v19 = vpop.f32.mrb[145].mxu0 }
 0xa73   : > { %v6407_v41 = vadd.f32 %v6335_v40, %v2602_v15  ;;  %4377 = vmatmul.mubr.f32.gmra.mrb[168].mxu1 %v2635_v3 }
 0xa74   : > { %v2571_v48 = vpop.f32.mrb[146].mxu0  ;;  %4379 = vmatprep.mubr.msk.f32.mxu1 %vm4717_vm0, %v4718_v6 }
 0xa75   : > { %v2636_v54 = vmax.f32 %v6407_v41, 0.0  ;;  %v2603_v61 = vadd.f32 %v2571_v48, %v2248_v55  ;;  %v4313_v25 = vpop.f32.mrb[147].mxu0 }
 0xa77   : > { %v6417_v49 = vadd.f32 %v6335_v40, %v2603_v61  ;;  %4380 = vmatmul.mubr.f32.gmra.mrb[170].mxu1 %v2636_v54 }
 0xa78   : > { %v2576_v35 = vpop.f32.mrb[148].mxu0  ;;  %4382 = vmatprep.mubr.msk.f32.mxu1 %vm4717_vm0, %v4718_v6 }
 0xa79   : > { %v2637_v62 = vmax.f32 %v6417_v49, 0.0  ;;  %v2604_v22 = vadd.f32 %v2576_v35, %v2249_v47  ;;  %v4316_v14 = vpop.f32.mrb[149].mxu0 }
 0xa7b   : > { %v6427_v56 = vadd.f32 %v6335_v40, %v2604_v22  ;;  %4383 = vmatmul.mubr.f32.gmra.mrb[172].mxu1 %v2637_v62 }
 0xa7c   : > { %v2581_v55 = vpop.f32.mrb[150].mxu0  ;;  %4385 = vmatprep.mubr.msk.f32.mxu1 %vm4717_vm0, %v4718_v6 }
 0xa7d   : > { %v2638_v42 = vmax.f32 %v6427_v56, 0.0  ;;  %v2605_v4 = vadd.f32 %v2581_v55, %v2250_v53  ;;  %v4319_v32 = vpop.f32.mrb[151].mxu0 }
 0xa7f   : > { %v6437_v60 = vadd.f32 %v6335_v40, %v2605_v4  ;;  %4386 = vmatmul.mubr.f32.gmra.mrb[174].mxu1 %v2638_v42 }
 0xa80   : > { %v2586_v47 = vpop.f32.mrb[152].mxu0  ;;  %4388 = vmatprep.mubr.msk.f32.mxu1 %vm4717_vm0, %v4718_v6 }
 0xa81   : > { %v2639_v63 = vmax.f32 %v6437_v60, 0.0  ;;  %v2606_v8 = vadd.f32 %v2586_v47, %v2251_v24  ;;  %v4322_v9 = vpop.f32.mrb[153].mxu0 }
 0xa83   : > { %v6447_v0 = vadd.f32 %v6335_v40, %v2606_v8  ;;  %4389 = vmatmul.mubr.f32.gmra.mrb[176].mxu1 %v2639_v63 }
 0xa84   : > { %v2591_v53 = vpop.f32.mrb[154].mxu0  ;;  %4391 = vmatprep.mubr.msk.f32.mxu1 %vm4717_vm0, %v4718_v6 }
 0xa85   : > { %v2640_v43 = vmax.f32 %v6447_v0, 0.0  ;;  %v2607_v16 = vadd.f32 %v2591_v53, %v2252_v7  ;;  %v4325_v58 = vpop.f32.mrb[155].mxu0 }
 0xa87   : > { %v6457_v5 = vadd.f32 %v6335_v40, %v2607_v16  ;;  %4392 = vmatmul.mubr.f32.gmra.mrb[178].mxu1 %v2640_v43 }
 0xa88   : > { %4394 = vmatprep.mubr.msk.f32.mxu1 %vm4717_vm0, %v4718_v6 }
 0xa89   : > { %v2641_v24 = vmax.f32 %v6457_v5, 0.0 }
 0xa8b   : > { %4395 = vmatmul.mubr.f32.gmra.mrb[180].mxu1 %v2641_v24 }
 0xa8c   : > { %4429 = vmatprep.mubr.msk.f32.mxu1 %vm4717_vm0, %v4718_v6 }
 0xb2e   : > { %v2733_v7 = vpop.f32.mrb[156].mxu1 }
 0xb2f   : > { %v2734_v40 = vadd.f32 %v6471_v10, %v2733_v7  ;;  %v4360_v59 = vpop.f32.mrb[157].mxu1 }
 0xb31   : > { %v2797_v50 = vmax.f32 %v2734_v40, 0.0 }
 0xb32   : > { %v2738_v26 = vpop.f32.mrb[158].mxu1 }
 0xb33   : > { %v2739_v31 = vadd.f32 %v6471_v10, %v2738_v26  ;;  %v4363_v45 = vpop.f32.mrb[159].mxu1  ;;  %4400 = vmatmul.mubr.msk.f32.vlgmr.msra.gmra.mrb[156].mxu0 %vm477_vm2, %v2797_v50 }
 0xb34   : > { %4402 = vmatprep.mubr.msk.f32.mxu0 %vm4717_vm0, %v4718_v6 }
 0xb35   : > { %v2798_v1 = vmax.f32 %v2739_v31, 0.0 }
 0xb36   : > { %v2743_v27 = vpop.f32.mrb[160].mxu1 }
 0xb37   : > { %v2744_v37 = vadd.f32 %v6471_v10, %v2743_v27  ;;  %v4366_v28 = vpop.f32.mrb[161].mxu1  ;;  %4403 = vmatmul.mubr.msk.f32.gmra.mrb[158].mxu0 %vm477_vm2, %v2798_v1 }
 0xb38   : > { %4405 = vmatprep.mubr.msk.f32.mxu0 %vm4717_vm0, %v4718_v6 }
 0xb39   : > { %v2799_v11 = vmax.f32 %v2744_v37, 0.0 }
 0xb3a   : > { %v2748_v44 = vpop.f32.mrb[162].mxu1 }
 0xb3b   : > { %v2749_v13 = vadd.f32 %v6471_v10, %v2748_v44  ;;  %v4369_v20 = vpop.f32.mrb[163].mxu1  ;;  %4406 = vmatmul.mubr.msk.f32.gmra.mrb[160].mxu0 %vm477_vm2, %v2799_v11 }
 0xb3c   : > { %4408 = vmatprep.mubr.msk.f32.mxu0 %vm4717_vm0, %v4718_v6 }
 0xb3d   : > { %v2800_v2 = vmax.f32 %v2749_v13, 0.0 }
 0xb3e   : > { %v2753_v23 = vpop.f32.mrb[164].mxu1 }
 0xb3f   : > { %v2754_v51 = vadd.f32 %v6471_v10, %v2753_v23  ;;  %v4372_v34 = vpop.f32.mrb[165].mxu1  ;;  %4409 = vmatmul.mubr.msk.f32.gmra.mrb[162].mxu0 %vm477_vm2, %v2800_v2 }
 0xb40   : > { %4411 = vmatprep.mubr.msk.f32.mxu0 %vm4717_vm0, %v4718_v6 }
 0xb41   : > { %v2801_v15 = vmax.f32 %v2754_v51, 0.0  ;;  %v6527_v51 = vld [vmem:[%s6651_s5 + $0x6] ss:$0 sm:$0xff] }
 0xb42   : > { %v2758_v19 = vpop.f32.mrb[166].mxu1 }
 0xb43   : > { %v2759_v48 = vadd.f32 %v6471_v10, %v2758_v19  ;;  %v4375_v61 = vpop.f32.mrb[167].mxu1  ;;  %4412 = vmatmul.mubr.msk.f32.gmra.mrb[164].mxu0 %vm477_vm2, %v2801_v15 }
 0xb44   : > { %4414 = vmatprep.mubr.msk.f32.mxu0 %vm4717_vm0, %v4718_v6 }
 0xb45   : > { %v2802_v25 = vmax.f32 %v2759_v48, 0.0 }
 0xb46   : > { %v2763_v35 = vpop.f32.mrb[168].mxu1 }
 0xb47   : > { %v2764_v22 = vadd.f32 %v6471_v10, %v2763_v35  ;;  %v4378_v14 = vpop.f32.mrb[169].mxu1  ;;  %4415 = vmatmul.mubr.msk.f32.gmra.mrb[166].mxu0 %vm477_vm2, %v2802_v25 }
 0xb48   : > { %4417 = vmatprep.mubr.msk.f32.mxu0 %vm4717_vm0, %v4718_v6 }
 0xb49   : > { %v2803_v55 = vmax.f32 %v2764_v22, 0.0 }
 0xb4a   : > { %v2768_v4 = vpop.f32.mrb[170].mxu1 }
 0xb4b   : > { %v2769_v32 = vadd.f32 %v6471_v10, %v2768_v4  ;;  %v4381_v47 = vpop.f32.mrb[171].mxu1  ;;  %4418 = vmatmul.mubr.msk.f32.gmra.mrb[168].mxu0 %vm477_vm2, %v2803_v55 }
 0xb4c   : > { %4420 = vmatprep.mubr.msk.f32.mxu0 %vm4717_vm0, %v4718_v6 }
 0xb4d   : > { %v2804_v8 = vmax.f32 %v2769_v32, 0.0 }
 0xb4e   : > { %v2773_v9 = vpop.f32.mrb[172].mxu1 }
 0xb4f   : > { %v2774_v53 = vadd.f32 %v6471_v10, %v2773_v9  ;;  %v4384_v16 = vpop.f32.mrb[173].mxu1  ;;  %4421 = vmatmul.mubr.msk.f32.gmra.mrb[170].mxu0 %vm477_vm2, %v2804_v8 }
 0xb50   : > { %4423 = vmatprep.mubr.msk.f32.mxu0 %vm4717_vm0, %v4718_v6 }
 0xb51   : > { %v2805_v58 = vmax.f32 %v2774_v53, 0.0 }
 0xb52   : > { %v2778_v7 = vpop.f32.mrb[174].mxu1 }
 0xb53   : > { %v2779_v40 = vadd.f32 %v6471_v10, %v2778_v7  ;;  %v4387_v59 = vpop.f32.mrb[175].mxu1  ;;  %4424 = vmatmul.mubr.msk.f32.gmra.mrb[172].mxu0 %vm477_vm2, %v2805_v58 }
 0xb54   : > { %4426 = vmatprep.mubr.msk.f32.mxu0 %vm4717_vm0, %v4718_v6 }
 0xb55   : > { %v2806_v50 = vmax.f32 %v2779_v40, 0.0 }
 0xb56   : > { %v2783_v26 = vpop.f32.mrb[176].mxu1 }
 0xb57   : > { %v2784_v31 = vadd.f32 %v6471_v10, %v2783_v26  ;;  %v4390_v45 = vpop.f32.mrb[177].mxu1  ;;  %4427 = vmatmul.mubr.msk.f32.gmra.mrb[174].mxu0 %vm477_vm2, %v2806_v50 }
 0xb59   : > { %v2807_v1 = vmax.f32 %v2784_v31, 0.0 }
 0xb5a   : > { %v2788_v27 = vpop.f32.mrb[178].mxu1 }
 0xb5b   : > { %v2789_v37 = vadd.f32 %v6471_v10, %v2788_v27  ;;  %v4393_v28 = vpop.f32.mrb[179].mxu1  ;;  %4430 = vmatmul.mubr.msk.f32.vlgmr.msra.gmra.mrb[182].mxu1 %vm477_vm2, %v2807_v1 }
 0xb5c   : > { %4432 = vmatprep.mubr.msk.f32.mxu1 %vm4717_vm0, %v4718_v6 }
 0xb5d   : > { %v2808_v11 = vmax.f32 %v2789_v37, 0.0 }
 0xb5e   : > { %v2793_v44 = vpop.f32.mrb[180].mxu1 }
 0xb5f   : > { %v2794_v13 = vadd.f32 %v6471_v10, %v2793_v44  ;;  %v4396_v20 = vpop.f32.mrb[181].mxu1  ;;  %4433 = vmatmul.mubr.msk.f32.gmra.mrb[184].mxu1 %vm477_vm2, %v2808_v11 }
 0xb60   : > { %4435 = vmatprep.mubr.msk.f32.mxu1 %vm4717_vm0, %v4718_v6 }
 0xb61   : > { %v2809_v2 = vmax.f32 %v2794_v13, 0.0 }
 0xb63   : > { %4436 = vmatmul.mubr.msk.f32.gmra.mrb[186].mxu1 %vm477_vm2, %v2809_v2 }
 0xc06   : > { %v2920_v23 = vpop.f32.mrb[156].mxu0 }
 0xc07   : > { %v2984_v10 = vadd.f32 %v2920_v23, %v2629_v21  ;;  %v4401_v34 = vpop.f32.mrb[157].mxu0 }
 0xc09   : > { %v3005_v15 = vadd.f32 %v6527_v51, %v2984_v10 }
 0xc0a   : > { %v2925_v19 = vpop.f32.mrb[158].mxu0 }
 0xc0b   : > { %3018 = vst [vmem:[%s6532_s18] sm:$0xff] %v3005_v15  ;;  %v2985_v6 = vadd.f32 %v2925_v19, %v2630_v29  ;;  %v4404_v48 = vpop.f32.mrb[159].mxu0 }
 0xc0d   : > { %v3006_v61 = vadd.f32 %v6527_v51, %v2985_v6 }
 0xc0e   : > { %v2930_v25 = vpop.f32.mrb[160].mxu0 }
 0xc0f   : > { %3019 = vst [vmem:[%s6532_s18 + $0x8] sm:$0xff] %v3006_v61  ;;  %v2986_v30 = vadd.f32 %v2930_v25, %v2631_v46  ;;  %v4407_v21 = vpop.f32.mrb[161].mxu0 }
 0xc11   : > { %v3007_v35 = vadd.f32 %v6527_v51, %v2986_v30 }
 0xc12   : > { %v2935_v22 = vpop.f32.mrb[162].mxu0 }
 0xc13   : > { %3020 = vst [vmem:[%s6532_s18 + $0x10] sm:$0xff] %v3007_v35  ;;  %v2987_v14 = vadd.f32 %v2935_v22, %v2632_v38  ;;  %v4410_v17 = vpop.f32.mrb[163].mxu0 }
 0xc15   : > { %v3008_v29 = vadd.f32 %v6527_v51, %v2987_v14 }
 0xc16   : > { %v2940_v55 = vpop.f32.mrb[164].mxu0 }
 0xc17   : > { %3021 = vst [vmem:[%s6532_s18 + $0x18] sm:$0xff] %v3008_v29  ;;  %v2988_v4 = vadd.f32 %v2940_v55, %v2633_v18  ;;  %v4413_v52 = vpop.f32.mrb[165].mxu0 }
 0xc19   : > { %v3009_v46 = vadd.f32 %v6527_v51, %v2988_v4 }
 0xc1a   : > { %v2945_v32 = vpop.f32.mrb[166].mxu0 }
 0xc1b   : > { %3022 = vst [vmem:[%s6532_s18 + $0x20] sm:$0xff] %v3009_v46  ;;  %v2989_v47 = vadd.f32 %v2945_v32, %v2634_v39  ;;  %v4416_v12 = vpop.f32.mrb[167].mxu0 }
 0xc1d   : > { %v3010_v38 = vadd.f32 %v6527_v51, %v2989_v47 }
 0xc1e   : > { %v2950_v8 = vpop.f32.mrb[168].mxu0 }
 0xc1f   : > { %3023 = vst [vmem:[%s6532_s18 + $0x28] sm:$0xff] %v3010_v38  ;;  %v2990_v9 = vadd.f32 %v2950_v8, %v2635_v3  ;;  %v4419_v57 = vpop.f32.mrb[169].mxu0 }
 0xc21   : > { %v3011_v18 = vadd.f32 %v6527_v51, %v2990_v9 }
 0xc22   : > { %v2955_v53 = vpop.f32.mrb[170].mxu0 }
 0xc23   : > { %3024 = vst [vmem:[%s6532_s18 + $0x30] sm:$0xff] %v3011_v18  ;;  %v2991_v16 = vadd.f32 %v2955_v53, %v2636_v54  ;;  %v4422_v36 = vpop.f32.mrb[171].mxu0 }
 0xc25   : > { %v3012_v39 = vadd.f32 %v6527_v51, %v2991_v16 }
 0xc26   : > { %v2960_v58 = vpop.f32.mrb[172].mxu0 }
 0xc27   : > { %3025 = vst [vmem:[%s6532_s18 + $0x38] sm:$0xff] %v3012_v39  ;;  %v2992_v7 = vadd.f32 %v2960_v58, %v2637_v62  ;;  %v4425_v33 = vpop.f32.mrb[173].mxu0 }
 0xc29   : > { %v3013_v3 = vadd.f32 %v6527_v51, %v2992_v7 }
 0xc2a   : > { %v2965_v40 = vpop.f32.mrb[174].mxu0 }
 0xc2b   : > { %3026 = vst [vmem:[%s6532_s18 + $0x40] sm:$0xff] %v3013_v3  ;;  %v2993_v59 = vadd.f32 %v2965_v40, %v2638_v42  ;;  %v4428_v41 = vpop.f32.mrb[175].mxu0 }
 0xc2d   : > { %v3014_v54 = vadd.f32 %v6527_v51, %v2993_v59 }
 0xc2e   : > { %v2970_v50 = vpop.f32.mrb[182].mxu1 }
 0xc2f   : > { %3027 = vst [vmem:[%s6532_s18 + $0x48] sm:$0xff] %v3014_v54  ;;  %v2994_v49 = vadd.f32 %v2970_v50, %v2639_v63  ;;  %v4431_v62 = vpop.f32.mrb[183].mxu1 }
 0xc31   : > { %v3015_v26 = vadd.f32 %v6527_v51, %v2994_v49 }
 0xc32   : > { %v2975_v31 = vpop.f32.mrb[184].mxu1 }
 0xc33   : > { %3028 = vst [vmem:[%s6532_s18 + $0x50] sm:$0xff] %v3015_v26  ;;  %v2995_v45 = vadd.f32 %v2975_v31, %v2640_v43  ;;  %v4434_v56 = vpop.f32.mrb[185].mxu1 }
 0xc35   : > { %v3016_v42 = vadd.f32 %v6527_v51, %v2995_v45  ;;  %3038 = sbr.rel (!%p4795_p5) target bundleno = 3160 (0xc58), region = 48 }
 0xc36   : > { %v2980_v1 = vpop.f32.mrb[186].mxu1 }
 0xc37   : > { %3029 = vst [vmem:[%s6532_s18 + $0x58] sm:$0xff] %v3016_v42  ;;  %v2996_v27 = vadd.f32 %v2980_v1, %v2641_v24  ;;  %v4437_v37 = vpop.f32.mrb[187].mxu1 }
 0xc39   : > { %v3017_v60 = vadd.f32 %v6527_v51, %v2996_v27 }
 0xc3b   : > { %3030 = vst [vmem:[%s6532_s18 + $0x60] sm:$0xff] %v3017_v60 }
 0xc3c   : > { %s6660_s20 = smov (!%p3041_p11, %s3040_s20), 13 }
 0xc3d   : > { %s6590_s26 = sshll.u32 %s6660_s20, 7 }
 0xc3e   : > { %s3045_s28 = ssub.s32 1664, %s6590_s26 }
 0xc3f   : > { %3046 = vsyncadd %s6585_s19, %s3045_s28  ;;  %p3346_p12 = scmp.ne.s32.totalorder %s6590_s26, 0  ;;  %s3352_s29 = smul.u32 1664, %s4778_s25 }
 0xc40   : > { %s3051_s9 = sshll.u32 %s6532_s18, 4  ;;  %s4719_s13 = smov [#allocation2]   ;;  %s6602_s9 = int_to_ptr.vmem [resolvable:$true] %s3051_s9 }
 0xc41   : > { %s6600_s12 = scalar_lea.hbm %s6652_s6, %s3352_s29  ;;  %s4652_s10 = scalar_lea.vmem %s6602_s9, %s6590_s26 }
 0xc42   : > { %p4653_p13 = scmp.ne.s32.totalorder %s6602_s9, %s4652_s10  ;;  %s4656_s14 = sshll.u32 %s4719_s13, 4  ;;  %s4657_s14 = int_to_ptr.vmem [resolvable:$false] %s4656_s14 }
 0xc43   : > { %s4658_s25 = scalar_lea.vmem %s4657_s14, 3328  ;;  %p4659_p2 = scmp.lt.s32.totalorder %s6602_s9, %s4657_s14 }
 0xc44   : > { %p4654_p0 = pnand %p4653_p13, %p3346_p12  ;;  %p4660_p3 = scmp.lt.s32.totalorder %s4658_s25, %s4652_s10 }
 0xc46   : > { %p4655_p1 = pneg %p4654_p0  ;;  %p4661_p4 = por %p4660_p3, %p4659_p2 }
 0xc48   : > { %p4662_p5 = pnand %p4661_p4, %p4655_p1 }
 0xc4a   : > { %4665 = shalt.err (!%p4662_p5)
}
 0xc4b   : > { %s4666_s15 = scalar_lea.hbm %s6600_s12, %s6590_s26  ;;  %s4670_s18 = scalar_lea.hbm %s6652_s6, 3200 }
 0xc4c   : > { %p4667_p7 = scmp.ne.s32.totalorder %s6600_s12, %s4666_s15  ;;  %p4671_p10 = scmp.lt.u32.totalorder %s6600_s12, %s6652_s6 }
 0xc4d   : > { %p4672_p11 = scmp.lt.u32.totalorder %s4670_s18, %s4666_s15  ;;  %p4674_p0 = scmp.lt.u32.totalorder %s4666_s15, %s6600_s12 }
 0xc4e   : > { %p4668_p8 = pnand %p4667_p7, %p3346_p12 }
 0xc4f   : > { %p4673_p13 = por %p4672_p11, %p4671_p10 }
 0xc50   : > { %p4669_p9 = pneg %p4668_p8 }
 0xc51   : > { %p4675_p1 = por %p4674_p0, %p4673_p13 }
 0xc53   : > { %p4676_p2 = pnand %p4675_p1, %p4669_p9 }
 0xc55   : > { %4679 = shalt.err (!%p4676_p2)
}
 0xc56   : > { %s4720_s29 = smov 128   ;;  %s4721_s7 = smov 8  }
 0xc57   : > { %3057 = dma.vmem_to_hbm [thread:$0]  (%p3346_p12), %s6602_s9, %s6590_s26, %s6600_s12, %s6585_s19, %s4720_s29, %s4720_s29, %s4721_s7  }
 0xc58 PF: > { %p4614_p3 = scmp.ge.s32.totalorder %s4714_s24, 2  ;;  %s3066_s11 = sand.u32 1, %s4702_s21  }
 0xc59   : > { %s3067_s10 = scalar_lea.sflag [#allocation3], %s3066_s11 }
 0xc5a   : > { %p4611_p4 = pnand %p4614_p3, %p4799_p6 }
 0xc5c   : > { %4697 = dma.done.wait (!%p4611_p4), %s3067_s10, 1664  }
 0xc5d   : > { %4699 = vsyncadd (!%p4611_p4), %s3067_s10, 4294965632  ;;  %p16_p5 = scmp.ge.s32.totalorder %s4782_s27, 4   ;;  %s6655_s21 = smov %s4706_s22 }
 0xc5e   : > { %s6656_s22 = smov %s4710_s23  ;;  %s6657_s23 = smov %s4793_s30 }
 0xc5f   : > { %s6658_s24 = smov %s4782_s27  ;;  %18 = sbr.rel (!%p16_p5) target bundleno = 3 (0x3), region = 103 }
 0xc66   :  { %3072 = vsyncpa [#allocation3], 1 }
 0xc67   :  { %3074 = vsyncpa [#allocation3 + $0x1], 1 }

</bundles_post_ra>
